<compile_context>
chip_gen: v7x
topology: tpu7x:2x2x1
jax: 0.10.0
libtpu: 0.0.40
codegen_flags: <defaults>
</compile_context>

<pallas_src>
import math

import jax
import jax.numpy as jnp
from jax import lax
from jax.experimental import pallas as pl
from jax.experimental.pallas import tpu as pltpu

KSIZE = 7      # kernel_size=7 (default in the PyTorch module)
PAD = 3        # padding = 3 when kernel_size == 7
ROW_STRIP = 32  # finalize-conv strip height (bounds vreg pressure for large H)


def _vmem_budgets():
    """(input double-buffer byte budget, vmem_limit_bytes) per TPU generation."""
    cap = 64 * 1024 * 1024
    try:
        cap = int(getattr(pltpu.get_tpu_info(), "vmem_capacity_bytes", cap))
    except Exception:
        pass
    if cap >= 100 * 1024 * 1024:               # v5e / v6e: 128 MiB VMEM
        return 20 * 1024 * 1024, 64 * 1024 * 1024
    return 10 * 1024 * 1024, 44 * 1024 * 1024  # v7x: 64 MiB per TensorCore


def _sublane_multiple(itemsize):
    # second-minor block dim must respect native tiling: 8 (f32), 16 (bf16), 32 (i8)
    return max(8, 32 // int(itemsize))


def _pick_c_tile(C, HW, itemsize, budget_bytes, requested=None):
    """Channel tile: full C if it fits, else a native-tiling multiple (prefer divisor)."""
    sub = _sublane_multiple(itemsize)
    per_ch = HW * itemsize
    max_fit = max(1, budget_bytes // (2 * per_ch))   # double-buffered input block
    t = int(min(requested, C)) if requested is not None else int(min(max_fit, C))
    if t >= C:
        return C
    t = max(sub, (t // sub) * sub)
    if t >= C:
        return C
    for cand in range(t, sub - 1, -sub):             # prefer exact divisor of C
        if C % cand == 0:
            return cand
    return t


def spatial_attention(x, conv_w, *, c_tile=None):
    """x: (N, C, H, W) float (any dtype); conv_w: (1, 2, KSIZE, KSIZE) (OIHW, no bias)."""
    N, C, H, W = x.shape
    HW = H * W
    Hp, Wp = H + 2 * PAD, W + 2 * PAD
    itemsize = jnp.dtype(x.dtype).itemsize

    budget, vmem_limit = _vmem_budgets()
    c_tile = _pick_c_tile(C, HW, itemsize, budget, requested=c_tile)
    num_c = pl.cdiv(C, c_tile)
    ragged = (C % c_tile) != 0

    # Fold the 1/C "mean" scale into the avg-path taps; conv then consumes the sum map.
    w = conv_w.astype(jnp.float32)
    w_flat = jnp.concatenate([(w[0, 0] * (1.0 / float(C))).reshape(-1),
                              w[0, 1].reshape(-1)])          # (2*K*K,) scalars -> SMEM

    # Lane-dense streaming layout: contiguous reshape, H*W on the lane axis.
    x_flat = x.reshape(N, C, HW)

    def kernel(x_ref, w_ref, o_ref, sum_ref, max_ref, avgp_ref, maxp_ref):
        # x_ref:   (1, c_tile, HW) lane-dense input block, native dtype
        # w_ref:   (2*K*K,) conv weights in SMEM
        # o_ref:   (1, 1, H, W) output block (resident across the C grid axis)
        # sum_ref / max_ref:   (1, HW) f32 running channel-sum / channel-max
        # avgp_ref / maxp_ref: (Hp, Wp) zero-padded sum / max maps for the conv
        c = pl.program_id(1)
        last = pl.num_programs(1) - 1

        # ---- vectorized channel sum + max over this tile (widen after load) ----
        xt = x_ref[0].astype(jnp.float32)                    # (c_tile, HW)
        if ragged:  # trace-time branch: single vectorized tail mask, no scalar loop work
            ch = lax.broadcasted_iota(jnp.int32, (c_tile, 1), 0)
            valid = (c * c_tile + ch) < C
            xs = jnp.where(valid, xt, 0.0)
            xm = jnp.where(valid, xt, -jnp.inf)
        else:
            xs = xm = xt
        part_sum = jnp.sum(xs, axis=0, keepdims=True)        # (1, HW)
        part_max = jnp.max(xm, axis=0, keepdims=True)        # (1, HW)

        @pl.when(c == 0)
        def _init():
            sum_ref[...] = part_sum
            max_ref[...] = part_max

        @pl.when(c > 0)
        def _accumulate():
            sum_ref[...] = sum_ref[...] + part_sum
            max_ref[...] = jnp.maximum(max_ref[...], part_max)

        # ---- finalize: one-time relayout, zero-padded maps, 7x7 conv, sigmoid ----
        @pl.when(c == last)
        def _finalize():
            avgp_ref[...] = jnp.zeros_like(avgp_ref)
            maxp_ref[...] = jnp.zeros_like(maxp_ref)
            s_map = sum_ref[...]                             # (1, HW)
            m_map = max_ref[...]
            for r in range(H):                               # static, finalize-only relayout
                avgp_ref[PAD + r:PAD + r + 1, PAD:PAD + W] = s_map[:, r * W:(r + 1) * W]
                maxp_ref[PAD + r:PAD + r + 1, PAD:PAD + W] = m_map[:, r * W:(r + 1) * W]

            for s0 in range(0, H, ROW_STRIP):                # strip-mined conv rows
                sh = min(ROW_STRIP, H - s0)
                acc = jnp.zeros((sh, W), jnp.float32)
                for dh in range(KSIZE):
                    a_rows = avgp_ref[s0 + dh:s0 + dh + sh, :]    # (sh, Wp)
                    m_rows = maxp_ref[s0 + dh:s0 + dh + sh, :]    # (sh, Wp)
                    for dw in range(KSIZE):                       # 7x7 taps, unrolled
                        w_a = w_ref[dh * KSIZE + dw]
                        w_m = w_ref[KSIZE * KSIZE + dh * KSIZE + dw]
                        acc = (acc
                               + w_a * a_rows[:, dw:dw + W]
                               + w_m * m_rows[:, dw:dw + W])
                o_ref[0, 0, s0:s0 + sh, :] = jax.nn.sigmoid(acc)

    cost = pl.CostEstimate(
        flops=int(N * (2 * C * HW + 4 * KSIZE * KSIZE * HW)),
        transcendentals=int(N * HW),
        bytes_accessed=int(N * C * HW * itemsize + N * HW * 4 + 2 * KSIZE * KSIZE * 4),
    )

    # TODO(synk): for v7x small-batch (N==1) inference, add a second "parallel" grid
    # split (halo'd H strips or per-core C partials) so the 2nd TensorCore isn't idle.
    return pl.pallas_call(
        kernel,
        out_shape=jax.ShapeDtypeStruct((N, 1, H, W), jnp.float32),
        grid=(N, num_c),
        in_specs=[
            pl.BlockSpec((1, c_tile, HW), lambda n, c: (n, c, 0)),
            pl.BlockSpec(memory_space=pltpu.MemorySpace.SMEM),
        ],
        out_specs=pl.BlockSpec((1, 1, H, W), lambda n, c: (n, 0, 0, 0)),
        scratch_shapes=[
            pltpu.VMEM((1, HW), jnp.float32),    # running channel-sum (lane-dense)
            pltpu.VMEM((1, HW), jnp.float32),    # running channel-max (lane-dense)
            pltpu.VMEM((Hp, Wp), jnp.float32),   # zero-padded sum map for conv
            pltpu.VMEM((Hp, Wp), jnp.float32),   # zero-padded max map for conv
        ],
        compiler_params=pltpu.CompilerParams(
            dimension_semantics=("parallel", "arbitrary"),
            vmem_limit_bytes=vmem_limit,
        ),
        cost_estimate=cost,
    )(x_flat, w_flat)


if __name__ == "__main__":
    key = jax.random.PRNGKey(0)
    kx, kw = jax.random.split(key)

    # Small NCHW shapes consistent with the module's forward.
    N, C, H, W = 2, 16, 16, 16
    x = jax.random.normal(kx, (N, C, H, W), dtype=jnp.float32)

    # Deterministic Conv2d(2, 1, 7, bias=False) weight init:
    # PyTorch default kaiming_uniform(a=sqrt(5)) => U(-1/sqrt(fan_in), +1/sqrt(fan_in))
    fan_in = 2 * KSIZE * KSIZE
    bound = 1.0 / math.sqrt(fan_in)
    conv_w = jax.random.uniform(kw, (1, 2, KSIZE, KSIZE), dtype=jnp.float32,
                                minval=-bound, maxval=bound)

    # c_tile=8 -> 2 reduction steps over C (exercises the accumulator path).
    out = spatial_attention(x, conv_w, c_tile=8)
    out = jax.block_until_ready(out)
    # Default c_tile (whole C in one step).
    out1 = jax.block_until_ready(spatial_attention(x, conv_w))

    # Pure-JAX reference for correctness.
    avg_ref = jnp.mean(x, axis=1, keepdims=True)
    max_ref = jnp.max(x, axis=1, keepdims=True)
    feat = jnp.concatenate([avg_ref, max_ref], axis=1)
    ref = lax.conv_general_dilated(
        feat, conv_w, window_strides=(1, 1),
        padding=((PAD, PAD), (PAD, PAD)),
        dimension_numbers=("NCHW", "OIHW", "NCHW"))
    ref = jax.nn.sigmoid(ref)

    assert out.shape == (N, 1, H, W), out.shape
    assert jnp.allclose(out, ref, atol=1e-5, rtol=1e-5), \
        float(jnp.max(jnp.abs(out - ref)))
    assert jnp.allclose(out1, ref, atol=1e-5, rtol=1e-5), \
        float(jnp.max(jnp.abs(out1 - ref)))
    print("KERNEL_OK")
</pallas_src>

<mosaic_0001>
module attributes {stable_mosaic.version = 11 : i64} {
  func.func @kernel(%arg0: i32, %arg1: i32, %arg2: memref<1x8x256xf32, #tpu.memory_space<vmem>>, %arg3: memref<98xf32, #tpu.memory_space<smem>>, %arg4: memref<1x1x16x16xf32, #tpu.memory_space<vmem>>, %arg5: memref<1x256xf32, #tpu.memory_space<vmem>>, %arg6: memref<1x256xf32, #tpu.memory_space<vmem>>, %arg7: memref<22x22xf32, #tpu.memory_space<vmem>>, %arg8: memref<22x22xf32, #tpu.memory_space<vmem>>) attributes {dimension_semantics = [#tpu.dimension_semantics<parallel>, #tpu.dimension_semantics<arbitrary>], iteration_bounds = array<i64: 2, 2>, scalar_prefetch = 0 : i64, scratch_operands = 4 : i64, tpu.core_type = #tpu.core_type<tc>, window_params = [{transform_indices = @transform_0, window_bounds = array<i64: 1, 8, 256>}, {transform_indices = @transform_1, window_bounds = array<i64: 98>}, {transform_indices = @transform_2, window_bounds = array<i64: 1, 1, 16, 16>}]} {
    %c0 = arith.constant 0 : index
    %c0_0 = arith.constant 0 : index
    %c0_1 = arith.constant 0 : index
    %0 = vector.load %arg2[%c0, %c0_0, %c0_1] : memref<1x8x256xf32, #tpu.memory_space<vmem>>, vector<1x8x256xf32>
    %1 = vector.shape_cast %0 : vector<1x8x256xf32> to vector<8x256xf32>
    %cst = arith.constant dense<0.000000e+00> : vector<256xf32>
    %2 = vector.multi_reduction <add>, %1, %cst [0] : vector<8x256xf32> to vector<256xf32>
    %3 = vector.shape_cast %2 : vector<256xf32> to vector<1x256xf32>
    %cst_2 = arith.constant dense<0xFF800000> : vector<256xf32>
    %4 = vector.multi_reduction <maximumf>, %1, %cst_2 [0] : vector<8x256xf32> to vector<256xf32>
    %5 = vector.shape_cast %4 : vector<256xf32> to vector<1x256xf32>
    %c0_i32 = arith.constant 0 : i32
    %6 = arith.cmpi eq, %arg1, %c0_i32 : i32
    %7 = arith.extui %6 : i1 to i32
    %c0_i32_3 = arith.constant 0 : i32
    %8 = arith.cmpi ne, %7, %c0_i32_3 : i32
    scf.if %8 {
      %c0_7 = arith.constant 0 : index
      %c0_8 = arith.constant 0 : index
      %15 = vector.load %arg5[%c0_7, %c0_8] : memref<1x256xf32, #tpu.memory_space<vmem>>, vector<1x256xf32>
      tpu.vector_store %arg5[%c0_7, %c0_8], %3 {strides = array<i32>} : memref<1x256xf32, #tpu.memory_space<vmem>>, vector<1x256xf32>,
      %c0_9 = arith.constant 0 : index
      %c0_10 = arith.constant 0 : index
      %16 = vector.load %arg6[%c0_9, %c0_10] : memref<1x256xf32, #tpu.memory_space<vmem>>, vector<1x256xf32>
      tpu.vector_store %arg6[%c0_9, %c0_10], %5 {strides = array<i32>} : memref<1x256xf32, #tpu.memory_space<vmem>>, vector<1x256xf32>,
    } else {
    }
    %c0_i32_4 = arith.constant 0 : i32
    %9 = arith.cmpi sgt, %arg1, %c0_i32_4 : i32
    %10 = arith.extui %9 : i1 to i32
    %c0_i32_5 = arith.constant 0 : i32
    %11 = arith.cmpi ne, %10, %c0_i32_5 : i32
    scf.if %11 {
      %c0_7 = arith.constant 0 : index
      %c0_8 = arith.constant 0 : index
      %15 = vector.load %arg5[%c0_7, %c0_8] : memref<1x256xf32, #tpu.memory_space<vmem>>, vector<1x256xf32>
      %16 = arith.addf %15, %3 : vector<1x256xf32>
      %c0_9 = arith.constant 0 : index
      %c0_10 = arith.constant 0 : index
      %17 = vector.load %arg5[%c0_9, %c0_10] : memref<1x256xf32, #tpu.memory_space<vmem>>, vector<1x256xf32>
      tpu.vector_store %arg5[%c0_9, %c0_10], %16 {strides = array<i32>} : memref<1x256xf32, #tpu.memory_space<vmem>>, vector<1x256xf32>,
      %c0_11 = arith.constant 0 : index
      %c0_12 = arith.constant 0 : index
      %18 = vector.load %arg6[%c0_11, %c0_12] : memref<1x256xf32, #tpu.memory_space<vmem>>, vector<1x256xf32>
      %19 = arith.maximumf %18, %5 : vector<1x256xf32>
      %c0_13 = arith.constant 0 : index
      %c0_14 = arith.constant 0 : index
      %20 = vector.load %arg6[%c0_13, %c0_14] : memref<1x256xf32, #tpu.memory_space<vmem>>, vector<1x256xf32>
      tpu.vector_store %arg6[%c0_13, %c0_14], %19 {strides = array<i32>} : memref<1x256xf32, #tpu.memory_space<vmem>>, vector<1x256xf32>,
    } else {
    }
    %c1_i32 = arith.constant 1 : i32
    %12 = arith.cmpi eq, %arg1, %c1_i32 : i32
    %13 = arith.extui %12 : i1 to i32
    %c0_i32_6 = arith.constant 0 : i32
    %14 = arith.cmpi ne, %13, %c0_i32_6 : i32
    scf.if %14 {
      %cst_7 = arith.constant 0.000000e+00 : f32
      %15 = vector.broadcast %cst_7 : f32 to vector<22x22xf32>
      %c0_8 = arith.constant 0 : index
      %c0_9 = arith.constant 0 : index
      %16 = vector.load %arg7[%c0_8, %c0_9] : memref<22x22xf32, #tpu.memory_space<vmem>>, vector<22x22xf32>
      tpu.vector_store %arg7[%c0_8, %c0_9], %15 {strides = array<i32>} : memref<22x22xf32, #tpu.memory_space<vmem>>, vector<22x22xf32>,
      %cst_10 = arith.constant 0.000000e+00 : f32
      %17 = vector.broadcast %cst_10 : f32 to vector<22x22xf32>
      %c0_11 = arith.constant 0 : index
      %c0_12 = arith.constant 0 : index
      %18 = vector.load %arg8[%c0_11, %c0_12] : memref<22x22xf32, #tpu.memory_space<vmem>>, vector<22x22xf32>
      tpu.vector_store %arg8[%c0_11, %c0_12], %17 {strides = array<i32>} : memref<22x22xf32, #tpu.memory_space<vmem>>, vector<22x22xf32>,
      %c0_13 = arith.constant 0 : index
      %c0_14 = arith.constant 0 : index
      %19 = vector.load %arg5[%c0_13, %c0_14] : memref<1x256xf32, #tpu.memory_space<vmem>>, vector<1x256xf32>
      %c0_15 = arith.constant 0 : index
      %c0_16 = arith.constant 0 : index
      %20 = vector.load %arg6[%c0_15, %c0_16] : memref<1x256xf32, #tpu.memory_space<vmem>>, vector<1x256xf32>
      %21 = vector.extract_strided_slice %19 {offsets = [0, 0], sizes = [1, 16], strides = [1, 1]} : vector<1x256xf32> to vector<1x16xf32>
      %c3 = arith.constant 3 : index
      %c3_17 = arith.constant 3 : index
      %22 = vector.load %arg7[%c3, %c3_17] : memref<22x22xf32, #tpu.memory_space<vmem>>, vector<1x16xf32>
      tpu.vector_store %arg7[%c3, %c3_17], %21 {strides = array<i32>} : memref<22x22xf32, #tpu.memory_space<vmem>>, vector<1x16xf32>,
      %23 = vector.extract_strided_slice %20 {offsets = [0, 0], sizes = [1, 16], strides = [1, 1]} : vector<1x256xf32> to vector<1x16xf32>
      %c3_18 = arith.constant 3 : index
      %c3_19 = arith.constant 3 : index
      %24 = vector.load %arg8[%c3_18, %c3_19] : memref<22x22xf32, #tpu.memory_space<vmem>>, vector<1x16xf32>
      tpu.vector_store %arg8[%c3_18, %c3_19], %23 {strides = array<i32>} : memref<22x22xf32, #tpu.memory_space<vmem>>, vector<1x16xf32>,
      %25 = vector.extract_strided_slice %19 {offsets = [0, 16], sizes = [1, 16], strides = [1, 1]} : vector<1x256xf32> to vector<1x16xf32>
      %c4 = arith.constant 4 : index
      %c3_20 = arith.constant 3 : index
      %26 = vector.load %arg7[%c4, %c3_20] : memref<22x22xf32, #tpu.memory_space<vmem>>, vector<1x16xf32>
      tpu.vector_store %arg7[%c4, %c3_20], %25 {strides = array<i32>} : memref<22x22xf32, #tpu.memory_space<vmem>>, vector<1x16xf32>,
      %27 = vector.extract_strided_slice %20 {offsets = [0, 16], sizes = [1, 16], strides = [1, 1]} : vector<1x256xf32> to vector<1x16xf32>
      %c4_21 = arith.constant 4 : index
      %c3_22 = arith.constant 3 : index
      %28 = vector.load %arg8[%c4_21, %c3_22] : memref<22x22xf32, #tpu.memory_space<vmem>>, vector<1x16xf32>
      tpu.vector_store %arg8[%c4_21, %c3_22], %27 {strides = array<i32>} : memref<22x22xf32, #tpu.memory_space<vmem>>, vector<1x16xf32>,
      %29 = vector.extract_strided_slice %19 {offsets = [0, 32], sizes = [1, 16], strides = [1, 1]} : vector<1x256xf32> to vector<1x16xf32>
      %c5 = arith.constant 5 : index
      %c3_23 = arith.constant 3 : index
      %30 = vector.load %arg7[%c5, %c3_23] : memref<22x22xf32, #tpu.memory_space<vmem>>, vector<1x16xf32>
      tpu.vector_store %arg7[%c5, %c3_23], %29 {strides = array<i32>} : memref<22x22xf32, #tpu.memory_space<vmem>>, vector<1x16xf32>,
      %31 = vector.extract_strided_slice %20 {offsets = [0, 32], sizes = [1, 16], strides = [1, 1]} : vector<1x256xf32> to vector<1x16xf32>
      %c5_24 = arith.constant 5 : index
      %c3_25 = arith.constant 3 : index
      %32 = vector.load %arg8[%c5_24, %c3_25] : memref<22x22xf32, #tpu.memory_space<vmem>>, vector<1x16xf32>
      tpu.vector_store %arg8[%c5_24, %c3_25], %31 {strides = array<i32>} : memref<22x22xf32, #tpu.memory_space<vmem>>, vector<1x16xf32>,
      %33 = vector.extract_strided_slice %19 {offsets = [0, 48], sizes = [1, 16], strides = [1, 1]} : vector<1x256xf32> to vector<1x16xf32>
      %c6 = arith.constant 6 : index
      %c3_26 = arith.constant 3 : index
      %34 = vector.load %arg7[%c6, %c3_26] : memref<22x22xf32, #tpu.memory_space<vmem>>, vector<1x16xf32>
      tpu.vector_store %arg7[%c6, %c3_26], %33 {strides = array<i32>} : memref<22x22xf32, #tpu.memory_space<vmem>>, vector<1x16xf32>,
      %35 = vector.extract_strided_slice %20 {offsets = [0, 48], sizes = [1, 16], strides = [1, 1]} : vector<1x256xf32> to vector<1x16xf32>
      %c6_27 = arith.constant 6 : index
      %c3_28 = arith.constant 3 : index
      %36 = vector.load %arg8[%c6_27, %c3_28] : memref<22x22xf32, #tpu.memory_space<vmem>>, vector<1x16xf32>
      tpu.vector_store %arg8[%c6_27, %c3_28], %35 {strides = array<i32>} : memref<22x22xf32, #tpu.memory_space<vmem>>, vector<1x16xf32>,
      %37 = vector.extract_strided_slice %19 {offsets = [0, 64], sizes = [1, 16], strides = [1, 1]} : vector<1x256xf32> to vector<1x16xf32>
      %c7 = arith.constant 7 : index
      %c3_29 = arith.constant 3 : index
      %38 = vector.load %arg7[%c7, %c3_29] : memref<22x22xf32, #tpu.memory_space<vmem>>, vector<1x16xf32>
      tpu.vector_store %arg7[%c7, %c3_29], %37 {strides = array<i32>} : memref<22x22xf32, #tpu.memory_space<vmem>>, vector<1x16xf32>,
      %39 = vector.extract_strided_slice %20 {offsets = [0, 64], sizes = [1, 16], strides = [1, 1]} : vector<1x256xf32> to vector<1x16xf32>
      %c7_30 = arith.constant 7 : index
      %c3_31 = arith.constant 3 : index
      %40 = vector.load %arg8[%c7_30, %c3_31] : memref<22x22xf32, #tpu.memory_space<vmem>>, vector<1x16xf32>
      tpu.vector_store %arg8[%c7_30, %c3_31], %39 {strides = array<i32>} : memref<22x22xf32, #tpu.memory_space<vmem>>, vector<1x16xf32>,
      %41 = vector.extract_strided_slice %19 {offsets = [0, 80], sizes = [1, 16], strides = [1, 1]} : vector<1x256xf32> to vector<1x16xf32>
      %c8 = arith.constant 8 : index
      %c3_32 = arith.constant 3 : index
      %42 = vector.load %arg7[%c8, %c3_32] : memref<22x22xf32, #tpu.memory_space<vmem>>, vector<1x16xf32>
      tpu.vector_store %arg7[%c8, %c3_32], %41 {strides = array<i32>} : memref<22x22xf32, #tpu.memory_space<vmem>>, vector<1x16xf32>,
      %43 = vector.extract_strided_slice %20 {offsets = [0, 80], sizes = [1, 16], strides = [1, 1]} : vector<1x256xf32> to vector<1x16xf32>
      %c8_33 = arith.constant 8 : index
      %c3_34 = arith.constant 3 : index
      %44 = vector.load %arg8[%c8_33, %c3_34] : memref<22x22xf32, #tpu.memory_space<vmem>>, vector<1x16xf32>
      tpu.vector_store %arg8[%c8_33, %c3_34], %43 {strides = array<i32>} : memref<22x22xf32, #tpu.memory_space<vmem>>, vector<1x16xf32>,
      %45 = vector.extract_strided_slice %19 {offsets = [0, 96], sizes = [1, 16], strides = [1, 1]} : vector<1x256xf32> to vector<1x16xf32>
      %c9 = arith.constant 9 : index
      %c3_35 = arith.constant 3 : index
      %46 = vector.load %arg7[%c9, %c3_35] : memref<22x22xf32, #tpu.memory_space<vmem>>, vector<1x16xf32>
      tpu.vector_store %arg7[%c9, %c3_35], %45 {strides = array<i32>} : memref<22x22xf32, #tpu.memory_space<vmem>>, vector<1x16xf32>,
      %47 = vector.extract_strided_slice %20 {offsets = [0, 96], sizes = [1, 16], strides = [1, 1]} : vector<1x256xf32> to vector<1x16xf32>
      %c9_36 = arith.constant 9 : index
      %c3_37 = arith.constant 3 : index
      %48 = vector.load %arg8[%c9_36, %c3_37] : memref<22x22xf32, #tpu.memory_space<vmem>>, vector<1x16xf32>
      tpu.vector_store %arg8[%c9_36, %c3_37], %47 {strides = array<i32>} : memref<22x22xf32, #tpu.memory_space<vmem>>, vector<1x16xf32>,
      %49 = vector.extract_strided_slice %19 {offsets = [0, 112], sizes = [1, 16], strides = [1, 1]} : vector<1x256xf32> to vector<1x16xf32>
      %c10 = arith.constant 10 : index
      %c3_38 = arith.constant 3 : index
      %50 = vector.load %arg7[%c10, %c3_38] : memref<22x22xf32, #tpu.memory_space<vmem>>, vector<1x16xf32>
      tpu.vector_store %arg7[%c10, %c3_38], %49 {strides = array<i32>} : memref<22x22xf32, #tpu.memory_space<vmem>>, vector<1x16xf32>,
      %51 = vector.extract_strided_slice %20 {offsets = [0, 112], sizes = [1, 16], strides = [1, 1]} : vector<1x256xf32> to vector<1x16xf32>
      %c10_39 = arith.constant 10 : index
      %c3_40 = arith.constant 3 : index
      %52 = vector.load %arg8[%c10_39, %c3_40] : memref<22x22xf32, #tpu.memory_space<vmem>>, vector<1x16xf32>
      tpu.vector_store %arg8[%c10_39, %c3_40], %51 {strides = array<i32>} : memref<22x22xf32, #tpu.memory_space<vmem>>, vector<1x16xf32>,
      %53 = vector.extract_strided_slice %19 {offsets = [0, 128], sizes = [1, 16], strides = [1, 1]} : vector<1x256xf32> to vector<1x16xf32>
      %c11 = arith.constant 11 : index
      %c3_41 = arith.constant 3 : index
      %54 = vector.load %arg7[%c11, %c3_41] : memref<22x22xf32, #tpu.memory_space<vmem>>, vector<1x16xf32>
      tpu.vector_store %arg7[%c11, %c3_41], %53 {strides = array<i32>} : memref<22x22xf32, #tpu.memory_space<vmem>>, vector<1x16xf32>,
      %55 = vector.extract_strided_slice %20 {offsets = [0, 128], sizes = [1, 16], strides = [1, 1]} : vector<1x256xf32> to vector<1x16xf32>
      %c11_42 = arith.constant 11 : index
      %c3_43 = arith.constant 3 : index
      %56 = vector.load %arg8[%c11_42, %c3_43] : memref<22x22xf32, #tpu.memory_space<vmem>>, vector<1x16xf32>
      tpu.vector_store %arg8[%c11_42, %c3_43], %55 {strides = array<i32>} : memref<22x22xf32, #tpu.memory_space<vmem>>, vector<1x16xf32>,
      %57 = vector.extract_strided_slice %19 {offsets = [0, 144], sizes = [1, 16], strides = [1, 1]} : vector<1x256xf32> to vector<1x16xf32>
      %c12 = arith.constant 12 : index
      %c3_44 = arith.constant 3 : index
      %58 = vector.load %arg7[%c12, %c3_44] : memref<22x22xf32, #tpu.memory_space<vmem>>, vector<1x16xf32>
      tpu.vector_store %arg7[%c12, %c3_44], %57 {strides = array<i32>} : memref<22x22xf32, #tpu.memory_space<vmem>>, vector<1x16xf32>,
      %59 = vector.extract_strided_slice %20 {offsets = [0, 144], sizes = [1, 16], strides = [1, 1]} : vector<1x256xf32> to vector<1x16xf32>
      %c12_45 = arith.constant 12 : index
      %c3_46 = arith.constant 3 : index
      %60 = vector.load %arg8[%c12_45, %c3_46] : memref<22x22xf32, #tpu.memory_space<vmem>>, vector<1x16xf32>
      tpu.vector_store %arg8[%c12_45, %c3_46], %59 {strides = array<i32>} : memref<22x22xf32, #tpu.memory_space<vmem>>, vector<1x16xf32>,
      %61 = vector.extract_strided_slice %19 {offsets = [0, 160], sizes = [1, 16], strides = [1, 1]} : vector<1x256xf32> to vector<1x16xf32>
      %c13 = arith.constant 13 : index
      %c3_47 = arith.constant 3 : index
      %62 = vector.load %arg7[%c13, %c3_47] : memref<22x22xf32, #tpu.memory_space<vmem>>, vector<1x16xf32>
      tpu.vector_store %arg7[%c13, %c3_47], %61 {strides = array<i32>} : memref<22x22xf32, #tpu.memory_space<vmem>>, vector<1x16xf32>,
      %63 = vector.extract_strided_slice %20 {offsets = [0, 160], sizes = [1, 16], strides = [1, 1]} : vector<1x256xf32> to vector<1x16xf32>
      %c13_48 = arith.constant 13 : index
      %c3_49 = arith.constant 3 : index
      %64 = vector.load %arg8[%c13_48, %c3_49] : memref<22x22xf32, #tpu.memory_space<vmem>>, vector<1x16xf32>
      tpu.vector_store %arg8[%c13_48, %c3_49], %63 {strides = array<i32>} : memref<22x22xf32, #tpu.memory_space<vmem>>, vector<1x16xf32>,
      %65 = vector.extract_strided_slice %19 {offsets = [0, 176], sizes = [1, 16], strides = [1, 1]} : vector<1x256xf32> to vector<1x16xf32>
      %c14 = arith.constant 14 : index
      %c3_50 = arith.constant 3 : index
      %66 = vector.load %arg7[%c14, %c3_50] : memref<22x22xf32, #tpu.memory_space<vmem>>, vector<1x16xf32>
      tpu.vector_store %arg7[%c14, %c3_50], %65 {strides = array<i32>} : memref<22x22xf32, #tpu.memory_space<vmem>>, vector<1x16xf32>,
      %67 = vector.extract_strided_slice %20 {offsets = [0, 176], sizes = [1, 16], strides = [1, 1]} : vector<1x256xf32> to vector<1x16xf32>
      %c14_51 = arith.constant 14 : index
      %c3_52 = arith.constant 3 : index
      %68 = vector.load %arg8[%c14_51, %c3_52] : memref<22x22xf32, #tpu.memory_space<vmem>>, vector<1x16xf32>
      tpu.vector_store %arg8[%c14_51, %c3_52], %67 {strides = array<i32>} : memref<22x22xf32, #tpu.memory_space<vmem>>, vector<1x16xf32>,
      %69 = vector.extract_strided_slice %19 {offsets = [0, 192], sizes = [1, 16], strides = [1, 1]} : vector<1x256xf32> to vector<1x16xf32>
      %c15 = arith.constant 15 : index
      %c3_53 = arith.constant 3 : index
      %70 = vector.load %arg7[%c15, %c3_53] : memref<22x22xf32, #tpu.memory_space<vmem>>, vector<1x16xf32>
      tpu.vector_store %arg7[%c15, %c3_53], %69 {strides = array<i32>} : memref<22x22xf32, #tpu.memory_space<vmem>>, vector<1x16xf32>,
      %71 = vector.extract_strided_slice %20 {offsets = [0, 192], sizes = [1, 16], strides = [1, 1]} : vector<1x256xf32> to vector<1x16xf32>
      %c15_54 = arith.constant 15 : index
      %c3_55 = arith.constant 3 : index
      %72 = vector.load %arg8[%c15_54, %c3_55] : memref<22x22xf32, #tpu.memory_space<vmem>>, vector<1x16xf32>
      tpu.vector_store %arg8[%c15_54, %c3_55], %71 {strides = array<i32>} : memref<22x22xf32, #tpu.memory_space<vmem>>, vector<1x16xf32>,
      %73 = vector.extract_strided_slice %19 {offsets = [0, 208], sizes = [1, 16], strides = [1, 1]} : vector<1x256xf32> to vector<1x16xf32>
      %c16 = arith.constant 16 : index
      %c3_56 = arith.constant 3 : index
      %74 = vector.load %arg7[%c16, %c3_56] : memref<22x22xf32, #tpu.memory_space<vmem>>, vector<1x16xf32>
      tpu.vector_store %arg7[%c16, %c3_56], %73 {strides = array<i32>} : memref<22x22xf32, #tpu.memory_space<vmem>>, vector<1x16xf32>,
      %75 = vector.extract_strided_slice %20 {offsets = [0, 208], sizes = [1, 16], strides = [1, 1]} : vector<1x256xf32> to vector<1x16xf32>
      %c16_57 = arith.constant 16 : index
      %c3_58 = arith.constant 3 : index
      %76 = vector.load %arg8[%c16_57, %c3_58] : memref<22x22xf32, #tpu.memory_space<vmem>>, vector<1x16xf32>
      tpu.vector_store %arg8[%c16_57, %c3_58], %75 {strides = array<i32>} : memref<22x22xf32, #tpu.memory_space<vmem>>, vector<1x16xf32>,
      %77 = vector.extract_strided_slice %19 {offsets = [0, 224], sizes = [1, 16], strides = [1, 1]} : vector<1x256xf32> to vector<1x16xf32>
      %c17 = arith.constant 17 : index
      %c3_59 = arith.constant 3 : index
      %78 = vector.load %arg7[%c17, %c3_59] : memref<22x22xf32, #tpu.memory_space<vmem>>, vector<1x16xf32>
      tpu.vector_store %arg7[%c17, %c3_59], %77 {strides = array<i32>} : memref<22x22xf32, #tpu.memory_space<vmem>>, vector<1x16xf32>,
      %79 = vector.extract_strided_slice %20 {offsets = [0, 224], sizes = [1, 16], strides = [1, 1]} : vector<1x256xf32> to vector<1x16xf32>
      %c17_60 = arith.constant 17 : index
      %c3_61 = arith.constant 3 : index
      %80 = vector.load %arg8[%c17_60, %c3_61] : memref<22x22xf32, #tpu.memory_space<vmem>>, vector<1x16xf32>
      tpu.vector_store %arg8[%c17_60, %c3_61], %79 {strides = array<i32>} : memref<22x22xf32, #tpu.memory_space<vmem>>, vector<1x16xf32>,
      %81 = vector.extract_strided_slice %19 {offsets = [0, 240], sizes = [1, 16], strides = [1, 1]} : vector<1x256xf32> to vector<1x16xf32>
      %c18 = arith.constant 18 : index
      %c3_62 = arith.constant 3 : index
      %82 = vector.load %arg7[%c18, %c3_62] : memref<22x22xf32, #tpu.memory_space<vmem>>, vector<1x16xf32>
      tpu.vector_store %arg7[%c18, %c3_62], %81 {strides = array<i32>} : memref<22x22xf32, #tpu.memory_space<vmem>>, vector<1x16xf32>,
      %83 = vector.extract_strided_slice %20 {offsets = [0, 240], sizes = [1, 16], strides = [1, 1]} : vector<1x256xf32> to vector<1x16xf32>
      %c18_63 = arith.constant 18 : index
      %c3_64 = arith.constant 3 : index
      %84 = vector.load %arg8[%c18_63, %c3_64] : memref<22x22xf32, #tpu.memory_space<vmem>>, vector<1x16xf32>
      tpu.vector_store %arg8[%c18_63, %c3_64], %83 {strides = array<i32>} : memref<22x22xf32, #tpu.memory_space<vmem>>, vector<1x16xf32>,
      %cst_65 = arith.constant 0.000000e+00 : f32
      %85 = vector.broadcast %cst_65 : f32 to vector<16x16xf32>
      %c0_66 = arith.constant 0 : index
      %c0_67 = arith.constant 0 : index
      %86 = vector.load %arg7[%c0_66, %c0_67] : memref<22x22xf32, #tpu.memory_space<vmem>>, vector<16x22xf32>
      %c0_68 = arith.constant 0 : index
      %c0_69 = arith.constant 0 : index
      %87 = vector.load %arg8[%c0_68, %c0_69] : memref<22x22xf32, #tpu.memory_space<vmem>>, vector<16x22xf32>
      %c0_70 = arith.constant 0 : index
      %88 = memref.load %arg3[%c0_70] : memref<98xf32, #tpu.memory_space<smem>>
      %c49 = arith.constant 49 : index
      %89 = memref.load %arg3[%c49] : memref<98xf32, #tpu.memory_space<smem>>
      %90 = vector.extract_strided_slice %86 {offsets = [0, 0], sizes = [16, 16], strides = [1, 1]} : vector<16x22xf32> to vector<16x16xf32>
      %91 = vector.broadcast %88 : f32 to vector<16x16xf32>
      %92 = arith.mulf %91, %90 : vector<16x16xf32>
      %93 = arith.addf %85, %92 : vector<16x16xf32>
      %94 = vector.extract_strided_slice %87 {offsets = [0, 0], sizes = [16, 16], strides = [1, 1]} : vector<16x22xf32> to vector<16x16xf32>
      %95 = vector.broadcast %89 : f32 to vector<16x16xf32>
      %96 = arith.mulf %95, %94 : vector<16x16xf32>
      %97 = arith.addf %93, %96 : vector<16x16xf32>
      %c1 = arith.constant 1 : index
      %98 = memref.load %arg3[%c1] : memref<98xf32, #tpu.memory_space<smem>>
      %c50 = arith.constant 50 : index
      %99 = memref.load %arg3[%c50] : memref<98xf32, #tpu.memory_space<smem>>
      %100 = vector.extract_strided_slice %86 {offsets = [0, 1], sizes = [16, 16], strides = [1, 1]} : vector<16x22xf32> to vector<16x16xf32>
      %101 = vector.broadcast %98 : f32 to vector<16x16xf32>
      %102 = arith.mulf %101, %100 : vector<16x16xf32>
      %103 = arith.addf %97, %102 : vector<16x16xf32>
      %104 = vector.extract_strided_slice %87 {offsets = [0, 1], sizes = [16, 16], strides = [1, 1]} : vector<16x22xf32> to vector<16x16xf32>
      %105 = vector.broadcast %99 : f32 to vector<16x16xf32>
      %106 = arith.mulf %105, %104 : vector<16x16xf32>
      %107 = arith.addf %103, %106 : vector<16x16xf32>
      %c2 = arith.constant 2 : index
      %108 = memref.load %arg3[%c2] : memref<98xf32, #tpu.memory_space<smem>>
      %c51 = arith.constant 51 : index
      %109 = memref.load %arg3[%c51] : memref<98xf32, #tpu.memory_space<smem>>
      %110 = vector.extract_strided_slice %86 {offsets = [0, 2], sizes = [16, 16], strides = [1, 1]} : vector<16x22xf32> to vector<16x16xf32>
      %111 = vector.broadcast %108 : f32 to vector<16x16xf32>
      %112 = arith.mulf %111, %110 : vector<16x16xf32>
      %113 = arith.addf %107, %112 : vector<16x16xf32>
      %114 = vector.extract_strided_slice %87 {offsets = [0, 2], sizes = [16, 16], strides = [1, 1]} : vector<16x22xf32> to vector<16x16xf32>
      %115 = vector.broadcast %109 : f32 to vector<16x16xf32>
      %116 = arith.mulf %115, %114 : vector<16x16xf32>
      %117 = arith.addf %113, %116 : vector<16x16xf32>
      %c3_71 = arith.constant 3 : index
      %118 = memref.load %arg3[%c3_71] : memref<98xf32, #tpu.memory_space<smem>>
      %c52 = arith.constant 52 : index
      %119 = memref.load %arg3[%c52] : memref<98xf32, #tpu.memory_space<smem>>
      %120 = vector.extract_strided_slice %86 {offsets = [0, 3], sizes = [16, 16], strides = [1, 1]} : vector<16x22xf32> to vector<16x16xf32>
      %121 = vector.broadcast %118 : f32 to vector<16x16xf32>
      %122 = arith.mulf %121, %120 : vector<16x16xf32>
      %123 = arith.addf %117, %122 : vector<16x16xf32>
      %124 = vector.extract_strided_slice %87 {offsets = [0, 3], sizes = [16, 16], strides = [1, 1]} : vector<16x22xf32> to vector<16x16xf32>
      %125 = vector.broadcast %119 : f32 to vector<16x16xf32>
      %126 = arith.mulf %125, %124 : vector<16x16xf32>
      %127 = arith.addf %123, %126 : vector<16x16xf32>
      %c4_72 = arith.constant 4 : index
      %128 = memref.load %arg3[%c4_72] : memref<98xf32, #tpu.memory_space<smem>>
      %c53 = arith.constant 53 : index
      %129 = memref.load %arg3[%c53] : memref<98xf32, #tpu.memory_space<smem>>
      %130 = vector.extract_strided_slice %86 {offsets = [0, 4], sizes = [16, 16], strides = [1, 1]} : vector<16x22xf32> to vector<16x16xf32>
      %131 = vector.broadcast %128 : f32 to vector<16x16xf32>
      %132 = arith.mulf %131, %130 : vector<16x16xf32>
      %133 = arith.addf %127, %132 : vector<16x16xf32>
      %134 = vector.extract_strided_slice %87 {offsets = [0, 4], sizes = [16, 16], strides = [1, 1]} : vector<16x22xf32> to vector<16x16xf32>
      %135 = vector.broadcast %129 : f32 to vector<16x16xf32>
      %136 = arith.mulf %135, %134 : vector<16x16xf32>
      %137 = arith.addf %133, %136 : vector<16x16xf32>
      %c5_73 = arith.constant 5 : index
      %138 = memref.load %arg3[%c5_73] : memref<98xf32, #tpu.memory_space<smem>>
      %c54 = arith.constant 54 : index
      %139 = memref.load %arg3[%c54] : memref<98xf32, #tpu.memory_space<smem>>
      %140 = vector.extract_strided_slice %86 {offsets = [0, 5], sizes = [16, 16], strides = [1, 1]} : vector<16x22xf32> to vector<16x16xf32>
      %141 = vector.broadcast %138 : f32 to vector<16x16xf32>
      %142 = arith.mulf %141, %140 : vector<16x16xf32>
      %143 = arith.addf %137, %142 : vector<16x16xf32>
      %144 = vector.extract_strided_slice %87 {offsets = [0, 5], sizes = [16, 16], strides = [1, 1]} : vector<16x22xf32> to vector<16x16xf32>
      %145 = vector.broadcast %139 : f32 to vector<16x16xf32>
      %146 = arith.mulf %145, %144 : vector<16x16xf32>
      %147 = arith.addf %143, %146 : vector<16x16xf32>
      %c6_74 = arith.constant 6 : index
      %148 = memref.load %arg3[%c6_74] : memref<98xf32, #tpu.memory_space<smem>>
      %c55 = arith.constant 55 : index
      %149 = memref.load %arg3[%c55] : memref<98xf32, #tpu.memory_space<smem>>
      %150 = vector.extract_strided_slice %86 {offsets = [0, 6], sizes = [16, 16], strides = [1, 1]} : vector<16x22xf32> to vector<16x16xf32>
      %151 = vector.broadcast %148 : f32 to vector<16x16xf32>
      %152 = arith.mulf %151, %150 : vector<16x16xf32>
      %153 = arith.addf %147, %152 : vector<16x16xf32>
      %154 = vector.extract_strided_slice %87 {offsets = [0, 6], sizes = [16, 16], strides = [1, 1]} : vector<16x22xf32> to vector<16x16xf32>
      %155 = vector.broadcast %149 : f32 to vector<16x16xf32>
      %156 = arith.mulf %155, %154 : vector<16x16xf32>
      %157 = arith.addf %153, %156 : vector<16x16xf32>
      %c1_75 = arith.constant 1 : index
      %c0_76 = arith.constant 0 : index
      %158 = vector.load %arg7[%c1_75, %c0_76] : memref<22x22xf32, #tpu.memory_space<vmem>>, vector<16x22xf32>
      %c1_77 = arith.constant 1 : index
      %c0_78 = arith.constant 0 : index
      %159 = vector.load %arg8[%c1_77, %c0_78] : memref<22x22xf32, #tpu.memory_space<vmem>>, vector<16x22xf32>
      %c7_79 = arith.constant 7 : index
      %160 = memref.load %arg3[%c7_79] : memref<98xf32, #tpu.memory_space<smem>>
      %c56 = arith.constant 56 : index
      %161 = memref.load %arg3[%c56] : memref<98xf32, #tpu.memory_space<smem>>
      %162 = vector.extract_strided_slice %158 {offsets = [0, 0], sizes = [16, 16], strides = [1, 1]} : vector<16x22xf32> to vector<16x16xf32>
      %163 = vector.broadcast %160 : f32 to vector<16x16xf32>
      %164 = arith.mulf %163, %162 : vector<16x16xf32>
      %165 = arith.addf %157, %164 : vector<16x16xf32>
      %166 = vector.extract_strided_slice %159 {offsets = [0, 0], sizes = [16, 16], strides = [1, 1]} : vector<16x22xf32> to vector<16x16xf32>
      %167 = vector.broadcast %161 : f32 to vector<16x16xf32>
      %168 = arith.mulf %167, %166 : vector<16x16xf32>
      %169 = arith.addf %165, %168 : vector<16x16xf32>
      %c8_80 = arith.constant 8 : index
      %170 = memref.load %arg3[%c8_80] : memref<98xf32, #tpu.memory_space<smem>>
      %c57 = arith.constant 57 : index
      %171 = memref.load %arg3[%c57] : memref<98xf32, #tpu.memory_space<smem>>
      %172 = vector.extract_strided_slice %158 {offsets = [0, 1], sizes = [16, 16], strides = [1, 1]} : vector<16x22xf32> to vector<16x16xf32>
      %173 = vector.broadcast %170 : f32 to vector<16x16xf32>
      %174 = arith.mulf %173, %172 : vector<16x16xf32>
      %175 = arith.addf %169, %174 : vector<16x16xf32>
      %176 = vector.extract_strided_slice %159 {offsets = [0, 1], sizes = [16, 16], strides = [1, 1]} : vector<16x22xf32> to vector<16x16xf32>
      %177 = vector.broadcast %171 : f32 to vector<16x16xf32>
      %178 = arith.mulf %177, %176 : vector<16x16xf32>
      %179 = arith.addf %175, %178 : vector<16x16xf32>
      %c9_81 = arith.constant 9 : index
      %180 = memref.load %arg3[%c9_81] : memref<98xf32, #tpu.memory_space<smem>>
      %c58 = arith.constant 58 : index
      %181 = memref.load %arg3[%c58] : memref<98xf32, #tpu.memory_space<smem>>
      %182 = vector.extract_strided_slice %158 {offsets = [0, 2], sizes = [16, 16], strides = [1, 1]} : vector<16x22xf32> to vector<16x16xf32>
      %183 = vector.broadcast %180 : f32 to vector<16x16xf32>
      %184 = arith.mulf %183, %182 : vector<16x16xf32>
      %185 = arith.addf %179, %184 : vector<16x16xf32>
      %186 = vector.extract_strided_slice %159 {offsets = [0, 2], sizes = [16, 16], strides = [1, 1]} : vector<16x22xf32> to vector<16x16xf32>
      %187 = vector.broadcast %181 : f32 to vector<16x16xf32>
      %188 = arith.mulf %187, %186 : vector<16x16xf32>
      %189 = arith.addf %185, %188 : vector<16x16xf32>
      %c10_82 = arith.constant 10 : index
      %190 = memref.load %arg3[%c10_82] : memref<98xf32, #tpu.memory_space<smem>>
      %c59 = arith.constant 59 : index
      %191 = memref.load %arg3[%c59] : memref<98xf32, #tpu.memory_space<smem>>
      %192 = vector.extract_strided_slice %158 {offsets = [0, 3], sizes = [16, 16], strides = [1, 1]} : vector<16x22xf32> to vector<16x16xf32>
      %193 = vector.broadcast %190 : f32 to vector<16x16xf32>
      %194 = arith.mulf %193, %192 : vector<16x16xf32>
      %195 = arith.addf %189, %194 : vector<16x16xf32>
      %196 = vector.extract_strided_slice %159 {offsets = [0, 3], sizes = [16, 16], strides = [1, 1]} : vector<16x22xf32> to vector<16x16xf32>
      %197 = vector.broadcast %191 : f32 to vector<16x16xf32>
      %198 = arith.mulf %197, %196 : vector<16x16xf32>
      %199 = arith.addf %195, %198 : vector<16x16xf32>
      %c11_83 = arith.constant 11 : index
      %200 = memref.load %arg3[%c11_83] : memref<98xf32, #tpu.memory_space<smem>>
      %c60 = arith.constant 60 : index
      %201 = memref.load %arg3[%c60] : memref<98xf32, #tpu.memory_space<smem>>
      %202 = vector.extract_strided_slice %158 {offsets = [0, 4], sizes = [16, 16], strides = [1, 1]} : vector<16x22xf32> to vector<16x16xf32>
      %203 = vector.broadcast %200 : f32 to vector<16x16xf32>
      %204 = arith.mulf %203, %202 : vector<16x16xf32>
      %205 = arith.addf %199, %204 : vector<16x16xf32>
      %206 = vector.extract_strided_slice %159 {offsets = [0, 4], sizes = [16, 16], strides = [1, 1]} : vector<16x22xf32> to vector<16x16xf32>
      %207 = vector.broadcast %201 : f32 to vector<16x16xf32>
      %208 = arith.mulf %207, %206 : vector<16x16xf32>
      %209 = arith.addf %205, %208 : vector<16x16xf32>
      %c12_84 = arith.constant 12 : index
      %210 = memref.load %arg3[%c12_84] : memref<98xf32, #tpu.memory_space<smem>>
      %c61 = arith.constant 61 : index
      %211 = memref.load %arg3[%c61] : memref<98xf32, #tpu.memory_space<smem>>
      %212 = vector.extract_strided_slice %158 {offsets = [0, 5], sizes = [16, 16], strides = [1, 1]} : vector<16x22xf32> to vector<16x16xf32>
      %213 = vector.broadcast %210 : f32 to vector<16x16xf32>
      %214 = arith.mulf %213, %212 : vector<16x16xf32>
      %215 = arith.addf %209, %214 : vector<16x16xf32>
      %216 = vector.extract_strided_slice %159 {offsets = [0, 5], sizes = [16, 16], strides = [1, 1]} : vector<16x22xf32> to vector<16x16xf32>
      %217 = vector.broadcast %211 : f32 to vector<16x16xf32>
      %218 = arith.mulf %217, %216 : vector<16x16xf32>
      %219 = arith.addf %215, %218 : vector<16x16xf32>
      %c13_85 = arith.constant 13 : index
      %220 = memref.load %arg3[%c13_85] : memref<98xf32, #tpu.memory_space<smem>>
      %c62 = arith.constant 62 : index
      %221 = memref.load %arg3[%c62] : memref<98xf32, #tpu.memory_space<smem>>
      %222 = vector.extract_strided_slice %158 {offsets = [0, 6], sizes = [16, 16], strides = [1, 1]} : vector<16x22xf32> to vector<16x16xf32>
      %223 = vector.broadcast %220 : f32 to vector<16x16xf32>
      %224 = arith.mulf %223, %222 : vector<16x16xf32>
      %225 = arith.addf %219, %224 : vector<16x16xf32>
      %226 = vector.extract_strided_slice %159 {offsets = [0, 6], sizes = [16, 16], strides = [1, 1]} : vector<16x22xf32> to vector<16x16xf32>
      %227 = vector.broadcast %221 : f32 to vector<16x16xf32>
      %228 = arith.mulf %227, %226 : vector<16x16xf32>
      %229 = arith.addf %225, %228 : vector<16x16xf32>
      %c2_86 = arith.constant 2 : index
      %c0_87 = arith.constant 0 : index
      %230 = vector.load %arg7[%c2_86, %c0_87] : memref<22x22xf32, #tpu.memory_space<vmem>>, vector<16x22xf32>
      %c2_88 = arith.constant 2 : index
      %c0_89 = arith.constant 0 : index
      %231 = vector.load %arg8[%c2_88, %c0_89] : memref<22x22xf32, #tpu.memory_space<vmem>>, vector<16x22xf32>
      %c14_90 = arith.constant 14 : index
      %232 = memref.load %arg3[%c14_90] : memref<98xf32, #tpu.memory_space<smem>>
      %c63 = arith.constant 63 : index
      %233 = memref.load %arg3[%c63] : memref<98xf32, #tpu.memory_space<smem>>
      %234 = vector.extract_strided_slice %230 {offsets = [0, 0], sizes = [16, 16], strides = [1, 1]} : vector<16x22xf32> to vector<16x16xf32>
      %235 = vector.broadcast %232 : f32 to vector<16x16xf32>
      %236 = arith.mulf %235, %234 : vector<16x16xf32>
      %237 = arith.addf %229, %236 : vector<16x16xf32>
      %238 = vector.extract_strided_slice %231 {offsets = [0, 0], sizes = [16, 16], strides = [1, 1]} : vector<16x22xf32> to vector<16x16xf32>
      %239 = vector.broadcast %233 : f32 to vector<16x16xf32>
      %240 = arith.mulf %239, %238 : vector<16x16xf32>
      %241 = arith.addf %237, %240 : vector<16x16xf32>
      %c15_91 = arith.constant 15 : index
      %242 = memref.load %arg3[%c15_91] : memref<98xf32, #tpu.memory_space<smem>>
      %c64 = arith.constant 64 : index
      %243 = memref.load %arg3[%c64] : memref<98xf32, #tpu.memory_space<smem>>
      %244 = vector.extract_strided_slice %230 {offsets = [0, 1], sizes = [16, 16], strides = [1, 1]} : vector<16x22xf32> to vector<16x16xf32>
      %245 = vector.broadcast %242 : f32 to vector<16x16xf32>
      %246 = arith.mulf %245, %244 : vector<16x16xf32>
      %247 = arith.addf %241, %246 : vector<16x16xf32>
      %248 = vector.extract_strided_slice %231 {offsets = [0, 1], sizes = [16, 16], strides = [1, 1]} : vector<16x22xf32> to vector<16x16xf32>
      %249 = vector.broadcast %243 : f32 to vector<16x16xf32>
      %250 = arith.mulf %249, %248 : vector<16x16xf32>
      %251 = arith.addf %247, %250 : vector<16x16xf32>
      %c16_92 = arith.constant 16 : index
      %252 = memref.load %arg3[%c16_92] : memref<98xf32, #tpu.memory_space<smem>>
      %c65 = arith.constant 65 : index
      %253 = memref.load %arg3[%c65] : memref<98xf32, #tpu.memory_space<smem>>
      %254 = vector.extract_strided_slice %230 {offsets = [0, 2], sizes = [16, 16], strides = [1, 1]} : vector<16x22xf32> to vector<16x16xf32>
      %255 = vector.broadcast %252 : f32 to vector<16x16xf32>
      %256 = arith.mulf %255, %254 : vector<16x16xf32>
      %257 = arith.addf %251, %256 : vector<16x16xf32>
      %258 = vector.extract_strided_slice %231 {offsets = [0, 2], sizes = [16, 16], strides = [1, 1]} : vector<16x22xf32> to vector<16x16xf32>
      %259 = vector.broadcast %253 : f32 to vector<16x16xf32>
      %260 = arith.mulf %259, %258 : vector<16x16xf32>
      %261 = arith.addf %257, %260 : vector<16x16xf32>
      %c17_93 = arith.constant 17 : index
      %262 = memref.load %arg3[%c17_93] : memref<98xf32, #tpu.memory_space<smem>>
      %c66 = arith.constant 66 : index
      %263 = memref.load %arg3[%c66] : memref<98xf32, #tpu.memory_space<smem>>
      %264 = vector.extract_strided_slice %230 {offsets = [0, 3], sizes = [16, 16], strides = [1, 1]} : vector<16x22xf32> to vector<16x16xf32>
      %265 = vector.broadcast %262 : f32 to vector<16x16xf32>
      %266 = arith.mulf %265, %264 : vector<16x16xf32>
      %267 = arith.addf %261, %266 : vector<16x16xf32>
      %268 = vector.extract_strided_slice %231 {offsets = [0, 3], sizes = [16, 16], strides = [1, 1]} : vector<16x22xf32> to vector<16x16xf32>
      %269 = vector.broadcast %263 : f32 to vector<16x16xf32>
      %270 = arith.mulf %269, %268 : vector<16x16xf32>
      %271 = arith.addf %267, %270 : vector<16x16xf32>
      %c18_94 = arith.constant 18 : index
      %272 = memref.load %arg3[%c18_94] : memref<98xf32, #tpu.memory_space<smem>>
      %c67 = arith.constant 67 : index
      %273 = memref.load %arg3[%c67] : memref<98xf32, #tpu.memory_space<smem>>
      %274 = vector.extract_strided_slice %230 {offsets = [0, 4], sizes = [16, 16], strides = [1, 1]} : vector<16x22xf32> to vector<16x16xf32>
      %275 = vector.broadcast %272 : f32 to vector<16x16xf32>
      %276 = arith.mulf %275, %274 : vector<16x16xf32>
      %277 = arith.addf %271, %276 : vector<16x16xf32>
      %278 = vector.extract_strided_slice %231 {offsets = [0, 4], sizes = [16, 16], strides = [1, 1]} : vector<16x22xf32> to vector<16x16xf32>
      %279 = vector.broadcast %273 : f32 to vector<16x16xf32>
      %280 = arith.mulf %279, %278 : vector<16x16xf32>
      %281 = arith.addf %277, %280 : vector<16x16xf32>
      %c19 = arith.constant 19 : index
      %282 = memref.load %arg3[%c19] : memref<98xf32, #tpu.memory_space<smem>>
      %c68 = arith.constant 68 : index
      %283 = memref.load %arg3[%c68] : memref<98xf32, #tpu.memory_space<smem>>
      %284 = vector.extract_strided_slice %230 {offsets = [0, 5], sizes = [16, 16], strides = [1, 1]} : vector<16x22xf32> to vector<16x16xf32>
      %285 = vector.broadcast %282 : f32 to vector<16x16xf32>
      %286 = arith.mulf %285, %284 : vector<16x16xf32>
      %287 = arith.addf %281, %286 : vector<16x16xf32>
      %288 = vector.extract_strided_slice %231 {offsets = [0, 5], sizes = [16, 16], strides = [1, 1]} : vector<16x22xf32> to vector<16x16xf32>
      %289 = vector.broadcast %283 : f32 to vector<16x16xf32>
      %290 = arith.mulf %289, %288 : vector<16x16xf32>
      %291 = arith.addf %287, %290 : vector<16x16xf32>
      %c20 = arith.constant 20 : index
      %292 = memref.load %arg3[%c20] : memref<98xf32, #tpu.memory_space<smem>>
      %c69 = arith.constant 69 : index
      %293 = memref.load %arg3[%c69] : memref<98xf32, #tpu.memory_space<smem>>
      %294 = vector.extract_strided_slice %230 {offsets = [0, 6], sizes = [16, 16], strides = [1, 1]} : vector<16x22xf32> to vector<16x16xf32>
      %295 = vector.broadcast %292 : f32 to vector<16x16xf32>
      %296 = arith.mulf %295, %294 : vector<16x16xf32>
      %297 = arith.addf %291, %296 : vector<16x16xf32>
      %298 = vector.extract_strided_slice %231 {offsets = [0, 6], sizes = [16, 16], strides = [1, 1]} : vector<16x22xf32> to vector<16x16xf32>
      %299 = vector.broadcast %293 : f32 to vector<16x16xf32>
      %300 = arith.mulf %299, %298 : vector<16x16xf32>
      %301 = arith.addf %297, %300 : vector<16x16xf32>
      %c3_95 = arith.constant 3 : index
      %c0_96 = arith.constant 0 : index
      %302 = vector.load %arg7[%c3_95, %c0_96] : memref<22x22xf32, #tpu.memory_space<vmem>>, vector<16x22xf32>
      %c3_97 = arith.constant 3 : index
      %c0_98 = arith.constant 0 : index
      %303 = vector.load %arg8[%c3_97, %c0_98] : memref<22x22xf32, #tpu.memory_space<vmem>>, vector<16x22xf32>
      %c21 = arith.constant 21 : index
      %304 = memref.load %arg3[%c21] : memref<98xf32, #tpu.memory_space<smem>>
      %c70 = arith.constant 70 : index
      %305 = memref.load %arg3[%c70] : memref<98xf32, #tpu.memory_space<smem>>
      %306 = vector.extract_strided_slice %302 {offsets = [0, 0], sizes = [16, 16], strides = [1, 1]} : vector<16x22xf32> to vector<16x16xf32>
      %307 = vector.broadcast %304 : f32 to vector<16x16xf32>
      %308 = arith.mulf %307, %306 : vector<16x16xf32>
      %309 = arith.addf %301, %308 : vector<16x16xf32>
      %310 = vector.extract_strided_slice %303 {offsets = [0, 0], sizes = [16, 16], strides = [1, 1]} : vector<16x22xf32> to vector<16x16xf32>
      %311 = vector.broadcast %305 : f32 to vector<16x16xf32>
      %312 = arith.mulf %311, %310 : vector<16x16xf32>
      %313 = arith.addf %309, %312 : vector<16x16xf32>
      %c22 = arith.constant 22 : index
      %314 = memref.load %arg3[%c22] : memref<98xf32, #tpu.memory_space<smem>>
      %c71 = arith.constant 71 : index
      %315 = memref.load %arg3[%c71] : memref<98xf32, #tpu.memory_space<smem>>
      %316 = vector.extract_strided_slice %302 {offsets = [0, 1], sizes = [16, 16], strides = [1, 1]} : vector<16x22xf32> to vector<16x16xf32>
      %317 = vector.broadcast %314 : f32 to vector<16x16xf32>
      %318 = arith.mulf %317, %316 : vector<16x16xf32>
      %319 = arith.addf %313, %318 : vector<16x16xf32>
      %320 = vector.extract_strided_slice %303 {offsets = [0, 1], sizes = [16, 16], strides = [1, 1]} : vector<16x22xf32> to vector<16x16xf32>
      %321 = vector.broadcast %315 : f32 to vector<16x16xf32>
      %322 = arith.mulf %321, %320 : vector<16x16xf32>
      %323 = arith.addf %319, %322 : vector<16x16xf32>
      %c23 = arith.constant 23 : index
      %324 = memref.load %arg3[%c23] : memref<98xf32, #tpu.memory_space<smem>>
      %c72 = arith.constant 72 : index
      %325 = memref.load %arg3[%c72] : memref<98xf32, #tpu.memory_space<smem>>
      %326 = vector.extract_strided_slice %302 {offsets = [0, 2], sizes = [16, 16], strides = [1, 1]} : vector<16x22xf32> to vector<16x16xf32>
      %327 = vector.broadcast %324 : f32 to vector<16x16xf32>
      %328 = arith.mulf %327, %326 : vector<16x16xf32>
      %329 = arith.addf %323, %328 : vector<16x16xf32>
      %330 = vector.extract_strided_slice %303 {offsets = [0, 2], sizes = [16, 16], strides = [1, 1]} : vector<16x22xf32> to vector<16x16xf32>
      %331 = vector.broadcast %325 : f32 to vector<16x16xf32>
      %332 = arith.mulf %331, %330 : vector<16x16xf32>
      %333 = arith.addf %329, %332 : vector<16x16xf32>
      %c24 = arith.constant 24 : index
      %334 = memref.load %arg3[%c24] : memref<98xf32, #tpu.memory_space<smem>>
      %c73 = arith.constant 73 : index
      %335 = memref.load %arg3[%c73] : memref<98xf32, #tpu.memory_space<smem>>
      %336 = vector.extract_strided_slice %302 {offsets = [0, 3], sizes = [16, 16], strides = [1, 1]} : vector<16x22xf32> to vector<16x16xf32>
      %337 = vector.broadcast %334 : f32 to vector<16x16xf32>
      %338 = arith.mulf %337, %336 : vector<16x16xf32>
      %339 = arith.addf %333, %338 : vector<16x16xf32>
      %340 = vector.extract_strided_slice %303 {offsets = [0, 3], sizes = [16, 16], strides = [1, 1]} : vector<16x22xf32> to vector<16x16xf32>
      %341 = vector.broadcast %335 : f32 to vector<16x16xf32>
      %342 = arith.mulf %341, %340 : vector<16x16xf32>
      %343 = arith.addf %339, %342 : vector<16x16xf32>
      %c25 = arith.constant 25 : index
      %344 = memref.load %arg3[%c25] : memref<98xf32, #tpu.memory_space<smem>>
      %c74 = arith.constant 74 : index
      %345 = memref.load %arg3[%c74] : memref<98xf32, #tpu.memory_space<smem>>
      %346 = vector.extract_strided_slice %302 {offsets = [0, 4], sizes = [16, 16], strides = [1, 1]} : vector<16x22xf32> to vector<16x16xf32>
      %347 = vector.broadcast %344 : f32 to vector<16x16xf32>
      %348 = arith.mulf %347, %346 : vector<16x16xf32>
      %349 = arith.addf %343, %348 : vector<16x16xf32>
      %350 = vector.extract_strided_slice %303 {offsets = [0, 4], sizes = [16, 16], strides = [1, 1]} : vector<16x22xf32> to vector<16x16xf32>
      %351 = vector.broadcast %345 : f32 to vector<16x16xf32>
      %352 = arith.mulf %351, %350 : vector<16x16xf32>
      %353 = arith.addf %349, %352 : vector<16x16xf32>
      %c26 = arith.constant 26 : index
      %354 = memref.load %arg3[%c26] : memref<98xf32, #tpu.memory_space<smem>>
      %c75 = arith.constant 75 : index
      %355 = memref.load %arg3[%c75] : memref<98xf32, #tpu.memory_space<smem>>
      %356 = vector.extract_strided_slice %302 {offsets = [0, 5], sizes = [16, 16], strides = [1, 1]} : vector<16x22xf32> to vector<16x16xf32>
      %357 = vector.broadcast %354 : f32 to vector<16x16xf32>
      %358 = arith.mulf %357, %356 : vector<16x16xf32>
      %359 = arith.addf %353, %358 : vector<16x16xf32>
      %360 = vector.extract_strided_slice %303 {offsets = [0, 5], sizes = [16, 16], strides = [1, 1]} : vector<16x22xf32> to vector<16x16xf32>
      %361 = vector.broadcast %355 : f32 to vector<16x16xf32>
      %362 = arith.mulf %361, %360 : vector<16x16xf32>
      %363 = arith.addf %359, %362 : vector<16x16xf32>
      %c27 = arith.constant 27 : index
      %364 = memref.load %arg3[%c27] : memref<98xf32, #tpu.memory_space<smem>>
      %c76 = arith.constant 76 : index
      %365 = memref.load %arg3[%c76] : memref<98xf32, #tpu.memory_space<smem>>
      %366 = vector.extract_strided_slice %302 {offsets = [0, 6], sizes = [16, 16], strides = [1, 1]} : vector<16x22xf32> to vector<16x16xf32>
      %367 = vector.broadcast %364 : f32 to vector<16x16xf32>
      %368 = arith.mulf %367, %366 : vector<16x16xf32>
      %369 = arith.addf %363, %368 : vector<16x16xf32>
      %370 = vector.extract_strided_slice %303 {offsets = [0, 6], sizes = [16, 16], strides = [1, 1]} : vector<16x22xf32> to vector<16x16xf32>
      %371 = vector.broadcast %365 : f32 to vector<16x16xf32>
      %372 = arith.mulf %371, %370 : vector<16x16xf32>
      %373 = arith.addf %369, %372 : vector<16x16xf32>
      %c4_99 = arith.constant 4 : index
      %c0_100 = arith.constant 0 : index
      %374 = vector.load %arg7[%c4_99, %c0_100] : memref<22x22xf32, #tpu.memory_space<vmem>>, vector<16x22xf32>
      %c4_101 = arith.constant 4 : index
      %c0_102 = arith.constant 0 : index
      %375 = vector.load %arg8[%c4_101, %c0_102] : memref<22x22xf32, #tpu.memory_space<vmem>>, vector<16x22xf32>
      %c28 = arith.constant 28 : index
      %376 = memref.load %arg3[%c28] : memref<98xf32, #tpu.memory_space<smem>>
      %c77 = arith.constant 77 : index
      %377 = memref.load %arg3[%c77] : memref<98xf32, #tpu.memory_space<smem>>
      %378 = vector.extract_strided_slice %374 {offsets = [0, 0], sizes = [16, 16], strides = [1, 1]} : vector<16x22xf32> to vector<16x16xf32>
      %379 = vector.broadcast %376 : f32 to vector<16x16xf32>
      %380 = arith.mulf %379, %378 : vector<16x16xf32>
      %381 = arith.addf %373, %380 : vector<16x16xf32>
      %382 = vector.extract_strided_slice %375 {offsets = [0, 0], sizes = [16, 16], strides = [1, 1]} : vector<16x22xf32> to vector<16x16xf32>
      %383 = vector.broadcast %377 : f32 to vector<16x16xf32>
      %384 = arith.mulf %383, %382 : vector<16x16xf32>
      %385 = arith.addf %381, %384 : vector<16x16xf32>
      %c29 = arith.constant 29 : index
      %386 = memref.load %arg3[%c29] : memref<98xf32, #tpu.memory_space<smem>>
      %c78 = arith.constant 78 : index
      %387 = memref.load %arg3[%c78] : memref<98xf32, #tpu.memory_space<smem>>
      %388 = vector.extract_strided_slice %374 {offsets = [0, 1], sizes = [16, 16], strides = [1, 1]} : vector<16x22xf32> to vector<16x16xf32>
      %389 = vector.broadcast %386 : f32 to vector<16x16xf32>
      %390 = arith.mulf %389, %388 : vector<16x16xf32>
      %391 = arith.addf %385, %390 : vector<16x16xf32>
      %392 = vector.extract_strided_slice %375 {offsets = [0, 1], sizes = [16, 16], strides = [1, 1]} : vector<16x22xf32> to vector<16x16xf32>
      %393 = vector.broadcast %387 : f32 to vector<16x16xf32>
      %394 = arith.mulf %393, %392 : vector<16x16xf32>
      %395 = arith.addf %391, %394 : vector<16x16xf32>
      %c30 = arith.constant 30 : index
      %396 = memref.load %arg3[%c30] : memref<98xf32, #tpu.memory_space<smem>>
      %c79 = arith.constant 79 : index
      %397 = memref.load %arg3[%c79] : memref<98xf32, #tpu.memory_space<smem>>
      %398 = vector.extract_strided_slice %374 {offsets = [0, 2], sizes = [16, 16], strides = [1, 1]} : vector<16x22xf32> to vector<16x16xf32>
      %399 = vector.broadcast %396 : f32 to vector<16x16xf32>
      %400 = arith.mulf %399, %398 : vector<16x16xf32>
      %401 = arith.addf %395, %400 : vector<16x16xf32>
      %402 = vector.extract_strided_slice %375 {offsets = [0, 2], sizes = [16, 16], strides = [1, 1]} : vector<16x22xf32> to vector<16x16xf32>
      %403 = vector.broadcast %397 : f32 to vector<16x16xf32>
      %404 = arith.mulf %403, %402 : vector<16x16xf32>
      %405 = arith.addf %401, %404 : vector<16x16xf32>
      %c31 = arith.constant 31 : index
      %406 = memref.load %arg3[%c31] : memref<98xf32, #tpu.memory_space<smem>>
      %c80 = arith.constant 80 : index
      %407 = memref.load %arg3[%c80] : memref<98xf32, #tpu.memory_space<smem>>
      %408 = vector.extract_strided_slice %374 {offsets = [0, 3], sizes = [16, 16], strides = [1, 1]} : vector<16x22xf32> to vector<16x16xf32>
      %409 = vector.broadcast %406 : f32 to vector<16x16xf32>
      %410 = arith.mulf %409, %408 : vector<16x16xf32>
      %411 = arith.addf %405, %410 : vector<16x16xf32>
      %412 = vector.extract_strided_slice %375 {offsets = [0, 3], sizes = [16, 16], strides = [1, 1]} : vector<16x22xf32> to vector<16x16xf32>
      %413 = vector.broadcast %407 : f32 to vector<16x16xf32>
      %414 = arith.mulf %413, %412 : vector<16x16xf32>
      %415 = arith.addf %411, %414 : vector<16x16xf32>
      %c32 = arith.constant 32 : index
      %416 = memref.load %arg3[%c32] : memref<98xf32, #tpu.memory_space<smem>>
      %c81 = arith.constant 81 : index
      %417 = memref.load %arg3[%c81] : memref<98xf32, #tpu.memory_space<smem>>
      %418 = vector.extract_strided_slice %374 {offsets = [0, 4], sizes = [16, 16], strides = [1, 1]} : vector<16x22xf32> to vector<16x16xf32>
      %419 = vector.broadcast %416 : f32 to vector<16x16xf32>
      %420 = arith.mulf %419, %418 : vector<16x16xf32>
      %421 = arith.addf %415, %420 : vector<16x16xf32>
      %422 = vector.extract_strided_slice %375 {offsets = [0, 4], sizes = [16, 16], strides = [1, 1]} : vector<16x22xf32> to vector<16x16xf32>
      %423 = vector.broadcast %417 : f32 to vector<16x16xf32>
      %424 = arith.mulf %423, %422 : vector<16x16xf32>
      %425 = arith.addf %421, %424 : vector<16x16xf32>
      %c33 = arith.constant 33 : index
      %426 = memref.load %arg3[%c33] : memref<98xf32, #tpu.memory_space<smem>>
      %c82 = arith.constant 82 : index
      %427 = memref.load %arg3[%c82] : memref<98xf32, #tpu.memory_space<smem>>
      %428 = vector.extract_strided_slice %374 {offsets = [0, 5], sizes = [16, 16], strides = [1, 1]} : vector<16x22xf32> to vector<16x16xf32>
      %429 = vector.broadcast %426 : f32 to vector<16x16xf32>
      %430 = arith.mulf %429, %428 : vector<16x16xf32>
      %431 = arith.addf %425, %430 : vector<16x16xf32>
      %432 = vector.extract_strided_slice %375 {offsets = [0, 5], sizes = [16, 16], strides = [1, 1]} : vector<16x22xf32> to vector<16x16xf32>
      %433 = vector.broadcast %427 : f32 to vector<16x16xf32>
      %434 = arith.mulf %433, %432 : vector<16x16xf32>
      %435 = arith.addf %431, %434 : vector<16x16xf32>
      %c34 = arith.constant 34 : index
      %436 = memref.load %arg3[%c34] : memref<98xf32, #tpu.memory_space<smem>>
      %c83 = arith.constant 83 : index
      %437 = memref.load %arg3[%c83] : memref<98xf32, #tpu.memory_space<smem>>
      %438 = vector.extract_strided_slice %374 {offsets = [0, 6], sizes = [16, 16], strides = [1, 1]} : vector<16x22xf32> to vector<16x16xf32>
      %439 = vector.broadcast %436 : f32 to vector<16x16xf32>
      %440 = arith.mulf %439, %438 : vector<16x16xf32>
      %441 = arith.addf %435, %440 : vector<16x16xf32>
      %442 = vector.extract_strided_slice %375 {offsets = [0, 6], sizes = [16, 16], strides = [1, 1]} : vector<16x22xf32> to vector<16x16xf32>
      %443 = vector.broadcast %437 : f32 to vector<16x16xf32>
      %444 = arith.mulf %443, %442 : vector<16x16xf32>
      %445 = arith.addf %441, %444 : vector<16x16xf32>
      %c5_103 = arith.constant 5 : index
      %c0_104 = arith.constant 0 : index
      %446 = vector.load %arg7[%c5_103, %c0_104] : memref<22x22xf32, #tpu.memory_space<vmem>>, vector<16x22xf32>
      %c5_105 = arith.constant 5 : index
      %c0_106 = arith.constant 0 : index
      %447 = vector.load %arg8[%c5_105, %c0_106] : memref<22x22xf32, #tpu.memory_space<vmem>>, vector<16x22xf32>
      %c35 = arith.constant 35 : index
      %448 = memref.load %arg3[%c35] : memref<98xf32, #tpu.memory_space<smem>>
      %c84 = arith.constant 84 : index
      %449 = memref.load %arg3[%c84] : memref<98xf32, #tpu.memory_space<smem>>
      %450 = vector.extract_strided_slice %446 {offsets = [0, 0], sizes = [16, 16], strides = [1, 1]} : vector<16x22xf32> to vector<16x16xf32>
      %451 = vector.broadcast %448 : f32 to vector<16x16xf32>
      %452 = arith.mulf %451, %450 : vector<16x16xf32>
      %453 = arith.addf %445, %452 : vector<16x16xf32>
      %454 = vector.extract_strided_slice %447 {offsets = [0, 0], sizes = [16, 16], strides = [1, 1]} : vector<16x22xf32> to vector<16x16xf32>
      %455 = vector.broadcast %449 : f32 to vector<16x16xf32>
      %456 = arith.mulf %455, %454 : vector<16x16xf32>
      %457 = arith.addf %453, %456 : vector<16x16xf32>
      %c36 = arith.constant 36 : index
      %458 = memref.load %arg3[%c36] : memref<98xf32, #tpu.memory_space<smem>>
      %c85 = arith.constant 85 : index
      %459 = memref.load %arg3[%c85] : memref<98xf32, #tpu.memory_space<smem>>
      %460 = vector.extract_strided_slice %446 {offsets = [0, 1], sizes = [16, 16], strides = [1, 1]} : vector<16x22xf32> to vector<16x16xf32>
      %461 = vector.broadcast %458 : f32 to vector<16x16xf32>
      %462 = arith.mulf %461, %460 : vector<16x16xf32>
      %463 = arith.addf %457, %462 : vector<16x16xf32>
      %464 = vector.extract_strided_slice %447 {offsets = [0, 1], sizes = [16, 16], strides = [1, 1]} : vector<16x22xf32> to vector<16x16xf32>
      %465 = vector.broadcast %459 : f32 to vector<16x16xf32>
      %466 = arith.mulf %465, %464 : vector<16x16xf32>
      %467 = arith.addf %463, %466 : vector<16x16xf32>
      %c37 = arith.constant 37 : index
      %468 = memref.load %arg3[%c37] : memref<98xf32, #tpu.memory_space<smem>>
      %c86 = arith.constant 86 : index
      %469 = memref.load %arg3[%c86] : memref<98xf32, #tpu.memory_space<smem>>
      %470 = vector.extract_strided_slice %446 {offsets = [0, 2], sizes = [16, 16], strides = [1, 1]} : vector<16x22xf32> to vector<16x16xf32>
      %471 = vector.broadcast %468 : f32 to vector<16x16xf32>
      %472 = arith.mulf %471, %470 : vector<16x16xf32>
      %473 = arith.addf %467, %472 : vector<16x16xf32>
      %474 = vector.extract_strided_slice %447 {offsets = [0, 2], sizes = [16, 16], strides = [1, 1]} : vector<16x22xf32> to vector<16x16xf32>
      %475 = vector.broadcast %469 : f32 to vector<16x16xf32>
      %476 = arith.mulf %475, %474 : vector<16x16xf32>
      %477 = arith.addf %473, %476 : vector<16x16xf32>
      %c38 = arith.constant 38 : index
      %478 = memref.load %arg3[%c38] : memref<98xf32, #tpu.memory_space<smem>>
      %c87 = arith.constant 87 : index
      %479 = memref.load %arg3[%c87] : memref<98xf32, #tpu.memory_space<smem>>
      %480 = vector.extract_strided_slice %446 {offsets = [0, 3], sizes = [16, 16], strides = [1, 1]} : vector<16x22xf32> to vector<16x16xf32>
      %481 = vector.broadcast %478 : f32 to vector<16x16xf32>
      %482 = arith.mulf %481, %480 : vector<16x16xf32>
      %483 = arith.addf %477, %482 : vector<16x16xf32>
      %484 = vector.extract_strided_slice %447 {offsets = [0, 3], sizes = [16, 16], strides = [1, 1]} : vector<16x22xf32> to vector<16x16xf32>
      %485 = vector.broadcast %479 : f32 to vector<16x16xf32>
      %486 = arith.mulf %485, %484 : vector<16x16xf32>
      %487 = arith.addf %483, %486 : vector<16x16xf32>
      %c39 = arith.constant 39 : index
      %488 = memref.load %arg3[%c39] : memref<98xf32, #tpu.memory_space<smem>>
      %c88 = arith.constant 88 : index
      %489 = memref.load %arg3[%c88] : memref<98xf32, #tpu.memory_space<smem>>
      %490 = vector.extract_strided_slice %446 {offsets = [0, 4], sizes = [16, 16], strides = [1, 1]} : vector<16x22xf32> to vector<16x16xf32>
      %491 = vector.broadcast %488 : f32 to vector<16x16xf32>
      %492 = arith.mulf %491, %490 : vector<16x16xf32>
      %493 = arith.addf %487, %492 : vector<16x16xf32>
      %494 = vector.extract_strided_slice %447 {offsets = [0, 4], sizes = [16, 16], strides = [1, 1]} : vector<16x22xf32> to vector<16x16xf32>
      %495 = vector.broadcast %489 : f32 to vector<16x16xf32>
      %496 = arith.mulf %495, %494 : vector<16x16xf32>
      %497 = arith.addf %493, %496 : vector<16x16xf32>
      %c40 = arith.constant 40 : index
      %498 = memref.load %arg3[%c40] : memref<98xf32, #tpu.memory_space<smem>>
      %c89 = arith.constant 89 : index
      %499 = memref.load %arg3[%c89] : memref<98xf32, #tpu.memory_space<smem>>
      %500 = vector.extract_strided_slice %446 {offsets = [0, 5], sizes = [16, 16], strides = [1, 1]} : vector<16x22xf32> to vector<16x16xf32>
      %501 = vector.broadcast %498 : f32 to vector<16x16xf32>
      %502 = arith.mulf %501, %500 : vector<16x16xf32>
      %503 = arith.addf %497, %502 : vector<16x16xf32>
      %504 = vector.extract_strided_slice %447 {offsets = [0, 5], sizes = [16, 16], strides = [1, 1]} : vector<16x22xf32> to vector<16x16xf32>
      %505 = vector.broadcast %499 : f32 to vector<16x16xf32>
      %506 = arith.mulf %505, %504 : vector<16x16xf32>
      %507 = arith.addf %503, %506 : vector<16x16xf32>
      %c41 = arith.constant 41 : index
      %508 = memref.load %arg3[%c41] : memref<98xf32, #tpu.memory_space<smem>>
      %c90 = arith.constant 90 : index
      %509 = memref.load %arg3[%c90] : memref<98xf32, #tpu.memory_space<smem>>
      %510 = vector.extract_strided_slice %446 {offsets = [0, 6], sizes = [16, 16], strides = [1, 1]} : vector<16x22xf32> to vector<16x16xf32>
      %511 = vector.broadcast %508 : f32 to vector<16x16xf32>
      %512 = arith.mulf %511, %510 : vector<16x16xf32>
      %513 = arith.addf %507, %512 : vector<16x16xf32>
      %514 = vector.extract_strided_slice %447 {offsets = [0, 6], sizes = [16, 16], strides = [1, 1]} : vector<16x22xf32> to vector<16x16xf32>
      %515 = vector.broadcast %509 : f32 to vector<16x16xf32>
      %516 = arith.mulf %515, %514 : vector<16x16xf32>
      %517 = arith.addf %513, %516 : vector<16x16xf32>
      %c6_107 = arith.constant 6 : index
      %c0_108 = arith.constant 0 : index
      %518 = vector.load %arg7[%c6_107, %c0_108] : memref<22x22xf32, #tpu.memory_space<vmem>>, vector<16x22xf32>
      %c6_109 = arith.constant 6 : index
      %c0_110 = arith.constant 0 : index
      %519 = vector.load %arg8[%c6_109, %c0_110] : memref<22x22xf32, #tpu.memory_space<vmem>>, vector<16x22xf32>
      %c42 = arith.constant 42 : index
      %520 = memref.load %arg3[%c42] : memref<98xf32, #tpu.memory_space<smem>>
      %c91 = arith.constant 91 : index
      %521 = memref.load %arg3[%c91] : memref<98xf32, #tpu.memory_space<smem>>
      %522 = vector.extract_strided_slice %518 {offsets = [0, 0], sizes = [16, 16], strides = [1, 1]} : vector<16x22xf32> to vector<16x16xf32>
      %523 = vector.broadcast %520 : f32 to vector<16x16xf32>
      %524 = arith.mulf %523, %522 : vector<16x16xf32>
      %525 = arith.addf %517, %524 : vector<16x16xf32>
      %526 = vector.extract_strided_slice %519 {offsets = [0, 0], sizes = [16, 16], strides = [1, 1]} : vector<16x22xf32> to vector<16x16xf32>
      %527 = vector.broadcast %521 : f32 to vector<16x16xf32>
      %528 = arith.mulf %527, %526 : vector<16x16xf32>
      %529 = arith.addf %525, %528 : vector<16x16xf32>
      %c43 = arith.constant 43 : index
      %530 = memref.load %arg3[%c43] : memref<98xf32, #tpu.memory_space<smem>>
      %c92 = arith.constant 92 : index
      %531 = memref.load %arg3[%c92] : memref<98xf32, #tpu.memory_space<smem>>
      %532 = vector.extract_strided_slice %518 {offsets = [0, 1], sizes = [16, 16], strides = [1, 1]} : vector<16x22xf32> to vector<16x16xf32>
      %533 = vector.broadcast %530 : f32 to vector<16x16xf32>
      %534 = arith.mulf %533, %532 : vector<16x16xf32>
      %535 = arith.addf %529, %534 : vector<16x16xf32>
      %536 = vector.extract_strided_slice %519 {offsets = [0, 1], sizes = [16, 16], strides = [1, 1]} : vector<16x22xf32> to vector<16x16xf32>
      %537 = vector.broadcast %531 : f32 to vector<16x16xf32>
      %538 = arith.mulf %537, %536 : vector<16x16xf32>
      %539 = arith.addf %535, %538 : vector<16x16xf32>
      %c44 = arith.constant 44 : index
      %540 = memref.load %arg3[%c44] : memref<98xf32, #tpu.memory_space<smem>>
      %c93 = arith.constant 93 : index
      %541 = memref.load %arg3[%c93] : memref<98xf32, #tpu.memory_space<smem>>
      %542 = vector.extract_strided_slice %518 {offsets = [0, 2], sizes = [16, 16], strides = [1, 1]} : vector<16x22xf32> to vector<16x16xf32>
      %543 = vector.broadcast %540 : f32 to vector<16x16xf32>
      %544 = arith.mulf %543, %542 : vector<16x16xf32>
      %545 = arith.addf %539, %544 : vector<16x16xf32>
      %546 = vector.extract_strided_slice %519 {offsets = [0, 2], sizes = [16, 16], strides = [1, 1]} : vector<16x22xf32> to vector<16x16xf32>
      %547 = vector.broadcast %541 : f32 to vector<16x16xf32>
      %548 = arith.mulf %547, %546 : vector<16x16xf32>
      %549 = arith.addf %545, %548 : vector<16x16xf32>
      %c45 = arith.constant 45 : index
      %550 = memref.load %arg3[%c45] : memref<98xf32, #tpu.memory_space<smem>>
      %c94 = arith.constant 94 : index
      %551 = memref.load %arg3[%c94] : memref<98xf32, #tpu.memory_space<smem>>
      %552 = vector.extract_strided_slice %518 {offsets = [0, 3], sizes = [16, 16], strides = [1, 1]} : vector<16x22xf32> to vector<16x16xf32>
      %553 = vector.broadcast %550 : f32 to vector<16x16xf32>
      %554 = arith.mulf %553, %552 : vector<16x16xf32>
      %555 = arith.addf %549, %554 : vector<16x16xf32>
      %556 = vector.extract_strided_slice %519 {offsets = [0, 3], sizes = [16, 16], strides = [1, 1]} : vector<16x22xf32> to vector<16x16xf32>
      %557 = vector.broadcast %551 : f32 to vector<16x16xf32>
      %558 = arith.mulf %557, %556 : vector<16x16xf32>
      %559 = arith.addf %555, %558 : vector<16x16xf32>
      %c46 = arith.constant 46 : index
      %560 = memref.load %arg3[%c46] : memref<98xf32, #tpu.memory_space<smem>>
      %c95 = arith.constant 95 : index
      %561 = memref.load %arg3[%c95] : memref<98xf32, #tpu.memory_space<smem>>
      %562 = vector.extract_strided_slice %518 {offsets = [0, 4], sizes = [16, 16], strides = [1, 1]} : vector<16x22xf32> to vector<16x16xf32>
      %563 = vector.broadcast %560 : f32 to vector<16x16xf32>
      %564 = arith.mulf %563, %562 : vector<16x16xf32>
      %565 = arith.addf %559, %564 : vector<16x16xf32>
      %566 = vector.extract_strided_slice %519 {offsets = [0, 4], sizes = [16, 16], strides = [1, 1]} : vector<16x22xf32> to vector<16x16xf32>
      %567 = vector.broadcast %561 : f32 to vector<16x16xf32>
      %568 = arith.mulf %567, %566 : vector<16x16xf32>
      %569 = arith.addf %565, %568 : vector<16x16xf32>
      %c47 = arith.constant 47 : index
      %570 = memref.load %arg3[%c47] : memref<98xf32, #tpu.memory_space<smem>>
      %c96 = arith.constant 96 : index
      %571 = memref.load %arg3[%c96] : memref<98xf32, #tpu.memory_space<smem>>
      %572 = vector.extract_strided_slice %518 {offsets = [0, 5], sizes = [16, 16], strides = [1, 1]} : vector<16x22xf32> to vector<16x16xf32>
      %573 = vector.broadcast %570 : f32 to vector<16x16xf32>
      %574 = arith.mulf %573, %572 : vector<16x16xf32>
      %575 = arith.addf %569, %574 : vector<16x16xf32>
      %576 = vector.extract_strided_slice %519 {offsets = [0, 5], sizes = [16, 16], strides = [1, 1]} : vector<16x22xf32> to vector<16x16xf32>
      %577 = vector.broadcast %571 : f32 to vector<16x16xf32>
      %578 = arith.mulf %577, %576 : vector<16x16xf32>
      %579 = arith.addf %575, %578 : vector<16x16xf32>
      %c48 = arith.constant 48 : index
      %580 = memref.load %arg3[%c48] : memref<98xf32, #tpu.memory_space<smem>>
      %c97 = arith.constant 97 : index
      %581 = memref.load %arg3[%c97] : memref<98xf32, #tpu.memory_space<smem>>
      %582 = vector.extract_strided_slice %518 {offsets = [0, 6], sizes = [16, 16], strides = [1, 1]} : vector<16x22xf32> to vector<16x16xf32>
      %583 = vector.broadcast %580 : f32 to vector<16x16xf32>
      %584 = arith.mulf %583, %582 : vector<16x16xf32>
      %585 = arith.addf %579, %584 : vector<16x16xf32>
      %586 = vector.extract_strided_slice %519 {offsets = [0, 6], sizes = [16, 16], strides = [1, 1]} : vector<16x22xf32> to vector<16x16xf32>
      %587 = vector.broadcast %581 : f32 to vector<16x16xf32>
      %588 = arith.mulf %587, %586 : vector<16x16xf32>
      %589 = arith.addf %585, %588 : vector<16x16xf32>
      %590 = arith.negf %589 : vector<16x16xf32>
      %591 = math.exp %590 : vector<16x16xf32>
      %cst_111 = arith.constant 1.000000e+00 : f32
      %592 = vector.broadcast %cst_111 : f32 to vector<16x16xf32>
      %593 = arith.addf %592, %591 : vector<16x16xf32>
      %594 = arith.divf %592, %593 : vector<16x16xf32>
      %c0_112 = arith.constant 0 : index
      %c0_113 = arith.constant 0 : index
      %c0_114 = arith.constant 0 : index
      %c0_115 = arith.constant 0 : index
      %595 = vector.load %arg4[%c0_112, %c0_113, %c0_114, %c0_115] : memref<1x1x16x16xf32, #tpu.memory_space<vmem>>, vector<1x1x16x16xf32>
      %596 = vector.shape_cast %595 : vector<1x1x16x16xf32> to vector<16x16xf32>
      %597 = vector.shape_cast %594 : vector<16x16xf32> to vector<1x1x16x16xf32>
      tpu.vector_store %arg4[%c0_112, %c0_113, %c0_114, %c0_115], %597 {strides = array<i32>} : memref<1x1x16x16xf32, #tpu.memory_space<vmem>>, vector<1x1x16x16xf32>,
    } else {
    }
    return
  }
  func.func @transform_0(%arg0: i32, %arg1: i32) -> (i32, i32, i32) {
    %c0_i32 = arith.constant 0 : i32
    %c0_i32_0 = arith.constant 0 : i32
    return %arg0, %arg1, %c0_i32 : i32, i32, i32
  }
  func.func @transform_1(%arg0: i32, %arg1: i32) -> i32 {
    %c0_i32 = arith.constant 0 : i32
    %c0_i32_0 = arith.constant 0 : i32
    return %c0_i32 : i32
  }
  func.func @transform_2(%arg0: i32, %arg1: i32) -> (i32, i32, i32, i32) {
    %c0_i32 = arith.constant 0 : i32
    %c0_i32_0 = arith.constant 0 : i32
    %c0_i32_1 = arith.constant 0 : i32
    %c0_i32_2 = arith.constant 0 : i32
    return %arg0, %c0_i32, %c0_i32_0, %c0_i32_1 : i32, i32, i32, i32
  }
}

</mosaic_0001>

<bundles_post_ra>
// kernel: tpu_custom_call.1
= control target key start
LH: loop header
LB: loop body
LE: loop exit
PB: predicated region body
PF: predicated region fallthrough
CT: control target
= control target key end

     0   :  { %s3675_s0 = inlined_call_operand.hbm [shape: f32[2,16,256], index: 0, kind: input, shape index: {}]   ;;  %s3676_s1 = inlined_call_operand.vmem [shape: f32[98], index: 1, kind: input, shape index: {}]   ;;  %s3677_s2 = inlined_call_operand.hbm [shape: f32[2,1,16,16], index: 2, kind: output, shape index: {}]  }
   0x1   :  { %3701 = sst [smem:[#allocation20_spill]] %s3675_s0 }
   0x2   :  { %3702 = sst [smem:[#allocation21_spill]] %s3676_s1 }
   0x3   :  { %3703 = sst [smem:[#allocation22_spill]] %s3677_s2 }
   0x4   :  { %7 = vsyncpa [#allocation7], 0 }
   0x5   :  { %9 = vsyncpa [#allocation7 + $0x1], 0 }
   0x6   :  { %10 = vsyncpa [#allocation9], 0 }
   0x7   :  { %11 = vsyncpa [#allocation8], 0 }
   0x8   :  { %13 = vsyncpa [#allocation8 + $0x1], 0  ;;  %s2360_s9 = smov 0   ;;  %s2362_s10 = smov 0  }
   0x9   :  { %s2364_s11 = smov 0   ;;  %s2366_s12 = smov 0  }
   0xa   :  { %s2368_s13 = smov 0   ;;  %s2370_s14 = smov 0  }
   0xb   :  { %s2372_s15 = smov 0   ;;  %s2374_s16 = smov 0  }
   0xc   :  { %s2376_s17 = smov 0   ;;  %s2378_s18 = smov 0  }
   0xd   :  { %s2380_s19 = smov 0  }
   0xe LB: > { %3704 = sst [smem:[#allocation15_spill]] %s2281_s9  ;;  %s1889_s20 = sadd.s32 4294967295, %s2321_s19   ;;  %s2321_s19 = sphi %s2380_s19, %s19_s19   ;;  %s2317_s18 = sphi %s2378_s18, %s3734_s18   ;;  %s2313_s17 = sphi %s2376_s17, %s3742_s17   ;;  %s2309_s16 = sphi %s2374_s16, %s3732_s16   ;;  %s2305_s15 = sphi %s2372_s15, %s3741_s15   ;;  %s2301_s14 = sphi %s2370_s14, %s3740_s14   ;;  %s2297_s13 = sphi %s2368_s13, %s3739_s13   ;;  %s2293_s12 = sphi %s2366_s12, %s3738_s12   ;;  %s2289_s11 = sphi %s2364_s11, %s3737_s11   ;;  %s2285_s10 = sphi %s2362_s10, %s3736_s10   ;;  %s2281_s9 = sphi %s2360_s9, %s3735_s9  }
   0xf   : > { %3705 = sst [smem:[#allocation16_spill]] %s2317_s18  ;;  %s1890_s21 = sadd.s32 4294967294, %s2321_s19  }
  0x10   : > { %p53_p0 = scmp.ne.s32.totalorder %s2297_s13, %s2293_s12  ;;  %p2416_p1 = scmp.eq.s32.totalorder %s1889_s20, 0 }
  0x11   : > { %s87_s23 = sadd.s32 1, %s2289_s11  ;;  %p97_p2 = scmp.ne.s32.totalorder %s2289_s11, %s2285_s10 }
  0x12   : > { %s3706_s22 = scalar_select %p2416_p1, 1, 0 }
  0x13   : > { %p2425_p3 = por %p2416_p1, %p53_p0  ;;  %p98_p4 = scmp.eq.s32.totalorder %s1889_s20, 3 }
  0x14   : > { %p103_p5 = scmp.ne.s32.totalorder %s2285_s10, %s2281_s9  ;;  %p104_p6 = scmp.eq.s32.totalorder %s1890_s21, 3 }
  0x15   : > { %s3707_s24 = scalar_select %p2425_p3, 1, 0 }
  0x16   : > { %p2431_p7 = por %p98_p4, %p97_p2  ;;  %p1891_p8 = scmp.ge.s32.totalorder %s2321_s19, 1 }
  0x17   : > { %p2436_p9 = por %p104_p6, %p103_p5  ;;  %p111_p10 = scmp.lt.s32.totalorder %s2321_s19, 5 }
  0x18   : > { %s3708_s25 = scalar_select %p2431_p7, 1, 0 }
  0x19   : > { %s3709_s26 = scalar_select %p2436_p9, 1, 0 }
  0x1a   : > { %s3711_s1 = sld [smem:[#allocation21_spill]]  ;;  %p2444_p11 = pnand %p1891_p8, %p111_p10 }
  0x1b   : > { %3710 = sst [smem:[#allocation17_spill]] %s3709_s26  ;;  %s28_s3 = sadd.s32 1, %s2313_s17 }
  0x1c   : > { %p2018_p12 = pneg %p2444_p11 }
  0x1e   : > { %p2019_p13 = pnand %p2018_p12, %p2416_p1 }
  0x20   : > { %s124_s29 = sshll.u32 %s3711_s1, 4  ;;  %p2152_p2 = pneg %p2019_p13  ;;  %s125_s29 = int_to_ptr.vmem [resolvable:$true] %s124_s29 }
  0x21   : > { %s2150_s4 = scalar_lea.vmem %s125_s29, 16  ;;  %p2158_p6 = scmp.lt.s32.totalorder %s125_s29, %s125_s29 }
  0x22   : > { %p2151_p0 = scmp.ne.s32.totalorder %s125_s29, %s2150_s4  ;;  %p2159_p9 = scmp.lt.s32.totalorder %s2150_s4, %s2150_s4 }
  0x24   : > { %p2153_p4 = pnand %p2152_p2, %p2151_p0  ;;  %p2160_p7 = por %p2159_p9, %p2158_p6 }
  0x26   : > { %p2154_p5 = pneg %p2153_p4 }
  0x28   : > { %p2161_p3 = pnand %p2160_p7, %p2154_p5 }
  0x2a   : > { %2164 = shalt.err (!%p2161_p3)
}
  0x2b   : > { %s2323_s5 = smov [#allocation10]   ;;  %p29_p8 = scmp.ge.s32.totalorder %s28_s3, 2 }
  0x2c   : > { %2021 = dma.vmem_to_smem (!%p2019_p13), %s125_s29, 16, %s2323_s5, [#allocation9]  }
  0x2d   : > { %s31_s6 = sadd.s32 1, %s2317_s18  ;;  %s40_s7 = sadd.s32 1, %s2301_s14 }
  0x2e   : > { %p47_p10 = scmp.ne.s32.totalorder %s2301_s14, %s2297_s13  ;;  %s3744_s3 = smov (%p29_p8, %s28_s3), 0 }
  0x2f   : > { %3713 = sst [smem:[#allocation18_spill]] %s3744_s3  ;;  %s3746_s6 = smov (!%p29_p8, %s31_s6), %s2317_s18 }
  0x30   : > { %s36_s8 = ssub.s32 %s2313_s17, %s3744_s3  ;;  %p48_p3 = scmp.eq.s32.totalorder %s2321_s19, 0 }
  0x31   : > { %p33_p7 = scmp.ge.s32.totalorder %s3746_s6, 2  ;;  %p2031_p9 = scmp.lt.s32.totalorder %s2321_s19, 4 }
  0x32   : > { %p2464_p12 = por %p48_p3, %p47_p10  ;;  %s135_s20 = sand.u32 1, %s2301_s14  }
  0x33   : > { %s3748_s6 = smov (%p33_p7, %s3746_s6), 0  ;;  %s1894_s21 = sshll.u32 %s135_s20, 4 }
  0x34   : > { %3715 = sst [smem:[#allocation19_spill]] %s3748_s6  ;;  %s35_s27 = ssub.s32 %s2317_s18, %s3748_s6 }
  0x35   : > { %s37_s28 = sor.u32 %s36_s8, %s35_s27  ;;  %p85_p13 = scmp.eq.s32.totalorder %s35_s27, 0 }
  0x36   : > { %p38_p0 = scmp.eq.s32.totalorder %s37_s28, 0  ;;  %s1895_s29 = sshll.u32 %s2313_s17, 1 }
  0x37   : > { %s2477_s4 = scalar_select %p85_p13, %s2289_s11, %s87_s23  }
  0x38   : > { %s2480_s5 = scalar_select %p38_p0, %s2301_s14, %s40_s7  }
  0x39   : > { %s1896_s1 = sshll.u32 %s2317_s18, 2  ;;  %s139_s3 = scalar_lea.vmem [#allocation6], %s1894_s21 }
  0x3a   : > { %s149_s26 = sshll.u32 %s139_s3, 4  ;;  %s145_s9 = sadd.s32 %s1896_s1, %s1895_s29  ;;  %s2483_s26 = int_to_ptr.vmem [resolvable:$true] %s149_s26 }
  0x3b   : > { %s1897_s2 = sshll.u32 %s145_s9, 7  ;;  %p2489_p2 = pnand %p2031_p9, %p2464_p12 }
  0x3c   : > { %s3717_s0 = sld [smem:[#allocation20_spill]]  ;;  %s136_s1 = scalar_lea.sflag [#allocation7], %s135_s20 }
  0x3d   : > { %p2167_p5 = pneg %p2489_p2 }
  0x42   : > { %s2496_s23 = scalar_lea.hbm %s3717_s0, %s1897_s2  ;;  %s2170_s12 = scalar_lea.hbm %s3717_s0, 1024 }
  0x43   : > { %s2165_s3 = scalar_lea.hbm %s2496_s23, 256  ;;  %p2171_p10 = scmp.lt.u32.totalorder %s2496_s23, %s3717_s0 }
  0x44   : > { %p2166_p4 = scmp.ne.s32.totalorder %s2496_s23, %s2165_s3  ;;  %p2172_p3 = scmp.lt.u32.totalorder %s2170_s12, %s2165_s3 }
  0x45   : > { %p2174_p9 = scmp.lt.u32.totalorder %s2165_s3, %s2496_s23 }
  0x46   : > { %p2168_p6 = pnand %p2167_p5, %p2166_p4  ;;  %p2173_p7 = por %p2172_p3, %p2171_p10 }
  0x48   : > { %p2169_p8 = pneg %p2168_p6  ;;  %p2175_p12 = por %p2174_p9, %p2173_p7 }
  0x4a   : > { %p2176_p13 = pnand %p2175_p12, %p2169_p8 }
  0x4c   : > { %2179 = shalt.err (!%p2176_p13)
}
  0x4d   : > { %s2180_s20 = scalar_lea.vmem %s2483_s26, 256  ;;  %s2324_s28 = smov [#allocation6]  }
  0x4e   : > { %p2181_p0 = scmp.ne.s32.totalorder %s2483_s26, %s2180_s20  ;;  %s2185_s29 = sshll.u32 %s2324_s28, 4  ;;  %s2186_s29 = int_to_ptr.vmem [resolvable:$false] %s2185_s29 }
  0x4f   : > { %s2187_s8 = scalar_lea.vmem %s2186_s29, 512  ;;  %p2188_p1 = scmp.lt.s32.totalorder %s2483_s26, %s2186_s29 }
  0x50   : > { %p2183_p4 = pnand %p2181_p0, %p2167_p5  ;;  %p2189_p10 = scmp.lt.s32.totalorder %s2187_s8, %s2180_s20 }
  0x52   : > { %p2184_p6 = pneg %p2183_p4  ;;  %p2190_p3 = por %p2189_p10, %p2188_p1 }
  0x54   : > { %p2191_p7 = pnand %p2190_p3, %p2184_p6 }
  0x56   : > { %2194 = shalt.err (!%p2191_p7)
}
  0x57   : > { %2025 = dma.hbm_to_vmem [thread:$0]  (!%p2489_p2), %s2496_s23, 256, %s2483_s26, %s136_s1  }
  0x58   : > { %158 = sbr.rel (%p2444_p11) target bundleno = 822 (0x336), region = 28  ;;  %s160_s27 = sand.u32 (!%p2444_p11), 1, %s2297_s13  }
  0x59   : > { %s1899_s3 = sshll.u32 (!%p2444_p11), %s160_s27, 4  ;;  %s161_s9 = scalar_lea.sflag (!%p2444_p11), [#allocation7], %s160_s27 }
  0x5a   : > { %s164_s7 = scalar_lea.vmem (!%p2444_p11), [#allocation6], %s1899_s3  ;;  %p3718_p5 = scmp.ne.s32.totalorder (!%p2444_p11), %s3707_s24, 0 }
  0x5f   : > { %2268 = dma.done.wait (%p3718_p5), %s161_s9, 256  }
  0x60   : > { %2270 = vsyncadd (%p3718_p5), %s161_s9, 4294967040  ;;  %p3719_p1 = scmp.ne.s32.totalorder %s3706_s22, 0 }
  0x62   : > { %2272 = dma.done.wait (%p3719_p1), [#allocation9], 16  }
  0x63   : > { %2274 = vsyncadd (%p3719_p1), [#allocation9], 4294967280 }
  0x64   : > { %173 = sfence }
  0x65   : > { %s3687_s26 = sand.u32 1, %s2285_s10   ;;  %v190_v0 = vld [vmem:[%s164_s7] sm:$0xff]  ;;  %v191_v1 = vld [vmem:[%s164_s7 + $0x8] sm:$0xff]  ;;  %p1902_p11 = scmp.ne.s32.totalorder %s2305_s15, 0 }
  0x66   : > { %s1901_s30 = sshll.u32 %s3687_s26, 4  ;;  %v192_v2 = vrot.slane %v190_v0, 4  ;;  %v198_v3 = vrot.slane %v191_v1, 4  ;;  %v226_v24 = vlaneseq (!%p1902_p11)  ;;  %v2325_v25 = vmov (!%p1902_p11), 1966171168  }
  0x67   : > { %s2537_s22 = scalar_lea.vmem [#allocation11], %s1901_s30  ;;  %v224_v26 = vunpack.c.l.s4 (!%p1902_p11), %v2325_v25 }
  0x68   : > { %v193_v4 = vadd.f32 %v192_v2, %v190_v0  ;;  %v199_v5 = vadd.f32 %v198_v3, %v191_v1  ;;  %v205_v6 = vmax.f32 %v190_v0, %v192_v2  ;;  %v211_v7 = vmax.f32 %v191_v1, %v198_v3 }
  0x69   : > { %v227_v27 = vshrl.u32 (!%p1902_p11), %v226_v24, 7  ;;  %v225_v29 = vunpack.c.0.s8 (!%p1902_p11), %v224_v26  ;;  %vm240_vm0 = vcmp.lt.s32.totalorder (!%p1902_p11), %v226_v24, 256 }
  0x6a   : > { %v194_v8 = vrot.slane %v193_v4, 2  ;;  %v200_v9 = vrot.slane %v199_v5, 2  ;;  %v206_v10 = vrot.slane %v205_v6, 2  ;;  %v212_v11 = vrot.slane %v211_v7, 2  ;;  %219 = sbr.rel (%p1902_p11) target bundleno = 121 (0x79), region = 40 }
  0x6b   : > { %v228_v31 = vsub.s32 (!%p1902_p11), %v225_v29, %v227_v27 }
  0x6c   : > { %v195_v12 = vadd.f32 %v194_v8, %v193_v4  ;;  %v201_v13 = vadd.f32 %v200_v9, %v199_v5  ;;  %v207_v14 = vmax.f32 %v205_v6, %v206_v10  ;;  %v213_v15 = vmax.f32 %v211_v7, %v212_v11 }
  0x6e   : > { %v196_v16 = vrot.slane %v195_v12, 1  ;;  %v202_v17 = vrot.slane %v201_v13, 1  ;;  %v208_v18 = vrot.slane %v207_v14, 1  ;;  %v214_v19 = vrot.slane %v213_v15, 1 }
  0x70   : > { %v197_v20 = vadd.f32 %v196_v16, %v195_v12  ;;  %v203_v21 = vadd.f32 %v202_v17, %v201_v13  ;;  %v209_v22 = vmax.f32 %v207_v14, %v208_v18  ;;  %v215_v23 = vmax.f32 %v213_v15, %v214_v19 }
  0x72   : > { %v222_v28 = vcombine.low %v197_v20, %v203_v21  ;;  %v245_v30 = vcombine.low %v209_v22, %v215_v23 }
  0x74   : > { %v229_v32 = vrot.slane %v222_v28, %v228_v31  ;;  %v252_v33 = vrot.slane %v245_v30, %v228_v31 }
  0x76   : > { %v236_v34 = vrot.slane %v229_v32, %v228_v31  ;;  %v259_v35 = vrot.slane %v252_v33, %v228_v31 }
  0x78   : > { %242 = vst.msk [vmem:[#allocation2] sm:$0x3] %vm240_vm0, %v236_v34  ;;  %261 = vst.msk [vmem:[#allocation3] sm:$0x3] %vm240_vm0, %v259_v35 }
  0x79 PF: > { %p1903_p2 = scmp.le.s32.totalorder %s2305_s15, 0 }
  0x7a   : > { %v273_v36 = vlaneseq (!%p1903_p2)  ;;  %v2326_v37 = vmov (!%p1903_p2), 1966171168   ;;  %v269_v40 = vcombine.low (!%p1903_p2), %v197_v20, %v203_v21  ;;  %v294_v42 = vcombine.low (!%p1903_p2), %v209_v22, %v215_v23 }
  0x7b   : > { %265 = sbr.rel (%p1903_p2) target bundleno = 136 (0x88), region = 44  ;;  %v271_v38 = vunpack.c.l.s4 (!%p1903_p2), %v2326_v37 }
  0x7c   : > { %v274_v39 = vshrl.u32 (!%p1903_p2), %v273_v36, 7  ;;  %vm288_vm1 = vcmp.lt.s32.totalorder (!%p1903_p2), %v273_v36, 256 }
  0x7d   : > { %v272_v41 = vunpack.c.0.s8 (!%p1903_p2), %v271_v38 }
  0x7f   : > { %v275_v43 = vsub.s32 (!%p1903_p2), %v272_v41, %v274_v39  ;;  %v266_v46 = vld [vmem:[#allocation2] sm:$0x3] (!%p1903_p2)  ;;  %v291_v47 = vld [vmem:[#allocation3] sm:$0x3] (!%p1903_p2) }
  0x81   : > { %v276_v44 = vrot.slane (!%p1903_p2), %v269_v40, %v275_v43  ;;  %v301_v45 = vrot.slane (!%p1903_p2), %v294_v42, %v275_v43 }
  0x83   : > { %v283_v48 = vrot.slane %v276_v44, %v275_v43  ;;  %v308_v49 = vrot.slane %v301_v45, %v275_v43 }
  0x85   : > { %v285_v50 = vadd.f32 %v283_v48, %v266_v46  ;;  %v310_v51 = vmax.f32 %v291_v47, %v308_v49 }
  0x87   : > { %290 = vst.msk [vmem:[#allocation2] sm:$0x3] %vm288_vm1, %v285_v50  ;;  %311 = vst.msk [vmem:[#allocation3] sm:$0x3] %vm288_vm1, %v310_v51 }
  0x88 PF: > { %p1904_p8 = scmp.ne.s32.totalorder %s2305_s15, 1 }
  0x89   : > { %v327_v52 = vlaneseq (!%p1904_p8)  ;;  %vm316_vm2 = vcmask (!%p1904_p8), 179200   ;;  %v2327_v54 = vmov (!%p1904_p8), 0.0   ;;  %s2328_s24 = smov (!%p1904_p8), 115   ;;  %s2329_s6 = smov (!%p1904_p8), 3   ;;  %vm319_vm3 = vcmask (!%p1904_p8), 177152  }
  0x8a   : > { %315 = sbr.rel (%p1904_p8) target bundleno = 794 (0x31a), region = 48  ;;  %317 = vst.msk [vmem:[#allocation4] sm:$0xff] (!%p1904_p8), %vm316_vm2, %v2327_v54  ;;  %318 = vst.msk [vmem:[#allocation4 + $0x8] sm:$0xff] (!%p1904_p8), %vm316_vm2, %v2327_v54  ;;  %s2330_s15 = smov (!%p1904_p8), 99   ;;  %vm334_vm4 = vcmask (!%p1904_p8), 147480   ;;  %vm1773_vm5 = vcmask (!%p1904_p8), 130048  }
  0x8b   : > { %v328_v53 = vshrl.u32 (!%p1904_p8), %v327_v52, 7  ;;  %321 = vst.msk [vmem:[#allocation5] sm:$0xff] (!%p1904_p8), %vm316_vm2, %v2327_v54  ;;  %322 = vst.msk [vmem:[#allocation5 + $0x8] sm:$0xff] (!%p1904_p8), %vm316_vm2, %v2327_v54  ;;  %s2331_s23 = smov (!%p1904_p8), 83   ;;  %s2332_s1 = smov (!%p1904_p8), 67  }
  0x8c   : > { %s2333_s12 = smov (!%p1904_p8), 51   ;;  %s2334_s21 = smov (!%p1904_p8), 35   ;;  %323 = vst.msk [vmem:[#allocation5 + $0x10] sm:$0x3f] (!%p1904_p8), %vm319_vm3, %v2327_v54  ;;  %320 = vst.msk [vmem:[#allocation4 + $0x10] sm:$0x3f] (!%p1904_p8), %vm319_vm3, %v2327_v54 }
  0x8d   : > { %v329_v56 = vsub.s32 (!%p1904_p8), 0, %v328_v53  ;;  %v403_v60 = vsub.s32 (!%p1904_p8), 1, %v328_v53  ;;  %s2335_s2 = smov (!%p1904_p8), 19   ;;  %s2554_s20 = sld [smem:[#allocation10 + $0x31]] (!%p1904_p8) }
  0x8e   : > { %v324_v55 = vld [vmem:[#allocation2] sm:$0x3] (!%p1904_p8)  ;;  %v325_v57 = vld [vmem:[#allocation3] sm:$0x3] (!%p1904_p8)  ;;  %s2556_s28 = sld [smem:[#allocation10]] (!%p1904_p8)  ;;  %s2558_s29 = sld [smem:[#allocation10 + $0x1]] (!%p1904_p8) }
  0x8f   : > { %v330_v58 = vrot.slane (!%p1904_p8), %v324_v55, %v329_v56  ;;  %v340_v59 = vrot.slane (!%p1904_p8), %v325_v57, %v329_v56  ;;  %v412_v61 = vrot.slane (!%p1904_p8), %v325_v57, %v403_v60  ;;  %v404_v62 = vrot.slane (!%p1904_p8), %v324_v55, %v403_v60  ;;  %s2562_s8 = sld [smem:[#allocation10 + $0x32]] (!%p1904_p8)  ;;  %s2587_s3 = sld [smem:[#allocation10 + $0x33]] (!%p1904_p8) }
  0x90   : > { %s2569_s27 = sld [smem:[#allocation10 + $0x2]] (!%p1904_p8)  ;;  %s3694_s9 = smov (!%p1904_p8), 127  }
  0x91   : > { %345 = vrot.lane.b32.xlu1 %v330_v58, %s2328_s24  ;;  %331 = vrot.lane.b32.xlu0 %v330_v58, %s2329_s6  ;;  %s2598_s7 = sld [smem:[#allocation10 + $0x3]]  ;;  %s2607_s30 = sld [smem:[#allocation10 + $0x34]] }
  0x92   : > { %s2674_s26 = sld [smem:[#allocation10 + $0x37]]  ;;  %s3724_s0 = smov 125  }
  0x93   : > { %v484_v11 = vstv %s2554_s20  ;;  %s3690_s20 = smov 123   ;;  %s3725_s18 = smov 124  }
  0x94   : > { %v479_v12 = vstv %s2556_s28  ;;  %v491_v13 = vstv %s2558_s29  ;;  %s2687_s28 = sld [smem:[#allocation10 + $0x8]]  ;;  %s2696_s29 = sld [smem:[#allocation10 + $0x39]] }
  0x95   : > { %349 = vrot.lane.b32.xlu1 %v340_v59, %s2328_s24  ;;  %341 = vrot.lane.b32.xlu0 %v340_v59, %s2329_s6  ;;  %v504_v21 = vstv %s2562_s8  ;;  %v532_v30 = vstv %s2587_s3  ;;  %s3688_s8 = smov 122   ;;  %s2727_s3 = sld [smem:[#allocation10 + $0xa]] }
  0x96   : > { %v519_v26 = vstv %s2569_s27  ;;  %s2707_s27 = sld [smem:[#allocation10 + $0x9]] }
  0x97   : > { %v547_v34 = vstv %s2598_s7  ;;  %v560_v38 = vstv %s2607_s30  ;;  %s2736_s7 = sld [smem:[#allocation10 + $0x3b]] }
  0x98   : > { %s2745_s30 = sld [smem:[#allocation10 + $0xb]] }
  0x99   : > { %357 = vrot.lane.b32.xlu1 %v340_v59, %s2330_s15  ;;  %353 = vrot.lane.b32.xlu0 %v330_v58, %s2330_s15 }
  0x9d   : > { %365 = vrot.lane.b32.xlu1 %v340_v59, %s2331_s23  ;;  %361 = vrot.lane.b32.xlu0 %v330_v58, %s2331_s23 }
  0xa1   : > { %373 = vrot.lane.b32.xlu1 %v340_v59, %s2332_s1  ;;  %369 = vrot.lane.b32.xlu0 %v330_v58, %s2332_s1 }
  0xa5   : > { %381 = vrot.lane.b32.xlu1 %v340_v59, %s2333_s12  ;;  %377 = vrot.lane.b32.xlu0 %v330_v58, %s2333_s12 }
  0xa9   : > { %389 = vrot.lane.b32.xlu1 %v340_v59, %s2334_s21  ;;  %385 = vrot.lane.b32.xlu0 %v330_v58, %s2334_s21 }
  0xad   : > { %397 = vrot.lane.b32.xlu1 %v340_v59, %s2335_s2  ;;  %393 = vrot.lane.b32.xlu0 %v330_v58, %s2335_s2 }
  0xb1   : > { %413 = vrot.lane.b32.xlu1 %v412_v61, %s2329_s6  ;;  %405 = vrot.lane.b32.xlu0 %v404_v62, %s2329_s6  ;;  %s2616_s6 = sld [smem:[#allocation10 + $0x4]] }
  0xb5   : > { %421 = vrot.lane.b32.xlu1 %v412_v61, %s2328_s24  ;;  %417 = vrot.lane.b32.xlu0 %v404_v62, %s2328_s24  ;;  %s3692_s24 = smov 126  }
  0xb7   : > { %v575_v42 = vstv %s2616_s6  ;;  %s2754_s6 = sld [smem:[#allocation10 + $0x3c]] }
  0xb9   : > { %429 = vrot.lane.b32.xlu1 %v412_v61, %s2330_s15  ;;  %425 = vrot.lane.b32.xlu0 %v404_v62, %s2330_s15  ;;  %s2625_s15 = sld [smem:[#allocation10 + $0x35]] }
  0xbd   : > { %437 = vrot.lane.b32.xlu1 %v412_v61, %s2331_s23  ;;  %433 = vrot.lane.b32.xlu0 %v404_v62, %s2331_s23  ;;  %s3696_s23 = smov 125  }
  0xbf   : > { %v588_v46 = vstv %s2625_s15  ;;  %s2761_s15 = sld [smem:[#allocation10 + $0xc]] }
  0xc1   : > { %445 = vrot.lane.b32.xlu1 %v412_v61, %s2332_s1  ;;  %441 = vrot.lane.b32.xlu0 %v404_v62, %s2332_s1  ;;  %s2634_s1 = sld [smem:[#allocation10 + $0x5]] }
  0xc5   : > { %453 = vrot.lane.b32.xlu1 %v412_v61, %s2333_s12  ;;  %449 = vrot.lane.b32.xlu0 %v404_v62, %s2333_s12  ;;  %s2643_s12 = sld [smem:[#allocation10 + $0x36]] }
  0xc7   : > { %v603_v50 = vstv %s2634_s1  ;;  %s2768_s1 = sld [smem:[#allocation10 + $0x3d]] }
  0xc9   : > { %461 = vrot.lane.b32.xlu1 %v412_v61, %s2334_s21  ;;  %457 = vrot.lane.b32.xlu0 %v404_v62, %s2334_s21  ;;  %s3698_s21 = smov 124  }
  0xcb   : > { %v616_v59 = vstv %s2643_s12  ;;  %s2777_s12 = sld [smem:[#allocation10 + $0xd]] }
  0xcd   : > { %469 = vrot.lane.b32.xlu1 %v412_v61, %s2335_s2  ;;  %465 = vrot.lane.b32.xlu0 %v404_v62, %s2335_s2  ;;  %s2652_s2 = sld [smem:[#allocation10 + $0x6]] }
 0x103   : > { %v346_v63 = vpop.permute.xlu1 %345  ;;  %v332_v0 = vpop.permute.xlu0 %331 }
 0x104   : > { %348 = vst.msk [vmem:[#allocation4 + $0x4] sm:$0x1] %vm334_vm4, %v346_v63  ;;  %335 = vst.msk [vmem:[#allocation4 + $0x3] sm:$0x1] %vm334_vm4, %v332_v0 }
 0x107   : > { %v350_v1 = vpop.permute.xlu1 %349  ;;  %v342_v2 = vpop.permute.xlu0 %341 }
 0x108   : > { %352 = vst.msk [vmem:[#allocation5 + $0x4] sm:$0x1] %vm334_vm4, %v350_v1  ;;  %344 = vst.msk [vmem:[#allocation5 + $0x3] sm:$0x1] %vm334_vm4, %v342_v2  ;;  %v631_v1 = vstv %s2652_s2  ;;  %s2786_s2 = sld [smem:[#allocation10 + $0x3e]] }
 0x10b   : > { %v358_v3 = vpop.permute.xlu1 %357  ;;  %v354_v4 = vpop.permute.xlu0 %353 }
 0x10c   : > { %360 = vst.msk [vmem:[#allocation5 + $0x5] sm:$0x1] %vm334_vm4, %v358_v3  ;;  %356 = vst.msk [vmem:[#allocation4 + $0x5] sm:$0x1] %vm334_vm4, %v354_v4  ;;  %v644_v4 = vstv %s2674_s26  ;;  %s2718_s26 = sld [smem:[#allocation10 + $0x3a]] }
 0x10f   : > { %v366_v5 = vpop.permute.xlu1 %365  ;;  %v362_v6 = vpop.permute.xlu0 %361 }
 0x110   : > { %368 = vst.msk [vmem:[#allocation5 + $0x6] sm:$0x1] %vm334_vm4, %v366_v5  ;;  %364 = vst.msk [vmem:[#allocation4 + $0x6] sm:$0x1] %vm334_vm4, %v362_v6 }
 0x113   : > { %v374_v7 = vpop.permute.xlu1 %373  ;;  %v370_v8 = vpop.permute.xlu0 %369 }
 0x114   : > { %376 = vst.msk [vmem:[#allocation5 + $0x7] sm:$0x1] %vm334_vm4, %v374_v7  ;;  %372 = vst.msk [vmem:[#allocation4 + $0x7] sm:$0x1] %vm334_vm4, %v370_v8  ;;  %v675_v8 = vstv %s2687_s28  ;;  %s2793_s28 = sld [smem:[#allocation10 + $0xf]] }
 0x117   : > { %v382_v9 = vpop.permute.xlu1 %381  ;;  %v378_v10 = vpop.permute.xlu0 %377 }
 0x118   : > { %384 = vst.msk [vmem:[#allocation5 + $0x8] sm:$0x1] %vm334_vm4, %v382_v9  ;;  %380 = vst.msk [vmem:[#allocation4 + $0x8] sm:$0x1] %vm334_vm4, %v378_v10 }
 0x11b   : > { %v2571_v14 = vld [vmem:[#allocation5] sm:$0xff]  ;;  %v2573_v15 = vld [vmem:[#allocation4] sm:$0xff]  ;;  %v390_v16 = vpop.permute.xlu1 %389  ;;  %v386_v17 = vpop.permute.xlu0 %385 }
 0x11c   : > { %v485_v18 = vmul.f32 %v484_v11, %v2571_v14  ;;  %v480_v19 = vmul.f32 %v479_v12, %v2573_v15  ;;  %392 = vst.msk [vmem:[#allocation5 + $0x9] sm:$0x1] %vm334_vm4, %v390_v16  ;;  %388 = vst.msk [vmem:[#allocation4 + $0x9] sm:$0x1] %vm334_vm4, %v386_v17  ;;  %v492_v20 = vmul.f32 %v491_v13, %v2573_v15 }
 0x11d   : > { %v505_v25 = vmul.f32 %v504_v21, %v2571_v14  ;;  %v520_v29 = vmul.f32 %v519_v26, %v2573_v15  ;;  %v533_v33 = vmul.f32 %v532_v30, %v2571_v14  ;;  %v548_v37 = vmul.f32 %v547_v34, %v2573_v15 }
 0x11e   : > { %v2589_v22 = vadd.f32 %v485_v18, %v480_v19  ;;  %496 = vrot.lane.b32.xlu0 %v492_v20, %s3694_s9  ;;  %v561_v41 = vmul.f32 %v560_v38, %v2571_v14  ;;  %v576_v45 = vmul.f32 %v575_v42, %v2573_v15  ;;  %v589_v49 = vmul.f32 %v588_v46, %v2571_v14 }
 0x11f   : > { %v398_v23 = vpop.permute.xlu1 %397  ;;  %v394_v24 = vpop.permute.xlu0 %393  ;;  %v604_v58 = vmul.f32 %v603_v50, %v2573_v15  ;;  %v617_v0 = vmul.f32 %v616_v59, %v2571_v14  ;;  %v632_v3 = vmul.f32 %v631_v1, %v2573_v15  ;;  %v645_v6 = vmul.f32 %v644_v4, %v2571_v14  ;;  %v2704_v7 = vld [vmem:[#allocation4 + $0x1] sm:$0xff] }
 0x120   : > { %400 = vst.msk [vmem:[#allocation5 + $0xa] sm:$0x1] %vm334_vm4, %v398_v23  ;;  %396 = vst.msk [vmem:[#allocation4 + $0xa] sm:$0x1] %vm334_vm4, %v394_v24  ;;  %v676_v10 = vmul.f32 %v675_v8, %v2704_v7  ;;  %v703_v15 = vstv %s2707_s27  ;;  %v716_v18 = vstv %s2718_s26  ;;  %s2809_s27 = sld [smem:[#allocation10 + $0x10]]  ;;  %s2818_s26 = sld [smem:[#allocation10 + $0x41]] }
 0x121   : > { %v704_v17 = vmul.f32 %v703_v15, %v2704_v7 }
 0x122   : > { %509 = vrot.lane.b32.xlu0 %v505_v25, %s3694_s9  ;;  %v744_v25 = vstv %s2736_s7  ;;  %s2832_s7 = sld [smem:[#allocation10 + $0x42]] }
 0x123   : > { %v414_v27 = vpop.permute.xlu1 %413  ;;  %v406_v28 = vpop.permute.xlu0 %405 }
 0x124   : > { %416 = vst.msk [vmem:[#allocation5 + $0xb] sm:$0x1] %vm334_vm4, %v414_v27  ;;  %408 = vst.msk [vmem:[#allocation4 + $0xb] sm:$0x1] %vm334_vm4, %v406_v28  ;;  %v759_v28 = vstv %s2745_s30  ;;  %s2839_s30 = sld [smem:[#allocation10 + $0x12]] }
 0x126   : > { %524 = vrot.lane.b32.xlu0 %v520_v29, %s3692_s24 }
 0x127   : > { %v422_v31 = vpop.permute.xlu1 %421  ;;  %v418_v32 = vpop.permute.xlu0 %417 }
 0x128   : > { %424 = vst.msk [vmem:[#allocation5 + $0xc] sm:$0x1] %vm334_vm4, %v422_v31  ;;  %420 = vst.msk [vmem:[#allocation4 + $0xc] sm:$0x1] %vm334_vm4, %v418_v32  ;;  %v772_v31 = vstv %s2754_s6  ;;  %s2848_s6 = sld [smem:[#allocation10 + $0x43]] }
 0x12a   : > { %537 = vrot.lane.b32.xlu0 %v533_v33, %s3692_s24 }
 0x12b   : > { %v430_v35 = vpop.permute.xlu1 %429  ;;  %v426_v36 = vpop.permute.xlu0 %425 }
 0x12c   : > { %432 = vst.msk [vmem:[#allocation5 + $0xd] sm:$0x1] %vm334_vm4, %v430_v35  ;;  %428 = vst.msk [vmem:[#allocation4 + $0xd] sm:$0x1] %vm334_vm4, %v426_v36  ;;  %v787_v35 = vstv %s2761_s15  ;;  %s2857_s15 = sld [smem:[#allocation10 + $0x13]] }
 0x12e   : > { %552 = vrot.lane.b32.xlu0 %v548_v37, %s3696_s23  ;;  %v788_v37 = vmul.f32 %v787_v35, %v2704_v7 }
 0x12f   : > { %v438_v39 = vpop.permute.xlu1 %437  ;;  %v434_v40 = vpop.permute.xlu0 %433 }
 0x130   : > { %440 = vst.msk [vmem:[#allocation5 + $0xe] sm:$0x1] %vm334_vm4, %v438_v39  ;;  %436 = vst.msk [vmem:[#allocation4 + $0xe] sm:$0x1] %vm334_vm4, %v434_v40  ;;  %v800_v39 = vstv %s2768_s1  ;;  %s2866_s1 = sld [smem:[#allocation10 + $0x44]] }
 0x132   : > { %565 = vrot.lane.b32.xlu0 %v561_v41, %s3696_s23 }
 0x133   : > { %v446_v43 = vpop.permute.xlu1 %445  ;;  %v442_v44 = vpop.permute.xlu0 %441 }
 0x134   : > { %448 = vst.msk [vmem:[#allocation5 + $0xf] sm:$0x1] %vm334_vm4, %v446_v43  ;;  %444 = vst.msk [vmem:[#allocation4 + $0xf] sm:$0x1] %vm334_vm4, %v442_v44 }
 0x136   : > { %580 = vrot.lane.b32.xlu0 %v576_v45, %s3698_s21  ;;  %v828_v45 = vstv %s2786_s2  ;;  %s2888_s2 = sld [smem:[#allocation10 + $0x45]] }
 0x137   : > { %v454_v47 = vpop.permute.xlu1 %453  ;;  %v450_v48 = vpop.permute.xlu0 %449 }
 0x138   : > { %456 = vst.msk [vmem:[#allocation5 + $0x10] sm:$0x1] %vm334_vm4, %v454_v47  ;;  %452 = vst.msk [vmem:[#allocation4 + $0x10] sm:$0x1] %vm334_vm4, %v450_v48  ;;  %v2806_v48 = vld [vmem:[#allocation4 + $0x2] sm:$0xff] }
 0x13a   : > { %593 = vrot.lane.b32.xlu0 %v589_v49, %s3698_s21  ;;  %v859_v49 = vstv %s2793_s28  ;;  %s2897_s28 = sld [smem:[#allocation10 + $0x16]] }
 0x13b   : > { %v2655_v51 = vld [vmem:[#allocation5 + $0x8] sm:$0xff]  ;;  %v2657_v52 = vld [vmem:[#allocation4 + $0x8] sm:$0xff]  ;;  %v462_v53 = vpop.permute.xlu1 %461  ;;  %v458_v54 = vpop.permute.xlu0 %457 }
 0x13c   : > { %v486_v55 = vmul.f32 %v484_v11, %v2655_v51  ;;  %v481_v56 = vmul.f32 %v479_v12, %v2657_v52  ;;  %464 = vst.msk [vmem:[#allocation5 + $0x11] sm:$0x1] %vm334_vm4, %v462_v53  ;;  %460 = vst.msk [vmem:[#allocation4 + $0x11] sm:$0x1] %vm334_vm4, %v458_v54  ;;  %v493_v57 = vmul.f32 %v491_v13, %v2657_v52  ;;  %v2715_v11 = vld [vmem:[#allocation5 + $0x1] sm:$0xff]  ;;  %v688_v12 = vstv %s2696_s29  ;;  %s2800_s29 = sld [smem:[#allocation10 + $0x40]] }
 0x13d   : > { %v506_v63 = vmul.f32 %v504_v21, %v2655_v51  ;;  %v521_v2 = vmul.f32 %v519_v26, %v2657_v52  ;;  %v534_v5 = vmul.f32 %v532_v30, %v2655_v51  ;;  %v549_v9 = vmul.f32 %v547_v34, %v2657_v52 }
 0x13e   : > { %v2676_v60 = vadd.f32 %v486_v55, %v481_v56  ;;  %498 = vrot.lane.b32.xlu1 %v493_v57, %s3694_s9  ;;  %608 = vrot.lane.b32.xlu0 %v604_v58, %s3690_s20  ;;  %v562_v13 = vmul.f32 %v560_v38, %v2655_v51  ;;  %v689_v14 = vmul.f32 %v688_v12, %v2715_v11  ;;  %v731_v21 = vstv %s2727_s3  ;;  %s2825_s3 = sld [smem:[#allocation10 + $0x11]] }
 0x13f   : > { %v470_v61 = vpop.permute.xlu1 %469  ;;  %v466_v62 = vpop.permute.xlu0 %465  ;;  %v577_v16 = vmul.f32 %v575_v42, %v2657_v52  ;;  %v590_v19 = vmul.f32 %v588_v46, %v2655_v51  ;;  %v717_v20 = vmul.f32 %v716_v18, %v2715_v11  ;;  %v605_v23 = vmul.f32 %v603_v50, %v2657_v52  ;;  %v2774_v34 = vld [vmem:[#allocation4 + $0x9] sm:$0xff]  ;;  %v2783_v38 = vld [vmem:[#allocation5 + $0x9] sm:$0xff] }
 0x140   : > { %472 = vst.msk [vmem:[#allocation5 + $0x12] sm:$0x1] %vm334_vm4, %v470_v61  ;;  %468 = vst.msk [vmem:[#allocation4 + $0x12] sm:$0x1] %vm334_vm4, %v466_v62  ;;  %v732_v24 = vmul.f32 %v731_v21, %v2704_v7  ;;  %v618_v26 = vmul.f32 %v616_v59, %v2655_v51  ;;  %v745_v27 = vmul.f32 %v744_v25, %v2715_v11  ;;  %v815_v42 = vstv %s2777_s12  ;;  %s2877_s12 = sld [smem:[#allocation10 + $0x14]] }
 0x141   : > { %v633_v29 = vmul.f32 %v631_v1, %v2657_v52  ;;  %v760_v30 = vmul.f32 %v759_v28, %v2704_v7  ;;  %v646_v32 = vmul.f32 %v644_v4, %v2655_v51  ;;  %v773_v33 = vmul.f32 %v772_v31, %v2715_v11  ;;  %v2815_v52 = vld [vmem:[#allocation5 + $0x2] sm:$0xff] }
 0x142   : > { %511 = vrot.lane.b32.xlu1 %v506_v63, %s3694_s9  ;;  %621 = vrot.lane.b32.xlu0 %v617_v0, %s3690_s20  ;;  %v677_v36 = vmul.f32 %v675_v8, %v2774_v34  ;;  %v690_v40 = vmul.f32 %v688_v12, %v2783_v38  ;;  %v801_v41 = vmul.f32 %v800_v39, %v2715_v11  ;;  %v872_v53 = vstv %s2800_s29  ;;  %s2906_s29 = sld [smem:[#allocation10 + $0x47]] }
 0x143   : > { %v705_v43 = vmul.f32 %v703_v15, %v2774_v34  ;;  %v816_v44 = vmul.f32 %v815_v42, %v2704_v7  ;;  %v718_v46 = vmul.f32 %v716_v18, %v2783_v38  ;;  %v829_v47 = vmul.f32 %v828_v45, %v2715_v11 }
 0x144   : > { %v733_v50 = vmul.f32 %v731_v21, %v2774_v34  ;;  %v860_v51 = vmul.f32 %v859_v49, %v2806_v48  ;;  %v746_v54 = vmul.f32 %v744_v25, %v2783_v38  ;;  %v873_v55 = vmul.f32 %v872_v53, %v2815_v52  ;;  %v2885_v21 = vld [vmem:[#allocation5 + $0xa] sm:$0xff] }
 0x145   : > { %v887_v56 = vstv %s2809_s27  ;;  %v761_v57 = vmul.f32 %v759_v28, %v2774_v34  ;;  %v900_v59 = vstv %s2818_s26  ;;  %v774_v61 = vmul.f32 %v772_v31, %v2783_v38  ;;  %s2918_s27 = sld [smem:[#allocation10 + $0x17]]  ;;  %s2931_s26 = sld [smem:[#allocation10 + $0x48]] }
 0x146   : > { %526 = vrot.lane.b32.xlu1 %v521_v2, %s3692_s24  ;;  %636 = vrot.lane.b32.xlu0 %v632_v3, %s3688_s8  ;;  %v888_v58 = vmul.f32 %v887_v56, %v2806_v48  ;;  %v901_v62 = vmul.f32 %v900_v59, %v2815_v52  ;;  %v915_v63 = vstv %s2825_s3  ;;  %v789_v0 = vmul.f32 %v787_v35, %v2774_v34  ;;  %s2944_s3 = sld [smem:[#allocation10 + $0x18]] }
 0x147   : > { %v916_v1 = vmul.f32 %v915_v63, %v2806_v48  ;;  %v928_v2 = vstv %s2832_s7  ;;  %v802_v4 = vmul.f32 %v800_v39, %v2783_v38  ;;  %v956_v12 = vstv %s2848_s6  ;;  %s2959_s7 = sld [smem:[#allocation10 + $0x49]]  ;;  %s2986_s6 = sld [smem:[#allocation10 + $0x4a]] }
 0x148   : > { %v957_v15 = vmul.f32 %v956_v12, %v2815_v52  ;;  %v874_v25 = vmul.f32 %v872_v53, %v2885_v21  ;;  %v1012_v31 = vstv %s2888_s2  ;;  %v902_v35 = vmul.f32 %v900_v59, %v2885_v21  ;;  %s3039_s2 = sld [smem:[#allocation10 + $0x4c]] }
 0x14a   : > { %539 = vrot.lane.b32.xlu1 %v534_v5, %s3692_s24  ;;  %649 = vrot.lane.b32.xlu0 %v645_v6, %s3688_s8  ;;  %v929_v5 = vmul.f32 %v928_v2, %v2815_v52  ;;  %v943_v6 = vstv %s2839_s30  ;;  %s2970_s30 = sld [smem:[#allocation10 + $0x19]] }
 0x14e   : > { %554 = vrot.lane.b32.xlu1 %v549_v9, %s3696_s23  ;;  %680 = vrot.lane.b32.xlu0 %v676_v10, %s3694_s9  ;;  %v817_v9 = vmul.f32 %v815_v42, %v2774_v34  ;;  %v944_v10 = vmul.f32 %v943_v6, %v2806_v48 }
 0x152   : > { %567 = vrot.lane.b32.xlu1 %v562_v13, %s3696_s23  ;;  %693 = vrot.lane.b32.xlu0 %v689_v14, %s3694_s9  ;;  %v830_v14 = vmul.f32 %v828_v45, %v2783_v38  ;;  %v2928_v45 = vld [vmem:[#allocation5 + $0x3] sm:$0xff] }
 0x156   : > { %582 = vrot.lane.b32.xlu1 %v577_v16, %s3698_s21  ;;  %708 = vrot.lane.b32.xlu0 %v704_v17, %s3692_s24  ;;  %v2874_v16 = vld [vmem:[#allocation4 + $0xa] sm:$0xff]  ;;  %v971_v17 = vstv %s2857_s15  ;;  %s3000_s15 = sld [smem:[#allocation10 + $0x1a]] }
 0x157   : > { %v917_v42 = vmul.f32 %v915_v63, %v2874_v16  ;;  %v945_v59 = vmul.f32 %v943_v6, %v2874_v16  ;;  %v1084_v63 = vstv %s2931_s26  ;;  %v1099_v6 = vstv %s2944_s3  ;;  %s3090_s26 = sld [smem:[#allocation10 + $0x4f]] }
 0x158   : > { %s3110_s3 = sld [smem:[#allocation10 + $0x3f]] }
 0x15a   : > { %595 = vrot.lane.b32.xlu1 %v590_v19, %s3698_s21  ;;  %721 = vrot.lane.b32.xlu0 %v717_v20, %s3692_s24  ;;  %v861_v19 = vmul.f32 %v859_v49, %v2874_v16  ;;  %v972_v20 = vmul.f32 %v971_v17, %v2806_v48 }
 0x15e   : > { %610 = vrot.lane.b32.xlu1 %v605_v23, %s3690_s20  ;;  %736 = vrot.lane.b32.xlu0 %v732_v24, %s3696_s23  ;;  %v984_v23 = vstv %s2866_s1  ;;  %s3011_s1 = sld [smem:[#allocation10 + $0x4b]] }
 0x162   : > { %623 = vrot.lane.b32.xlu1 %v618_v26, %s3690_s20  ;;  %749 = vrot.lane.b32.xlu0 %v745_v27, %s3696_s23  ;;  %v985_v26 = vmul.f32 %v984_v23, %v2815_v52  ;;  %v999_v27 = vstv %s2877_s12  ;;  %s3026_s12 = sld [smem:[#allocation10 + $0x1b]] }
 0x166   : > { %638 = vrot.lane.b32.xlu1 %v633_v29, %s3688_s8  ;;  %764 = vrot.lane.b32.xlu0 %v760_v30, %s3698_s21  ;;  %v889_v29 = vmul.f32 %v887_v56, %v2874_v16  ;;  %v1000_v30 = vmul.f32 %v999_v27, %v2806_v48 }
 0x16a   : > { %651 = vrot.lane.b32.xlu1 %v646_v32, %s3688_s8  ;;  %777 = vrot.lane.b32.xlu0 %v773_v33, %s3698_s21 }
 0x16e   : > { %682 = vrot.lane.b32.xlu1 %v677_v36, %s3694_s9  ;;  %792 = vrot.lane.b32.xlu0 %v788_v37, %s3690_s20  ;;  %v1013_v36 = vmul.f32 %v1012_v31, %v2815_v52  ;;  %v2915_v37 = vld [vmem:[#allocation4 + $0x3] sm:$0xff] }
 0x172   : > { %695 = vrot.lane.b32.xlu1 %v690_v40, %s3694_s9  ;;  %805 = vrot.lane.b32.xlu0 %v801_v41, %s3690_s20  ;;  %v1043_v40 = vstv %s2897_s28  ;;  %s3050_s28 = sld [smem:[#allocation10 + $0x1d]] }
 0x176   : > { %710 = vrot.lane.b32.xlu1 %v705_v43, %s3692_s24  ;;  %820 = vrot.lane.b32.xlu0 %v816_v44, %s3688_s8  ;;  %v1044_v43 = vmul.f32 %v1043_v40, %v2915_v37 }
 0x17a   : > { %723 = vrot.lane.b32.xlu1 %v718_v46, %s3692_s24  ;;  %833 = vrot.lane.b32.xlu0 %v829_v47, %s3688_s8  ;;  %v1056_v46 = vstv %s2906_s29  ;;  %s3061_s29 = sld [smem:[#allocation10 + $0x4e]] }
 0x17b   : > { %v1057_v53 = vmul.f32 %v1056_v46, %v2928_v45 }
 0x17e   : > { %738 = vrot.lane.b32.xlu1 %v733_v50, %s3696_s23  ;;  %864 = vrot.lane.b32.xlu0 %v860_v51, %s3694_s9  ;;  %v930_v51 = vmul.f32 %v928_v2, %v2885_v21 }
 0x182   : > { %751 = vrot.lane.b32.xlu1 %v746_v54, %s3696_s23  ;;  %877 = vrot.lane.b32.xlu0 %v873_v55, %s3694_s9  ;;  %v1071_v55 = vstv %s2918_s27  ;;  %s3074_s27 = sld [smem:[#allocation10 + $0x1e]] }
 0x186   : > { %766 = vrot.lane.b32.xlu1 %v761_v57, %s3698_s21  ;;  %892 = vrot.lane.b32.xlu0 %v888_v58, %s3692_s24 }
 0x18a   : > { %779 = vrot.lane.b32.xlu1 %v774_v61, %s3698_s21  ;;  %905 = vrot.lane.b32.xlu0 %v901_v62, %s3692_s24  ;;  %v1072_v61 = vmul.f32 %v1071_v55, %v2915_v37 }
 0x18e   : > { %794 = vrot.lane.b32.xlu1 %v789_v0, %s3690_s20  ;;  %920 = vrot.lane.b32.xlu0 %v916_v1, %s3696_s23 }
 0x190   : > { %v497_v3 = vpop.permute.xlu0 %496 }
 0x191   : > { %v502_v32 = vadd.f32 %v497_v3, %v2589_v22  ;;  %v958_v3 = vmul.f32 %v956_v12, %v2885_v21 }
 0x192   : > { %807 = vrot.lane.b32.xlu1 %v802_v4, %s3690_s20  ;;  %933 = vrot.lane.b32.xlu0 %v929_v5, %s3696_s23  ;;  %v1085_v4 = vmul.f32 %v1084_v63, %v2928_v45 }
 0x194   : > { %v510_v8 = vpop.permute.xlu0 %509 }
 0x195   : > { %v515_v39 = vadd.f32 %v510_v8, %v502_v32 }
 0x196   : > { %822 = vrot.lane.b32.xlu1 %v817_v9, %s3688_s8  ;;  %948 = vrot.lane.b32.xlu0 %v944_v10, %s3698_s21 }
 0x198   : > { %v525_v13 = vpop.permute.xlu0 %524 }
 0x199   : > { %v530_v22 = vadd.f32 %v525_v13, %v515_v39 }
 0x19a   : > { %835 = vrot.lane.b32.xlu1 %v830_v14, %s3688_s8  ;;  %961 = vrot.lane.b32.xlu0 %v957_v15, %s3698_s21  ;;  %v973_v14 = vmul.f32 %v971_v17, %v2874_v16  ;;  %v1100_v15 = vmul.f32 %v1099_v6, %v2915_v37 }
 0x19c   : > { %v538_v18 = vpop.permute.xlu0 %537 }
 0x19d   : > { %v543_v44 = vadd.f32 %v538_v18, %v530_v22 }
 0x19e   : > { %866 = vrot.lane.b32.xlu1 %v861_v19, %s3694_s9  ;;  %976 = vrot.lane.b32.xlu0 %v972_v20, %s3690_s20  ;;  %v1112_v20 = vstv %s2959_s7  ;;  %s3119_s7 = sld [smem:[#allocation10 + $0x50]] }
 0x1a0   : > { %v553_v24 = vpop.permute.xlu0 %552 }
 0x1a1   : > { %v558_v47 = vadd.f32 %v553_v24, %v543_v44  ;;  %v1155_v44 = vstv %s3000_s15  ;;  %s3160_s15 = sld [smem:[#allocation10 + $0x21]] }
 0x1a2   : > { %879 = vrot.lane.b32.xlu1 %v874_v25, %s3694_s9  ;;  %989 = vrot.lane.b32.xlu0 %v985_v26, %s3690_s20  ;;  %s2950_s20 = sld [smem:[#allocation10 + $0x38]] }
 0x1a4   : > { %v566_v28 = vpop.permute.xlu0 %565 }
 0x1a5   : > { %v571_v54 = vadd.f32 %v566_v28, %v558_v47  ;;  %v1113_v28 = vmul.f32 %v1112_v20, %v2928_v45 }
 0x1a6   : > { %894 = vrot.lane.b32.xlu1 %v889_v29, %s3692_s24  ;;  %1004 = vrot.lane.b32.xlu0 %v1000_v30, %s3688_s8  ;;  %v1127_v30 = vstv %s2970_s30  ;;  %s3130_s30 = sld [smem:[#allocation10 + $0x20]] }
 0x1a8   : > { %v581_v33 = vpop.permute.xlu0 %580  ;;  %v668_v10 = vstv %s2950_s20  ;;  %s3106_s20 = sld [smem:[#allocation10 + $0xe]] }
 0x1a9   : > { %v586_v56 = vadd.f32 %v581_v33, %v571_v54  ;;  %v669_v17 = vmul.f32 %v668_v10, %v2715_v11  ;;  %v1001_v33 = vmul.f32 %v999_v27, %v2874_v16  ;;  %v1014_v27 = vmul.f32 %v1012_v31, %v2885_v21 }
 0x1aa   : > { %907 = vrot.lane.b32.xlu1 %v902_v35, %s3692_s24  ;;  %1017 = vrot.lane.b32.xlu0 %v1013_v36, %s3688_s8  ;;  %s2946_s8 = sld [smem:[#allocation10 + $0x7]]  ;;  %v1140_v35 = vstv %s2986_s6  ;;  %v1168_v54 = vstv %s3011_s1  ;;  %s3146_s6 = sld [smem:[#allocation10 + $0x51]] }
 0x1ab   : > { %s3171_s1 = sld [smem:[#allocation10 + $0x52]] }
 0x1ac   : > { %v594_v41 = vpop.permute.xlu0 %593 }
 0x1ad   : > { %v599_v62 = vadd.f32 %v594_v41, %v586_v56  ;;  %v1141_v41 = vmul.f32 %v1140_v35, %v2928_v45 }
 0x1ae   : > { %922 = vrot.lane.b32.xlu1 %v917_v42, %s3696_s23  ;;  %1048 = vrot.lane.b32.xlu0 %v1044_v43, %s3694_s9  ;;  %v3023_v42 = vld [vmem:[#allocation4 + $0xb] sm:$0xff] }
 0x1af   : > { %v1045_v31 = vmul.f32 %v1043_v40, %v3023_v42 }
 0x1b0   : > { %v2935_v49 = vpop.permute.xlu1 %498  ;;  %v609_v50 = vpop.permute.xlu0 %608  ;;  %v663_v8 = vstv %s2946_s8  ;;  %s3104_s8 = sld [smem:[#allocation10 + $0x1f]] }
 0x1b1   : > { %v614_v0 = vadd.f32 %v609_v50, %v599_v62  ;;  %v664_v18 = vmul.f32 %v663_v8, %v2704_v7  ;;  %v986_v7 = vmul.f32 %v984_v23, %v2885_v21  ;;  %v1128_v23 = vmul.f32 %v1127_v30, %v2915_v37 }
 0x1b2   : > { %935 = vrot.lane.b32.xlu1 %v930_v51, %s3696_s23  ;;  %1061 = vrot.lane.b32.xlu0 %v1057_v53, %s3694_s9  ;;  %s3721_s9 = smov 122   ;;  %v503_v36 = vadd.f32 %v2935_v49, %v2676_v60  ;;  %v1156_v50 = vmul.f32 %v1155_v44, %v2915_v37  ;;  %v3036_v53 = vld [vmem:[#allocation5 + $0xb] sm:$0xff]  ;;  %v1183_v62 = vstv %s3026_s12  ;;  %s3184_s12 = sld [smem:[#allocation10 + $0x22]] }
 0x1b3   : > { %v1058_v40 = vmul.f32 %v1056_v46, %v3036_v53  ;;  %v1184_v46 = vmul.f32 %v1183_v62, %v2915_v37 }
 0x1b4   : > { %v512_v57 = vpop.permute.xlu1 %511  ;;  %v622_v58 = vpop.permute.xlu0 %621 }
 0x1b5   : > { %v627_v5 = vadd.f32 %v622_v58, %v614_v0  ;;  %v516_v43 = vadd.f32 %v512_v57, %v503_v36  ;;  %v1240_v36 = vstv %s3061_s29  ;;  %s3219_s29 = sld [smem:[#allocation10 + $0x55]] }
 0x1b6   : > { %950 = vrot.lane.b32.xlu1 %v945_v59, %s3698_s21  ;;  %1076 = vrot.lane.b32.xlu0 %v1072_v61, %s3692_s24  ;;  %v1169_v59 = vmul.f32 %v1168_v54, %v2928_v45 }
 0x1b8   : > { %v527_v1 = vpop.permute.xlu1 %526  ;;  %v637_v2 = vpop.permute.xlu0 %636 }
 0x1b9   : > { %v642_v9 = vadd.f32 %v637_v2, %v627_v5  ;;  %v531_v60 = vadd.f32 %v527_v1, %v516_v43 }
 0x1ba   : > { %963 = vrot.lane.b32.xlu1 %v958_v3, %s3698_s21  ;;  %1089 = vrot.lane.b32.xlu0 %v1085_v4, %s3692_s24  ;;  %s3720_s24 = smov 123   ;;  %v1073_v3 = vmul.f32 %v1071_v55, %v3023_v42  ;;  %v1086_v55 = vmul.f32 %v1084_v63, %v3036_v53 }
 0x1bc   : > { %v540_v13 = vpop.permute.xlu1 %539  ;;  %v650_v12 = vpop.permute.xlu0 %649 }
 0x1bd   : > { %v655_v19 = vadd.f32 %v650_v12, %v642_v9  ;;  %v544_v51 = vadd.f32 %v540_v13, %v531_v60  ;;  %v1196_v9 = vstv %s3039_s2  ;;  %s3197_s2 = sld [smem:[#allocation10 + $0x53]] }
 0x1be   : > { %978 = vrot.lane.b32.xlu1 %v973_v14, %s3720_s24  ;;  %1104 = vrot.lane.b32.xlu0 %v1100_v15, %s3696_s23  ;;  %v1197_v15 = vmul.f32 %v1196_v9, %v2928_v45 }
 0x1bf   : > { %v666_v24 = vadd.f32 %v664_v18, %v655_v19 }
 0x1c0   : > { %v555_v25 = vpop.permute.xlu1 %554  ;;  %v681_v26 = vpop.permute.xlu0 %680 }
 0x1c1   : > { %v671_v29 = vadd.f32 %v669_v17, %v666_v24  ;;  %v559_v56 = vadd.f32 %v555_v25, %v544_v51  ;;  %v3071_v17 = vld [vmem:[#allocation4 + $0x4] sm:$0xff]  ;;  %v1227_v24 = vstv %s3050_s28  ;;  %v1268_v51 = vstv %s3090_s26  ;;  %s3208_s28 = sld [smem:[#allocation10 + $0x24]]  ;;  %s3248_s26 = sld [smem:[#allocation10 + $0x56]] }
 0x1c2   : > { %991 = vrot.lane.b32.xlu1 %v986_v7, %s3720_s24  ;;  %1117 = vrot.lane.b32.xlu0 %v1113_v28, %s3696_s23  ;;  %s3722_s23 = smov 127   ;;  %v1101_v28 = vmul.f32 %v1099_v6, %v3023_v42  ;;  %v670_v6 = vmul.f32 %v668_v10, %v2783_v38 }
 0x1c3   : > { %v686_v4 = vadd.f32 %v681_v26, %v671_v29  ;;  %v1228_v29 = vmul.f32 %v1227_v24, %v3071_v17 }
 0x1c4   : > { %v568_v11 = vpop.permute.xlu1 %567  ;;  %v694_v32 = vpop.permute.xlu0 %693 }
 0x1c5   : > { %v572_v61 = vadd.f32 %v568_v11, %v559_v56  ;;  %v699_v18 = vadd.f32 %v694_v32, %v686_v4  ;;  %v665_v11 = vmul.f32 %v663_v8, %v2774_v34  ;;  %v1114_v8 = vmul.f32 %v1112_v20, %v3036_v53 }
 0x1c6   : > { %1006 = vrot.lane.b32.xlu1 %v1001_v33, %s3721_s9  ;;  %1132 = vrot.lane.b32.xlu0 %v1128_v23, %s3698_s21  ;;  %v3087_v23 = vld [vmem:[#allocation5 + $0x4] sm:$0xff] }
 0x1c8   : > { %v583_v39 = vpop.permute.xlu1 %582  ;;  %v709_v22 = vpop.permute.xlu0 %708 }
 0x1c9   : > { %v587_v0 = vadd.f32 %v583_v39, %v572_v61  ;;  %v714_v25 = vadd.f32 %v709_v22, %v699_v18  ;;  %v1283_v61 = vstv %s3104_s8  ;;  %s3262_s8 = sld [smem:[#allocation10 + $0x26]] }
 0x1ca   : > { %1019 = vrot.lane.b32.xlu1 %v1014_v27, %s3721_s9  ;;  %1145 = vrot.lane.b32.xlu0 %v1141_v41, %s3698_s21  ;;  %s3723_s21 = smov 126   ;;  %v1241_v41 = vmul.f32 %v1240_v36, %v3087_v23  ;;  %v1284_v4 = vmul.f32 %v1283_v61, %v3071_v17 }
 0x1cc   : > { %v596_v47 = vpop.permute.xlu1 %595  ;;  %v722_v49 = vpop.permute.xlu0 %721 }
 0x1cd   : > { %v600_v5 = vadd.f32 %v596_v47, %v587_v0  ;;  %v727_v32 = vadd.f32 %v722_v49, %v714_v25  ;;  %v1255_v47 = vstv %s3074_s27  ;;  %v1129_v49 = vmul.f32 %v1127_v30, %v3023_v42  ;;  %s3232_s27 = sld [smem:[#allocation10 + $0x25]] }
 0x1ce   : > { %1050 = vrot.lane.b32.xlu1 %v1045_v31, %s3722_s23  ;;  %1160 = vrot.lane.b32.xlu0 %v1156_v50, %s3720_s24  ;;  %v1256_v31 = vmul.f32 %v1255_v47, %v3071_v17  ;;  %v1142_v30 = vmul.f32 %v1140_v35, %v3036_v53  ;;  %v847_v0 = vstv %s3106_s20  ;;  %v1311_v25 = vstv %s3130_s30  ;;  %s3264_s20 = sld [smem:[#allocation10 + $0x15]]  ;;  %s3288_s30 = sld [smem:[#allocation10 + $0x27]] }
 0x1d0   : > { %v611_v57 = vpop.permute.xlu1 %610  ;;  %v737_v58 = vpop.permute.xlu0 %736 }
 0x1d1   : > { %v615_v13 = vadd.f32 %v611_v57, %v600_v5  ;;  %v742_v39 = vadd.f32 %v737_v58, %v727_v32  ;;  %v848_v5 = vmul.f32 %v847_v0, %v2806_v48  ;;  %v1170_v48 = vmul.f32 %v1168_v54, %v3036_v53 }
 0x1d2   : > { %1063 = vrot.lane.b32.xlu1 %v1058_v40, %s3722_s23  ;;  %1173 = vrot.lane.b32.xlu0 %v1169_v59, %s3720_s24  ;;  %v1269_v40 = vmul.f32 %v1268_v51, %v3087_v23  ;;  %v1312_v54 = vmul.f32 %v1311_v25, %v3071_v17  ;;  %v1198_v32 = vmul.f32 %v1196_v9, %v3036_v53 }
 0x1d4   : > { %v624_v1 = vpop.permute.xlu1 %623  ;;  %v750_v2 = vpop.permute.xlu0 %749 }
 0x1d5   : > { %v628_v19 = vadd.f32 %v624_v1, %v615_v13  ;;  %v755_v43 = vadd.f32 %v750_v2, %v742_v39  ;;  %v852_v2 = vstv %s3110_s3  ;;  %v1339_v39 = vstv %s3160_s15  ;;  %s3274_s3 = sld [smem:[#allocation10 + $0x46]]  ;;  %s3318_s15 = sld [smem:[#allocation10 + $0x28]] }
 0x1d6   : > { %1078 = vrot.lane.b32.xlu1 %v1073_v3, %s3723_s21  ;;  %1188 = vrot.lane.b32.xlu0 %v1184_v46, %s3721_s9  ;;  %v1157_v46 = vmul.f32 %v1155_v44, %v3023_v42 }
 0x1d8   : > { %v639_v12 = vpop.permute.xlu1 %638  ;;  %v765_v14 = vpop.permute.xlu0 %764 }
 0x1d9   : > { %v643_v26 = vadd.f32 %v639_v12, %v628_v19  ;;  %v770_v38 = vadd.f32 %v765_v14, %v755_v43  ;;  %v1296_v12 = vstv %s3119_s7  ;;  %v853_v14 = vmul.f32 %v852_v2, %v2815_v52  ;;  %v3194_v43 = vld [vmem:[#allocation5 + $0xc] sm:$0xff]  ;;  %s3277_s7 = sld [smem:[#allocation10 + $0x57]] }
 0x1da   : > { %1091 = vrot.lane.b32.xlu1 %v1086_v55, %s3723_s21  ;;  %1201 = vrot.lane.b32.xlu0 %v1197_v15, %s3721_s9  ;;  %v1297_v18 = vmul.f32 %v1296_v12, %v3087_v23 }
 0x1dc   : > { %v652_v7 = vpop.permute.xlu1 %651  ;;  %v778_v63 = vpop.permute.xlu0 %777 }
 0x1dd   : > { %v656_v33 = vadd.f32 %v652_v7, %v643_v26  ;;  %v783_v50 = vadd.f32 %v778_v63, %v770_v38  ;;  %v1185_v7 = vmul.f32 %v1183_v62, %v3023_v42 }
 0x1de   : > { %1106 = vrot.lane.b32.xlu1 %v1101_v28, %s3724_s0  ;;  %1232 = vrot.lane.b32.xlu0 %v1228_v29, %s3722_s23  ;;  %v1324_v28 = vstv %s3146_s6  ;;  %s3304_s6 = sld [smem:[#allocation10 + $0x58]] }
 0x1df   : > { %v667_v22 = vadd.f32 %v665_v11, %v656_v33  ;;  %v1325_v62 = vmul.f32 %v1324_v28, %v3087_v23 }
 0x1e0   : > { %v683_v27 = vpop.permute.xlu1 %682  ;;  %v793_v34 = vpop.permute.xlu0 %792 }
 0x1e1   : > { %v672_v60 = vadd.f32 %v670_v6, %v667_v22  ;;  %v798_v56 = vadd.f32 %v793_v34, %v783_v50  ;;  %v3181_v6 = vld [vmem:[#allocation4 + $0xc] sm:$0xff]  ;;  %v1367_v50 = vstv %s3184_s12  ;;  %s3342_s12 = sld [smem:[#allocation10 + $0x29]] }
 0x1e2   : > { %1119 = vrot.lane.b32.xlu1 %v1114_v8, %s3724_s0  ;;  %1245 = vrot.lane.b32.xlu0 %v1241_v41, %s3722_s23  ;;  %v1229_v9 = vmul.f32 %v1227_v24, %v3181_v6  ;;  %v1340_v8 = vmul.f32 %v1339_v39, %v3071_v17  ;;  %v1242_v24 = vmul.f32 %v1240_v36, %v3194_v43 }
 0x1e3   : > { %v687_v63 = vadd.f32 %v683_v27, %v672_v60  ;;  %v1352_v60 = vstv %s3171_s1  ;;  %v1368_v36 = vmul.f32 %v1367_v50, %v3071_v17  ;;  %s3329_s1 = sld [smem:[#allocation10 + $0x59]] }
 0x1e4   : > { %v696_v10 = vpop.permute.xlu1 %695  ;;  %v806_v20 = vpop.permute.xlu0 %805 }
 0x1e5   : > { %v811_v59 = vadd.f32 %v806_v20, %v798_v56  ;;  %v700_v33 = vadd.f32 %v696_v10, %v687_v63  ;;  %v1424_v63 = vstv %s3219_s29  ;;  %s3377_s29 = sld [smem:[#allocation10 + $0x5c]] }
 0x1e6   : > { %1134 = vrot.lane.b32.xlu1 %v1129_v49, %s3725_s18  ;;  %1260 = vrot.lane.b32.xlu0 %v1256_v31, %s3723_s21  ;;  %v1353_v49 = vmul.f32 %v1352_v60, %v3087_v23 }
 0x1e8   : > { %v711_v57 = vpop.permute.xlu1 %710  ;;  %v821_v58 = vpop.permute.xlu0 %820 }
 0x1e9   : > { %v826_v1 = vadd.f32 %v821_v58, %v811_v59  ;;  %v715_v22 = vadd.f32 %v711_v57, %v700_v33 }
 0x1ea   : > { %1147 = vrot.lane.b32.xlu1 %v1142_v30, %s3725_s18  ;;  %1273 = vrot.lane.b32.xlu0 %v1269_v40, %s3723_s21  ;;  %v1257_v30 = vmul.f32 %v1255_v47, %v3181_v6  ;;  %v1270_v47 = vmul.f32 %v1268_v51, %v3194_v43 }
 0x1ec   : > { %v724_v3 = vpop.permute.xlu1 %723  ;;  %v834_v35 = vpop.permute.xlu0 %833 }
 0x1ed   : > { %v839_v13 = vadd.f32 %v834_v35, %v826_v1  ;;  %v728_v41 = vadd.f32 %v724_v3, %v715_v22  ;;  %v1380_v1 = vstv %s3197_s2  ;;  %s3355_s2 = sld [smem:[#allocation10 + $0x5a]] }
 0x1ee   : > { %1162 = vrot.lane.b32.xlu1 %v1157_v46, %s3720_s24  ;;  %1288 = vrot.lane.b32.xlu0 %v1284_v4, %s3724_s0  ;;  %v1381_v4 = vmul.f32 %v1380_v1, %v3087_v23 }
 0x1ef   : > { %v850_v44 = vadd.f32 %v848_v5, %v839_v13 }
 0x1f0   : > { %v739_v55 = vpop.permute.xlu1 %738  ;;  %v865_v15 = vpop.permute.xlu0 %864 }
 0x1f1   : > { %v855_v19 = vadd.f32 %v853_v14, %v850_v44  ;;  %v743_v38 = vadd.f32 %v739_v55, %v728_v41  ;;  %v3229_v14 = vld [vmem:[#allocation4 + $0x5] sm:$0xff]  ;;  %v1411_v44 = vstv %s3208_s28  ;;  %v1452_v41 = vstv %s3248_s26  ;;  %s3366_s28 = sld [smem:[#allocation10 + $0x2b]]  ;;  %s3406_s26 = sld [smem:[#allocation10 + $0x5d]] }
 0x1f2   : > { %1175 = vrot.lane.b32.xlu1 %v1170_v48, %s3720_s24  ;;  %1301 = vrot.lane.b32.xlu0 %v1297_v18, %s3724_s0  ;;  %v1285_v18 = vmul.f32 %v1283_v61, %v3181_v6  ;;  %v854_v61 = vmul.f32 %v852_v2, %v2885_v21 }
 0x1f3   : > { %v870_v40 = vadd.f32 %v865_v15, %v855_v19  ;;  %v1412_v19 = vmul.f32 %v1411_v44, %v3229_v14 }
 0x1f4   : > { %v752_v52 = vpop.permute.xlu1 %751  ;;  %v878_v26 = vpop.permute.xlu0 %877 }
 0x1f5   : > { %v756_v31 = vadd.f32 %v752_v52, %v743_v38  ;;  %v883_v5 = vadd.f32 %v878_v26, %v870_v40  ;;  %v849_v52 = vmul.f32 %v847_v0, %v2874_v16 }
 0x1f6   : > { %1190 = vrot.lane.b32.xlu1 %v1185_v7, %s3721_s9  ;;  %1316 = vrot.lane.b32.xlu0 %v1312_v54, %s3725_s18  ;;  %v3245_v54 = vld [vmem:[#allocation5 + $0x5] sm:$0xff] }
 0x1f8   : > { %v767_v29 = vpop.permute.xlu1 %766  ;;  %v893_v11 = vpop.permute.xlu0 %892 }
 0x1f9   : > { %v771_v56 = vadd.f32 %v767_v29, %v756_v31  ;;  %v898_v55 = vadd.f32 %v893_v11, %v883_v5  ;;  %v1467_v31 = vstv %s3262_s8  ;;  %s3420_s8 = sld [smem:[#allocation10 + $0x2d]] }
 0x1fa   : > { %1203 = vrot.lane.b32.xlu1 %v1198_v32, %s3721_s9  ;;  %1329 = vrot.lane.b32.xlu0 %v1325_v62, %s3725_s18  ;;  %v1298_v32 = vmul.f32 %v1296_v12, %v3194_v43  ;;  %v1425_v62 = vmul.f32 %v1424_v63, %v3245_v54  ;;  %v1468_v40 = vmul.f32 %v1467_v31, %v3229_v14 }
 0x1fc   : > { %v780_v27 = vpop.permute.xlu1 %779  ;;  %v906_v34 = vpop.permute.xlu0 %905 }
 0x1fd   : > { %v784_v59 = vadd.f32 %v780_v27, %v771_v56  ;;  %v911_v26 = vadd.f32 %v906_v34, %v898_v55  ;;  %v1439_v27 = vstv %s3232_s27  ;;  %v1313_v34 = vmul.f32 %v1311_v25, %v3181_v6  ;;  %s3390_s27 = sld [smem:[#allocation10 + $0x2c]] }
 0x1fe   : > { %1234 = vrot.lane.b32.xlu1 %v1229_v9, %s3722_s23  ;;  %1344 = vrot.lane.b32.xlu0 %v1340_v8, %s3720_s24  ;;  %v1440_v9 = vmul.f32 %v1439_v27, %v3229_v14  ;;  %v1031_v56 = vstv %s3264_s20  ;;  %v1495_v55 = vstv %s3288_s30  ;;  %s3424_s20 = sld [smem:[#allocation10 + $0x1c]]  ;;  %s3446_s30 = sld [smem:[#allocation10 + $0x2e]] }
 0x200   : > { %v795_v10 = vpop.permute.xlu1 %794  ;;  %v921_v20 = vpop.permute.xlu0 %920 }
 0x201   : > { %v799_v3 = vadd.f32 %v795_v10, %v784_v59  ;;  %v926_v29 = vadd.f32 %v921_v20, %v911_v26  ;;  %v1326_v20 = vmul.f32 %v1324_v28, %v3194_v43  ;;  %v1032_v59 = vmul.f32 %v1031_v56, %v2915_v37 }
 0x202   : > { %1247 = vrot.lane.b32.xlu1 %v1242_v24, %s3722_s23  ;;  %1357 = vrot.lane.b32.xlu0 %v1353_v49, %s3720_s24  ;;  %v1453_v24 = vmul.f32 %v1452_v41, %v3245_v54  ;;  %v1354_v37 = vmul.f32 %v1352_v60, %v3194_v43  ;;  %v1369_v60 = vmul.f32 %v1367_v50, %v3181_v6 }
 0x204   : > { %v808_v57 = vpop.permute.xlu1 %807  ;;  %v934_v58 = vpop.permute.xlu0 %933 }
 0x205   : > { %v812_v13 = vadd.f32 %v808_v57, %v799_v3  ;;  %v939_v33 = vadd.f32 %v934_v58, %v926_v29 }
 0x206   : > { %1262 = vrot.lane.b32.xlu1 %v1257_v30, %s3723_s21  ;;  %1372 = vrot.lane.b32.xlu0 %v1368_v36, %s3721_s9  ;;  %v1036_v30 = vstv %s3274_s3  ;;  %v1341_v36 = vmul.f32 %v1339_v39, %v3181_v6  ;;  %s3432_s3 = sld [smem:[#allocation10 + $0x4d]] }
 0x208   : > { %v823_v35 = vpop.permute.xlu1 %822  ;;  %v949_v46 = vpop.permute.xlu0 %948 }
 0x209   : > { %v827_v15 = vadd.f32 %v823_v35, %v812_v13  ;;  %v954_v21 = vadd.f32 %v949_v46, %v939_v33  ;;  %v1480_v35 = vstv %s3277_s7  ;;  %v1037_v46 = vmul.f32 %v1036_v30, %v2928_v45  ;;  %s3435_s7 = sld [smem:[#allocation10 + $0x5e]] }
 0x20a   : > { %1275 = vrot.lane.b32.xlu1 %v1270_v47, %s3723_s21  ;;  %1385 = vrot.lane.b32.xlu0 %v1381_v4, %s3721_s9  ;;  %v1481_v5 = vmul.f32 %v1480_v35, %v3245_v54 }
 0x20c   : > { %v836_v48 = vpop.permute.xlu1 %835  ;;  %v962_v51 = vpop.permute.xlu0 %961 }
 0x20d   : > { %v840_v7 = vadd.f32 %v836_v48, %v827_v15  ;;  %v967_v8 = vadd.f32 %v962_v51, %v954_v21  ;;  %v1496_v51 = vmul.f32 %v1495_v55, %v3229_v14 }
 0x20e   : > { %1290 = vrot.lane.b32.xlu1 %v1285_v18, %s3724_s0  ;;  %1416 = vrot.lane.b32.xlu0 %v1412_v19, %s3722_s23 }
 0x20f   : > { %v851_v11 = vadd.f32 %v849_v52, %v840_v7  ;;  %v1508_v52 = vstv %s3304_s6  ;;  %s3462_s6 = sld [smem:[#allocation10 + $0x5f]] }
 0x210   : > { %v867_v16 = vpop.permute.xlu1 %866  ;;  %v977_v0 = vpop.permute.xlu0 %976  ;;  %v1509_v50 = vmul.f32 %v1508_v52, %v3245_v54 }
 0x211   : > { %v856_v22 = vadd.f32 %v854_v61, %v851_v11  ;;  %v982_v38 = vadd.f32 %v977_v0, %v967_v8  ;;  %v1382_v61 = vmul.f32 %v1380_v1, %v3194_v43  ;;  %v1523_v0 = vstv %s3318_s15  ;;  %s3476_s15 = sld [smem:[#allocation10 + $0x2f]] }
 0x212   : > { %1303 = vrot.lane.b32.xlu1 %v1298_v32, %s3724_s0  ;;  %1429 = vrot.lane.b32.xlu0 %v1425_v62, %s3722_s23 }
 0x213   : > { %v871_v18 = vadd.f32 %v867_v16, %v856_v22  ;;  %v3339_v16 = vld [vmem:[#allocation4 + $0xd] sm:$0xff]  ;;  %v1524_v22 = vmul.f32 %v1523_v0, %v3229_v14 }
 0x214   : > { %v880_v2 = vpop.permute.xlu1 %879  ;;  %v990_v12 = vpop.permute.xlu0 %989  ;;  %v1413_v33 = vmul.f32 %v1411_v44, %v3339_v16 }
 0x215   : > { %v995_v49 = vadd.f32 %v990_v12, %v982_v38  ;;  %v884_v29 = vadd.f32 %v880_v2, %v871_v18  ;;  %v3352_v12 = vld [vmem:[#allocation5 + $0xd] sm:$0xff] }
 0x216   : > { %1318 = vrot.lane.b32.xlu1 %v1313_v34, %s3725_s18  ;;  %1444 = vrot.lane.b32.xlu0 %v1440_v9, %s3723_s21  ;;  %v1536_v34 = vstv %s3329_s1  ;;  %v1426_v38 = vmul.f32 %v1424_v63, %v3352_v12  ;;  %v1441_v63 = vmul.f32 %v1439_v27, %v3339_v16  ;;  %v1454_v27 = vmul.f32 %v1452_v41, %v3352_v12  ;;  %s3487_s1 = sld [smem:[#allocation10 + $0x60]] }
 0x218   : > { %v895_v10 = vpop.permute.xlu1 %894  ;;  %v1005_v25 = vpop.permute.xlu0 %1004 }
 0x219   : > { %v1010_v57 = vadd.f32 %v1005_v25, %v995_v49  ;;  %v899_v32 = vadd.f32 %v895_v10, %v884_v29  ;;  %v1537_v10 = vmul.f32 %v1536_v34, %v3245_v54 }
 0x21a   : > { %1331 = vrot.lane.b32.xlu1 %v1326_v20, %s3725_s18  ;;  %1457 = vrot.lane.b32.xlu0 %v1453_v24, %s3723_s21  ;;  %v1551_v24 = vstv %s3342_s12  ;;  %s3500_s12 = sld [smem:[#allocation10 + $0x30]] }
 0x21c   : > { %v908_v58 = vpop.permute.xlu1 %907  ;;  %v1018_v28 = vpop.permute.xlu0 %1017 }
 0x21d   : > { %v1023_v3 = vadd.f32 %v1018_v28, %v1010_v57  ;;  %v912_v21 = vadd.f32 %v908_v58, %v899_v32  ;;  %v1552_v28 = vmul.f32 %v1551_v24, %v3229_v14 }
 0x21e   : > { %1346 = vrot.lane.b32.xlu1 %v1341_v36, %s3720_s24  ;;  %1472 = vrot.lane.b32.xlu0 %v1468_v40, %s3724_s0 }
 0x21f   : > { %v1034_v39 = vadd.f32 %v1032_v59, %v1023_v3  ;;  %v1564_v59 = vstv %s3355_s2  ;;  %s3513_s2 = sld [smem:[#allocation10 + $0x61]] }
 0x220   : > { %v923_v47 = vpop.permute.xlu1 %922  ;;  %v1049_v4 = vpop.permute.xlu0 %1048 }
 0x221   : > { %v1039_v13 = vadd.f32 %v1037_v46, %v1034_v39  ;;  %v927_v9 = vadd.f32 %v923_v47, %v912_v21  ;;  %v1565_v47 = vmul.f32 %v1564_v59, %v3245_v54 }
 0x222   : > { %1359 = vrot.lane.b32.xlu1 %v1354_v37, %s3720_s24  ;;  %1485 = vrot.lane.b32.xlu0 %v1481_v5, %s3724_s0  ;;  %v3387_v5 = vld [vmem:[#allocation4 + $0x6] sm:$0xff] }
 0x223   : > { %v1054_v45 = vadd.f32 %v1049_v4, %v1039_v13  ;;  %v1595_v13 = vstv %s3366_s28 }
 0x224   : > { %v936_v15 = vpop.permute.xlu1 %935  ;;  %v1062_v48 = vpop.permute.xlu0 %1061 }
 0x225   : > { %v1067_v19 = vadd.f32 %v1062_v48, %v1054_v45  ;;  %v940_v25 = vadd.f32 %v936_v15, %v927_v9  ;;  %v1469_v48 = vmul.f32 %v1467_v31, %v3339_v16  ;;  %v1038_v31 = vmul.f32 %v1036_v30, %v3036_v53 }
 0x226   : > { %1374 = vrot.lane.b32.xlu1 %v1369_v60, %s3721_s9  ;;  %1500 = vrot.lane.b32.xlu0 %v1496_v51, %s3725_s18  ;;  %v1596_v60 = vmul.f32 %v1595_v13, %v3387_v5  ;;  %v1033_v51 = vmul.f32 %v1031_v56, %v3023_v42  ;;  %v1482_v56 = vmul.f32 %v1480_v35, %v3352_v12 }
 0x228   : > { %v951_v26 = vpop.permute.xlu1 %950  ;;  %v1077_v7 = vpop.permute.xlu0 %1076 }
 0x229   : > { %v1082_v11 = vadd.f32 %v1077_v7, %v1067_v19  ;;  %v955_v49 = vadd.f32 %v951_v26, %v940_v25  ;;  %v3403_v26 = vld [vmem:[#allocation5 + $0x6] sm:$0xff]  ;;  %v1608_v7 = vstv %s3377_s29  ;;  %v1215_v25 = vstv %s3424_s20 }
 0x22a   : > { %1387 = vrot.lane.b32.xlu1 %v1382_v61, %s3721_s9  ;;  %1513 = vrot.lane.b32.xlu0 %v1509_v50, %s3725_s18  ;;  %v1609_v29 = vmul.f32 %v1608_v7, %v3403_v26 }
 0x22c   : > { %v964_v62 = vpop.permute.xlu1 %963  ;;  %v1090_v1 = vpop.permute.xlu0 %1089 }
 0x22d   : > { %v1095_v2 = vadd.f32 %v1090_v1, %v1082_v11  ;;  %v968_v36 = vadd.f32 %v964_v62, %v955_v49  ;;  %v1623_v62 = vstv %s3390_s27  ;;  %v1497_v1 = vmul.f32 %v1495_v55, %v3339_v16 }
 0x22e   : > { %1418 = vrot.lane.b32.xlu1 %v1413_v33, %s3722_s23  ;;  %1528 = vrot.lane.b32.xlu0 %v1524_v22, %s3720_s24  ;;  %v1624_v33 = vmul.f32 %v1623_v62, %v3387_v5 }
 0x230   : > { %v979_v8 = vpop.permute.xlu1 %978  ;;  %v1105_v44 = vpop.permute.xlu0 %1104 }
 0x231   : > { %v1110_v20 = vadd.f32 %v1105_v44, %v1095_v2  ;;  %v983_v3 = vadd.f32 %v979_v8, %v968_v36  ;;  %v1636_v2 = vstv %s3406_s26  ;;  %v1510_v8 = vmul.f32 %v1508_v52, %v3352_v12 }
 0x232   : > { %1431 = vrot.lane.b32.xlu1 %v1426_v38, %s3722_s23  ;;  %1541 = vrot.lane.b32.xlu0 %v1537_v10, %s3720_s24  ;;  %v1637_v44 = vmul.f32 %v1636_v2, %v3403_v26  ;;  %v1651_v10 = vstv %s3420_s8  ;;  %v1216_v36 = vmul.f32 %v1215_v25, %v3071_v17  ;;  %v1538_v17 = vmul.f32 %v1536_v34, %v3352_v12 }
 0x233   : > { %v1553_v34 = vmul.f32 %v1551_v24, %v3339_v16 }
 0x234   : > { %v992_v57 = vpop.permute.xlu1 %991  ;;  %v1118_v58 = vpop.permute.xlu0 %1117 }
 0x235   : > { %v1123_v40 = vadd.f32 %v1118_v58, %v1110_v20  ;;  %v996_v4 = vadd.f32 %v992_v57, %v983_v3  ;;  %v1220_v57 = vstv %s3432_s3  ;;  %v1525_v58 = vmul.f32 %v1523_v0, %v3339_v16 }
 0x236   : > { %1446 = vrot.lane.b32.xlu1 %v1441_v63, %s3723_s21  ;;  %1556 = vrot.lane.b32.xlu0 %v1552_v28, %s3721_s9  ;;  %v1652_v63 = vmul.f32 %v1651_v10, %v3387_v5  ;;  %v1664_v3 = vstv %s3435_s7  ;;  %v1221_v0 = vmul.f32 %v1220_v57, %v3087_v23 }
 0x238   : > { %v1007_v46 = vpop.permute.xlu1 %1006  ;;  %v1133_v39 = vpop.permute.xlu0 %1132 }
 0x239   : > { %v1138_v37 = vadd.f32 %v1133_v39, %v1123_v40  ;;  %v1011_v45 = vadd.f32 %v1007_v46, %v996_v4 }
 0x23a   : > { %1459 = vrot.lane.b32.xlu1 %v1454_v27, %s3723_s21  ;;  %1569 = vrot.lane.b32.xlu0 %v1565_v47, %s3721_s9  ;;  %v1665_v47 = vmul.f32 %v1664_v3, %v3403_v26 }
 0x23c   : > { %v1020_v15 = vpop.permute.xlu1 %1019  ;;  %v1146_v41 = vpop.permute.xlu0 %1145 }
 0x23d   : > { %v1024_v18 = vadd.f32 %v1020_v15, %v1011_v45  ;;  %v1151_v19 = vadd.f32 %v1146_v41, %v1138_v37  ;;  %v1679_v45 = vstv %s3446_s30 }
 0x23e   : > { %1474 = vrot.lane.b32.xlu1 %v1469_v48, %s3724_s0  ;;  %1600 = vrot.lane.b32.xlu0 %v1596_v60, %s3722_s23  ;;  %v1680_v41 = vmul.f32 %v1679_v45, %v3387_v5  ;;  %v1692_v60 = vstv %s3462_s6 }
 0x23f   : > { %v1035_v61 = vadd.f32 %v1033_v51, %v1024_v18  ;;  %v1693_v24 = vmul.f32 %v1692_v60, %v3403_v26 }
 0x240   : > { %v1051_v50 = vpop.permute.xlu1 %1050  ;;  %v1161_v42 = vpop.permute.xlu0 %1160 }
 0x241   : > { %v1040_v11 = vadd.f32 %v1038_v31, %v1035_v61  ;;  %v1166_v32 = vadd.f32 %v1161_v42, %v1151_v19  ;;  %v1566_v19 = vmul.f32 %v1564_v59, %v3352_v12  ;;  %v3497_v61 = vld [vmem:[#allocation4 + $0xe] sm:$0xff] }
 0x242   : > { %1487 = vrot.lane.b32.xlu1 %v1482_v56, %s3724_s0  ;;  %1613 = vrot.lane.b32.xlu0 %v1609_v29, %s3722_s23  ;;  %v1597_v59 = vmul.f32 %v1595_v13, %v3497_v61 }
 0x243   : > { %v1055_v53 = vadd.f32 %v1051_v50, %v1040_v11  ;;  %v1707_v50 = vstv %s3476_s15 }
 0x244   : > { %v1064_v30 = vpop.permute.xlu1 %1063  ;;  %v1174_v35 = vpop.permute.xlu0 %1173  ;;  %v1708_v29 = vmul.f32 %v1707_v50, %v3387_v5 }
 0x245   : > { %v1068_v22 = vadd.f32 %v1064_v30, %v1055_v53  ;;  %v1179_v21 = vadd.f32 %v1174_v35, %v1166_v32  ;;  %v3510_v32 = vld [vmem:[#allocation5 + $0xe] sm:$0xff]  ;;  %v1720_v53 = vstv %s3487_s1 }
 0x246   : > { %1502 = vrot.lane.b32.xlu1 %v1497_v1, %s3725_s18  ;;  %1628 = vrot.lane.b32.xlu0 %v1624_v33, %s3723_s21  ;;  %v1610_v13 = vmul.f32 %v1608_v7, %v3510_v32  ;;  %v1721_v1 = vmul.f32 %v1720_v53, %v3403_v26 }
 0x248   : > { %v1079_v9 = vpop.permute.xlu1 %1078  ;;  %v1189_v55 = vpop.permute.xlu0 %1188 }
 0x249   : > { %v1083_v38 = vadd.f32 %v1079_v9, %v1068_v22  ;;  %v1194_v20 = vadd.f32 %v1189_v55, %v1179_v21  ;;  %v1735_v22 = vstv %s3500_s12  ;;  %v1625_v55 = vmul.f32 %v1623_v62, %v3497_v61 }
 0x24a   : > { %1515 = vrot.lane.b32.xlu1 %v1510_v8, %s3725_s18  ;;  %1641 = vrot.lane.b32.xlu0 %v1637_v44, %s3723_s21  ;;  %v1736_v8 = vmul.f32 %v1735_v22, %v3387_v5 }
 0x24c   : > { %v1092_v49 = vpop.permute.xlu1 %1091  ;;  %v1202_v52 = vpop.permute.xlu0 %1201 }
 0x24d   : > { %v1096_v28 = vadd.f32 %v1092_v49, %v1083_v38  ;;  %v1207_v40 = vadd.f32 %v1202_v52, %v1194_v20  ;;  %v1748_v38 = vstv %s3513_s2  ;;  %v1638_v52 = vmul.f32 %v1636_v2, %v3510_v32 }
 0x24e   : > { %1530 = vrot.lane.b32.xlu1 %v1525_v58, %s3720_s24  ;;  %1656 = vrot.lane.b32.xlu0 %v1652_v63, %s3724_s0  ;;  %v1749_v62 = vmul.f32 %v1748_v38, %v3403_v26  ;;  %v1217_v2 = vmul.f32 %v1215_v25, %v3181_v6 }
 0x24f   : > { %v1218_v46 = vadd.f32 %v1216_v36, %v1207_v40 }
 0x250   : > { %v1107_v39 = vpop.permute.xlu1 %1106  ;;  %v1233_v27 = vpop.permute.xlu0 %1232 }
 0x251   : > { %v1223_v4 = vadd.f32 %v1221_v0, %v1218_v46  ;;  %v1111_v37 = vadd.f32 %v1107_v39, %v1096_v28  ;;  %v1653_v0 = vmul.f32 %v1651_v10, %v3497_v61 }
 0x252   : > { %1543 = vrot.lane.b32.xlu1 %v1538_v17, %s3720_s24  ;;  %1669 = vrot.lane.b32.xlu0 %v1665_v47, %s3724_s0  ;;  %v1222_v17 = vmul.f32 %v1220_v57, %v3194_v43  ;;  %v1681_v43 = vmul.f32 %v1679_v45, %v3497_v61 }
 0x253   : > { %v1238_v7 = vadd.f32 %v1233_v27, %v1223_v4 }
 0x254   : > { %v1120_v23 = vpop.permute.xlu1 %1119  ;;  %v1246_v15 = vpop.permute.xlu0 %1245 }
 0x255   : > { %v1124_v48 = vadd.f32 %v1120_v23, %v1111_v37  ;;  %v1251_v58 = vadd.f32 %v1246_v15, %v1238_v7  ;;  %v1666_v23 = vmul.f32 %v1664_v3, %v3510_v32 }
 0x256   : > { %1558 = vrot.lane.b32.xlu1 %v1553_v34, %s3721_s9  ;;  %1684 = vrot.lane.b32.xlu0 %v1680_v41, %s3725_s18 }
 0x258   : > { %v1135_v51 = vpop.permute.xlu1 %1134  ;;  %v1261_v18 = vpop.permute.xlu0 %1260 }
 0x259   : > { %v1139_v31 = vadd.f32 %v1135_v51, %v1124_v48  ;;  %v1266_v63 = vadd.f32 %v1261_v18, %v1251_v58  ;;  %v1694_v51 = vmul.f32 %v1692_v60, %v3510_v32 }
 0x25a   : > { %1571 = vrot.lane.b32.xlu1 %v1566_v19, %s3721_s9  ;;  %1697 = vrot.lane.b32.xlu0 %v1693_v24, %s3725_s18 }
 0x25c   : > { %v1148_v42 = vpop.permute.xlu1 %1147  ;;  %v1274_v56 = vpop.permute.xlu0 %1273 }
 0x25d   : > { %v1152_v11 = vadd.f32 %v1148_v42, %v1139_v31  ;;  %v1279_v46 = vadd.f32 %v1274_v56, %v1266_v63  ;;  %v1709_v42 = vmul.f32 %v1707_v50, %v3497_v61 }
 0x25e   : > { %1602 = vrot.lane.b32.xlu1 %v1597_v59, %s3722_s23  ;;  %1712 = vrot.lane.b32.xlu0 %v1708_v29, %s3720_s24 }
 0x260   : > { %v1163_v30 = vpop.permute.xlu1 %1162  ;;  %v1289_v35 = vpop.permute.xlu0 %1288 }
 0x261   : > { %v1167_v33 = vadd.f32 %v1163_v30, %v1152_v11  ;;  %v1294_v27 = vadd.f32 %v1289_v35, %v1279_v46 }
 0x262   : > { %1615 = vrot.lane.b32.xlu1 %v1610_v13, %s3722_s23  ;;  %1725 = vrot.lane.b32.xlu0 %v1721_v1, %s3720_s24  ;;  %s3557_s23 = sld [smem:[#allocation10 + $0x23]]  ;;  %v1722_v13 = vmul.f32 %v1720_v53, %v3510_v32 }
 0x264   : > { %v1176_v21 = vpop.permute.xlu1 %1175  ;;  %v1302_v9 = vpop.permute.xlu0 %1301 }
 0x265   : > { %v1180_v44 = vadd.f32 %v1176_v21, %v1167_v33  ;;  %v1307_v10 = vadd.f32 %v1302_v9, %v1294_v27 }
 0x266   : > { %1630 = vrot.lane.b32.xlu1 %v1625_v55, %s3723_s21  ;;  %1740 = vrot.lane.b32.xlu0 %v1736_v8, %s3721_s9 }
 0x268   : > { %v1191_v20 = vpop.permute.xlu1 %1190  ;;  %v1317_v49 = vpop.permute.xlu0 %1316  ;;  %v1399_v19 = vstv %s3557_s23 }
 0x269   : > { %v1195_v28 = vadd.f32 %v1191_v20, %v1180_v44  ;;  %v1322_v6 = vadd.f32 %v1317_v49, %v1307_v10  ;;  %v1400_v59 = vmul.f32 %v1399_v19, %v3229_v14  ;;  %v1737_v14 = vmul.f32 %v1735_v22, %v3497_v61 }
 0x26a   : > { %1643 = vrot.lane.b32.xlu1 %v1638_v52, %s3723_s21  ;;  %1753 = vrot.lane.b32.xlu0 %v1749_v62, %s3721_s9  ;;  %s3562_s21 = sld [smem:[#allocation10 + $0x54]] }
 0x26c   : > { %v1204_v36 = vpop.permute.xlu1 %1203  ;;  %v1330_v40 = vpop.permute.xlu0 %1329 }
 0x26d   : > { %v1208_v39 = vadd.f32 %v1204_v36, %v1195_v28  ;;  %v1335_v57 = vadd.f32 %v1330_v40, %v1322_v6 }
 0x26e   : > { %1658 = vrot.lane.b32.xlu1 %v1653_v0, %s3724_s0 }
 0x26f   : > { %v1219_v47 = vadd.f32 %v1217_v2, %v1208_v39 }
 0x270   : > { %v1235_v4 = vpop.permute.xlu1 %1234  ;;  %v1345_v37 = vpop.permute.xlu0 %1344  ;;  %v1404_v56 = vstv %s3562_s21 }
 0x271   : > { %v1224_v15 = vadd.f32 %v1222_v17, %v1219_v47  ;;  %v1350_v3 = vadd.f32 %v1345_v37, %v1335_v57  ;;  %v1405_v11 = vmul.f32 %v1404_v56, %v3245_v54  ;;  %v1750_v54 = vmul.f32 %v1748_v38, %v3510_v32 }
 0x272   : > { %1671 = vrot.lane.b32.xlu1 %v1666_v23, %s3724_s0  ;;  %v1401_v23 = vmul.f32 %v1399_v19, %v3339_v16  ;;  %s3591_s0 = sld [smem:[#allocation10 + $0x2a]] }
 0x273   : > { %v1239_v21 = vadd.f32 %v1235_v4, %v1224_v15 }
 0x274   : > { %v1248_v25 = vpop.permute.xlu1 %1247  ;;  %v1358_v34 = vpop.permute.xlu0 %1357 }
 0x275   : > { %v1363_v18 = vadd.f32 %v1358_v34, %v1350_v3  ;;  %v1252_v8 = vadd.f32 %v1248_v25, %v1239_v21  ;;  %v1406_v25 = vmul.f32 %v1404_v56, %v3352_v12 }
 0x276   : > { %1686 = vrot.lane.b32.xlu1 %v1681_v43, %s3725_s18 }
 0x278   : > { %v1263_v41 = vpop.permute.xlu1 %1262  ;;  %v1373_v48 = vpop.permute.xlu0 %1372 }
 0x279   : > { %v1378_v24 = vadd.f32 %v1373_v48, %v1363_v18  ;;  %v1267_v53 = vadd.f32 %v1263_v41, %v1252_v8 }
 0x27a   : > { %1699 = vrot.lane.b32.xlu1 %v1694_v51, %s3725_s18  ;;  %s3593_s18 = sld [smem:[#allocation10 + $0x5b]] }
 0x27c   : > { %v1276_v31 = vpop.permute.xlu1 %1275  ;;  %v1386_v45 = vpop.permute.xlu0 %1385 }
 0x27d   : > { %v1391_v29 = vadd.f32 %v1386_v45, %v1378_v24  ;;  %v1280_v20 = vadd.f32 %v1276_v31, %v1267_v53  ;;  %v1583_v45 = vstv %s3591_s0 }
 0x27e   : > { %1714 = vrot.lane.b32.xlu1 %v1709_v42, %s3720_s24 }
 0x27f   : > { %v1402_v60 = vadd.f32 %v1400_v59, %v1391_v29  ;;  %v1584_v29 = vmul.f32 %v1583_v45, %v3387_v5 }
 0x280   : > { %v1291_v30 = vpop.permute.xlu1 %1290  ;;  %v1417_v35 = vpop.permute.xlu0 %1416  ;;  %v1588_v59 = vstv %s3593_s18 }
 0x281   : > { %v1407_v1 = vadd.f32 %v1405_v11, %v1402_v60  ;;  %v1295_v49 = vadd.f32 %v1291_v30, %v1280_v20  ;;  %v1589_v30 = vmul.f32 %v1588_v59, %v3403_v26 }
 0x282   : > { %1727 = vrot.lane.b32.xlu1 %v1722_v13, %s3720_s24 }
 0x283   : > { %v1422_v36 = vadd.f32 %v1417_v35, %v1407_v1 }
 0x284   : > { %v1304_v33 = vpop.permute.xlu1 %1303  ;;  %v1430_v50 = vpop.permute.xlu0 %1429 }
 0x285   : > { %v1308_v58 = vadd.f32 %v1304_v33, %v1295_v49  ;;  %v1435_v38 = vadd.f32 %v1430_v50, %v1422_v36 }
 0x286   : > { %1742 = vrot.lane.b32.xlu1 %v1737_v14, %s3721_s9 }
 0x288   : > { %v1319_v9 = vpop.permute.xlu1 %1318  ;;  %v1445_v55 = vpop.permute.xlu0 %1444 }
 0x289   : > { %v1323_v22 = vadd.f32 %v1319_v9, %v1308_v58  ;;  %v1450_v27 = vadd.f32 %v1445_v55, %v1435_v38 }
 0x28a   : > { %1755 = vrot.lane.b32.xlu1 %v1750_v54, %s3721_s9 }
 0x28c   : > { %v1332_v7 = vpop.permute.xlu1 %1331  ;;  %v1458_v44 = vpop.permute.xlu0 %1457 }
 0x28d   : > { %v1336_v40 = vadd.f32 %v1332_v7, %v1323_v22  ;;  %v1463_v37 = vadd.f32 %v1458_v44, %v1450_v27 }
 0x290   : > { %v1347_v52 = vpop.permute.xlu1 %1346  ;;  %v1473_v62 = vpop.permute.xlu0 %1472 }
 0x291   : > { %v1351_v0 = vadd.f32 %v1347_v52, %v1336_v40  ;;  %v1478_v15 = vadd.f32 %v1473_v62, %v1463_v37 }
 0x294   : > { %v1360_v63 = vpop.permute.xlu1 %1359  ;;  %v1486_v28 = vpop.permute.xlu0 %1485 }
 0x295   : > { %v1364_v39 = vadd.f32 %v1360_v63, %v1351_v0  ;;  %v1491_v57 = vadd.f32 %v1486_v28, %v1478_v15 }
 0x298   : > { %v1375_v46 = vpop.permute.xlu1 %1374  ;;  %v1501_v2 = vpop.permute.xlu0 %1500 }
 0x299   : > { %v1379_v17 = vadd.f32 %v1375_v46, %v1364_v39  ;;  %v1506_v41 = vadd.f32 %v1501_v2, %v1491_v57 }
 0x29c   : > { %v1388_v47 = vpop.permute.xlu1 %1387  ;;  %v1514_v4 = vpop.permute.xlu0 %1513 }
 0x29d   : > { %v1392_v10 = vadd.f32 %v1388_v47, %v1379_v17  ;;  %v1519_v18 = vadd.f32 %v1514_v4, %v1506_v41  ;;  %v1585_v17 = vmul.f32 %v1583_v45, %v3497_v61 }
 0x29f   : > { %v1403_v6 = vadd.f32 %v1401_v23, %v1392_v10  ;;  %v1590_v23 = vmul.f32 %v1588_v59, %v3510_v32 }
 0x2a0   : > { %v1419_v34 = vpop.permute.xlu1 %1418  ;;  %v1529_v43 = vpop.permute.xlu0 %1528 }
 0x2a1   : > { %v1408_v3 = vadd.f32 %v1406_v25, %v1403_v6  ;;  %v1534_v16 = vadd.f32 %v1529_v43, %v1519_v18 }
 0x2a3   : > { %v1423_v14 = vadd.f32 %v1419_v34, %v1408_v3 }
 0x2a4   : > { %v1432_v48 = vpop.permute.xlu1 %1431  ;;  %v1542_v51 = vpop.permute.xlu0 %1541 }
 0x2a5   : > { %v1547_v31 = vadd.f32 %v1542_v51, %v1534_v16  ;;  %v1436_v55 = vadd.f32 %v1432_v48, %v1423_v14 }
 0x2a8   : > { %v1447_v19 = vpop.permute.xlu1 %1446  ;;  %v1557_v24 = vpop.permute.xlu0 %1556 }
 0x2a9   : > { %v1562_v12 = vadd.f32 %v1557_v24, %v1547_v31  ;;  %v1451_v54 = vadd.f32 %v1447_v19, %v1436_v55 }
 0x2ac   : > { %v1460_v42 = vpop.permute.xlu1 %1459  ;;  %v1570_v56 = vpop.permute.xlu0 %1569 }
 0x2ad   : > { %v1575_v60 = vadd.f32 %v1570_v56, %v1562_v12  ;;  %v1464_v7 = vadd.f32 %v1460_v42, %v1451_v54 }
 0x2af   : > { %v1586_v11 = vadd.f32 %v1584_v29, %v1575_v60 }
 0x2b0   : > { %v1475_v35 = vpop.permute.xlu1 %1474  ;;  %v1601_v13 = vpop.permute.xlu0 %1600 }
 0x2b1   : > { %v1591_v1 = vadd.f32 %v1589_v30, %v1586_v11  ;;  %v1479_v44 = vadd.f32 %v1475_v35, %v1464_v7 }
 0x2b3   : > { %v1606_v58 = vadd.f32 %v1601_v13, %v1591_v1 }
 0x2b4   : > { %v1488_v33 = vpop.permute.xlu1 %1487  ;;  %v1614_v50 = vpop.permute.xlu0 %1613 }
 0x2b5   : > { %v1492_v49 = vadd.f32 %v1488_v33, %v1479_v44  ;;  %v1619_v40 = vadd.f32 %v1614_v50, %v1606_v58 }
 0x2b8   : > { %v1503_v21 = vpop.permute.xlu1 %1502  ;;  %v1629_v9 = vpop.permute.xlu0 %1628 }
 0x2b9   : > { %v1507_v52 = vadd.f32 %v1503_v21, %v1492_v49  ;;  %v1634_v46 = vadd.f32 %v1629_v9, %v1619_v40 }
 0x2bc   : > { %v1516_v8 = vpop.permute.xlu1 %1515  ;;  %v1642_v53 = vpop.permute.xlu0 %1641 }
 0x2bd   : > { %v1520_v22 = vadd.f32 %v1516_v8, %v1507_v52  ;;  %v1647_v27 = vadd.f32 %v1642_v53, %v1634_v46 }
 0x2c0   : > { %v1531_v20 = vpop.permute.xlu1 %1530  ;;  %v1657_v5 = vpop.permute.xlu0 %1656 }
 0x2c1   : > { %v1535_v63 = vadd.f32 %v1531_v20, %v1520_v22  ;;  %v1662_v4 = vadd.f32 %v1657_v5, %v1647_v27 }
 0x2c4   : > { %v1544_v62 = vpop.permute.xlu1 %1543  ;;  %v1670_v26 = vpop.permute.xlu0 %1669 }
 0x2c5   : > { %v1548_v0 = vadd.f32 %v1544_v62, %v1535_v63  ;;  %v1675_v6 = vadd.f32 %v1670_v26, %v1662_v4 }
 0x2c8   : > { %v1559_v28 = vpop.permute.xlu1 %1558  ;;  %v1685_v36 = vpop.permute.xlu0 %1684 }
 0x2c9   : > { %v1563_v2 = vadd.f32 %v1559_v28, %v1548_v0  ;;  %v1690_v34 = vadd.f32 %v1685_v36, %v1675_v6 }
 0x2cc   : > { %v1572_v38 = vpop.permute.xlu1 %1571  ;;  %v1698_v39 = vpop.permute.xlu0 %1697 }
 0x2cd   : > { %v1576_v47 = vadd.f32 %v1572_v38, %v1563_v2  ;;  %v1703_v3 = vadd.f32 %v1698_v39, %v1690_v34 }
 0x2cf   : > { %v1587_v37 = vadd.f32 %v1585_v17, %v1576_v47 }
 0x2d0   : > { %v1603_v10 = vpop.permute.xlu1 %1602  ;;  %v1713_v15 = vpop.permute.xlu0 %1712 }
 0x2d1   : > { %v1592_v25 = vadd.f32 %v1590_v23, %v1587_v37  ;;  %v1718_v41 = vadd.f32 %v1713_v15, %v1703_v3 }
 0x2d3   : > { %v1607_v12 = vadd.f32 %v1603_v10, %v1592_v25 }
 0x2d4   : > { %v1616_v43 = vpop.permute.xlu1 %1615  ;;  %v1726_v57 = vpop.permute.xlu0 %1725 }
 0x2d5   : > { %v1731_v18 = vadd.f32 %v1726_v57, %v1718_v41  ;;  %v1620_v56 = vadd.f32 %v1616_v43, %v1607_v12 }
 0x2d8   : > { %v1631_v48 = vpop.permute.xlu1 %1630  ;;  %v1741_v51 = vpop.permute.xlu0 %1740 }
 0x2d9   : > { %v1746_v16 = vadd.f32 %v1741_v51, %v1731_v18  ;;  %v1635_v29 = vadd.f32 %v1631_v48, %v1620_v56 }
 0x2dc   : > { %v1644_v19 = vpop.permute.xlu1 %1643  ;;  %v1754_v61 = vpop.permute.xlu0 %1753 }
 0x2dd   : > { %v1759_v24 = vadd.f32 %v1754_v61, %v1746_v16  ;;  %v1648_v30 = vadd.f32 %v1644_v19, %v1635_v29 }
 0x2df   : > { %v2002_v31 = vmul.f32 -1.442695, %v1759_v24 }
 0x2e0   : > { %v1659_v45 = vpop.permute.xlu1 %1658 }
 0x2e1   : > { %2142 = vpow2.f32 %v2002_v31  ;;  %v1663_v35 = vadd.f32 %v1659_v45, %v1648_v30 }
 0x2e4   : > { %v1672_v32 = vpop.permute.xlu1 %1671 }
 0x2e5   : > { %v1676_v1 = vadd.f32 %v1672_v32, %v1663_v35 }
 0x2e8   : > { %v1687_v42 = vpop.permute.xlu1 %1686 }
 0x2e9   : > { %v1691_v33 = vadd.f32 %v1687_v42, %v1676_v1 }
 0x2eb   : > { %v2143_v59 = vpop.eup %2142 }
 0x2ec   : > { %v1767_v60 = vadd.f32 1.0, %v2143_v59  ;;  %v1700_v11 = vpop.permute.xlu1 %1699 }
 0x2ed   : > { %v1704_v14 = vadd.f32 %v1700_v11, %v1691_v33 }
 0x2ee   : > { %2144 = vrcp.f32 %v1767_v60 }
 0x2f0   : > { %v1715_v13 = vpop.permute.xlu1 %1714 }
 0x2f1   : > { %v1719_v21 = vadd.f32 %v1715_v13, %v1704_v14 }
 0x2f4   : > { %v1728_v50 = vpop.permute.xlu1 %1727 }
 0x2f5   : > { %v1732_v54 = vadd.f32 %v1728_v50, %v1719_v21 }
 0x2f8   : > { %v2145_v9 = vpop.eup %2144  ;;  %v1743_v55 = vpop.permute.xlu1 %1742 }
 0x2f9   : > { %1774 = vst.msk [vmem:[%s2537_s22] sm:$0xff] %vm1773_vm5, %v2145_v9  ;;  %v1747_v8 = vadd.f32 %v1743_v55, %v1732_v54 }
 0x2fc   : > { %v1756_v53 = vpop.permute.xlu1 %1755 }
 0x2fd   : > { %v1760_v7 = vadd.f32 %v1756_v53, %v1747_v8 }
 0x2ff   : > { %v2003_v44 = vmul.f32 -1.442695, %v1760_v7 }
 0x301   : > { %2146 = vpow2.f32 %v2003_v44 }
 0x30b   : > { %v2147_v20 = vpop.eup %2146 }
 0x30c   : > { %v1768_v5 = vadd.f32 1.0, %v2147_v20 }
 0x30e   : > { %2148 = vrcp.f32 %v1768_v5 }
 0x318   : > { %v2149_v49 = vpop.eup %2148 }
 0x319   : > { %1775 = vst.msk [vmem:[%s2537_s22 + $0x8] sm:$0xff] %vm1773_vm5, %v2149_v49 }
 0x31a PF: > { %s2009_s9 = sshll.u32 %s2309_s16, 8  ;;  %s3726_s29 = sld [smem:[#allocation22_spill]] }
 0x31b   : > { %s1790_s26 = sshll.u32 %s2537_s22, 4  ;;  %s3727_s8 = sand.u32 1, %s2285_s10   ;;  %s3610_s26 = int_to_ptr.vmem [resolvable:$true] %s1790_s26 }
 0x31c   : > { %s3614_s20 = scalar_lea.sflag [#allocation8], %s3727_s8  ;;  %s2195_s3 = scalar_lea.vmem %s3610_s26, 256 }
 0x31d   : > { %p2196_p9 = scmp.ne.s32.totalorder %s3610_s26, %s2195_s3  ;;  %p3728_p12 = scmp.ne.s32.totalorder %s3708_s25, 0 }
 0x31e   : > { %s2342_s16 = smov [#allocation11]  }
 0x31f   : > { %p2197_p13 = pnand %p2196_p9, %p3728_p12  ;;  %s2199_s7 = sshll.u32 %s2342_s16, 4  ;;  %s2200_s7 = int_to_ptr.vmem [resolvable:$false] %s2199_s7 }
 0x320   : > { %s3607_s27 = scalar_lea.hbm %s3726_s29, %s2009_s9  ;;  %s2201_s30 = scalar_lea.vmem %s2200_s7, 512 }
 0x321   : > { %p2198_p0 = pneg %p2197_p13  ;;  %p2202_p4 = scmp.lt.s32.totalorder %s3610_s26, %s2200_s7 }
 0x322   : > { %p2203_p6 = scmp.lt.s32.totalorder %s2201_s30, %s2195_s3 }
 0x324   : > { %p2204_p10 = por %p2203_p6, %p2202_p4 }
 0x326   : > { %p2205_p3 = pnand %p2204_p10, %p2198_p0 }
 0x328   : > { %2208 = shalt.err (!%p2205_p3)
}
 0x329   : > { %s2209_s22 = scalar_lea.hbm %s3607_s27, 256  ;;  %s2213_s1 = scalar_lea.hbm %s3726_s29, 512 }
 0x32a   : > { %p2210_p7 = scmp.ne.s32.totalorder %s3607_s27, %s2209_s22  ;;  %p2214_p11 = scmp.lt.u32.totalorder %s3607_s27, %s3726_s29 }
 0x32b   : > { %p2215_p2 = scmp.lt.u32.totalorder %s2213_s1, %s2209_s22  ;;  %p2217_p9 = scmp.lt.u32.totalorder %s2209_s22, %s3607_s27 }
 0x32c   : > { %p2211_p5 = pnand %p2210_p7, %p3728_p12 }
 0x32d   : > { %p2216_p8 = por %p2215_p2, %p2214_p11 }
 0x32e   : > { %p2212_p1 = pneg %p2211_p5 }
 0x32f   : > { %p2218_p13 = por %p2217_p9, %p2216_p8 }
 0x331   : > { %p2219_p0 = pnand %p2218_p13, %p2212_p1 }
 0x333   : > { %2222 = shalt.err (!%p2219_p0)
}
 0x334   : > { %s2343_s23 = smov 128   ;;  %s2344_s21 = smov 8  }
 0x335   : > { %2016 = dma.vmem_to_hbm [thread:$0]  (%p3728_p12), %s3610_s26, 256, %s3607_s27, %s3614_s20, %s2343_s23, %s2343_s23, %s2344_s21  }
 0x336 PF: > { %s3729_s0 = sld [smem:[#allocation15_spill]]  ;;  %s3730_s18 = sld [smem:[#allocation17_spill]] }
 0x337   : > { %p2033_p4 = scmp.ge.s32.totalorder %s2321_s19, 2 }
 0x33c   : > { %s1805_s9 = sand.u32 1, %s3729_s0   ;;  %p3731_p6 = scmp.ne.s32.totalorder %s3730_s18, 0 }
 0x33d   : > { %s1806_s24 = scalar_lea.sflag [#allocation8], %s1805_s9 }
 0x33e   : > { %p2027_p10 = pnand %p2033_p4, %p3731_p6 }
 0x340   : > { %2276 = dma.done.wait (!%p2027_p10), %s1806_s24, 256  }
 0x341   : > { %2278 = vsyncadd (!%p2027_p10), %s1806_s24, 4294967040  ;;  %s19_s19 = sadd.s32 1, %s2321_s19   ;;  %s3732_s16 = sld [smem:[#allocation16_spill]] }
 0x342   : > { %p16_p3 = scmp.ge.s32.totalorder %s19_s19, 6   ;;  %s3733_s25 = sld [smem:[#allocation18_spill]] }
 0x343   : > { %s3734_s18 = sld [smem:[#allocation19_spill]]  ;;  %s3735_s9 = smov %s2285_s10 }
 0x344   : > { %s3736_s10 = smov %s2289_s11  ;;  %s3737_s11 = smov %s2477_s4 }
 0x345   : > { %s3738_s12 = smov %s2297_s13  ;;  %s3739_s13 = smov %s2301_s14 }
 0x346   : > { %s3740_s14 = smov %s2480_s5  ;;  %s3741_s15 = smov %s2313_s17 }
 0x347   :  { %18 = sbr.rel (!%p16_p3) target bundleno = 14 (0xe), region = 90 }
 0x348   : > { %s3742_s17 = smov %s3733_s25 }
 0x34e   :  { %1811 = vsyncpa [#allocation7], 1 }
 0x34f   :  { %1813 = vsyncpa [#allocation7 + $0x1], 1 }
 0x350   :  { %1814 = vsyncpa [#allocation8], 1 }
 0x351   :  { %1816 = vsyncpa [#allocation8 + $0x1], 1 }
 0x352   :  { %1817 = vsyncpa [#allocation9], 1 }
 0x353   :  { %1819 = vsyncpa [#allocation9 + $0x1], 1 }

</bundles_post_ra>
